<compile_context>
chip_gen: v6e
topology: v6e:2x2x1
jax: 0.10.0
libtpu: 0.0.40
codegen_flags: <defaults>
</compile_context>

<pallas_src>
import functools
import math

import jax
import jax.numpy as jnp
from jax import lax
from jax.experimental import pallas as pl
from jax.experimental.pallas import tpu as pltpu


def nca_kernel(x_ref, masks_ref, bias_ref, wbig_ref, wstep_ref, gamma_ref,
               beta_ref, wfc1_ref, bfc1_ref, out_ref, *, steps, P, Q, nb):
    """All `steps` NCA updates for `nb` lane-stacked batch elements.

    grid = (B // nb,).  The lane axis holds nb concatenated HW = P*Q segments.

    x_ref     : (1, Cn, L)       initial state, L = nb * P * Q
    masks_ref : (1, steps, L)    per-step fire masks (rand > fire_rate)
    bias_ref  : (1, hidden, L)   fc0 bias + pos_x/pos_y + conv bias + alive
    wbig_ref  : (hidden, 10*Cn)  [fc0_x | fold(conv3x3, fc0_y) for 9 taps]
    wstep_ref : (hidden, 1)      fc0 column for the step encoding
    gamma_ref, beta_ref : (hidden, 1)  GroupNorm(1, hidden) affine params
    wfc1_ref  : (Cn, hidden)     fc1 weight, frozen channels zeroed
    bfc1_ref  : (Cn, 1)          fc1 bias,   frozen channels zeroed
    out_ref   : (1, Cn, L)       final state
    """
    Cn = x_ref.shape[1]
    L = x_ref.shape[2]                 # total lane width = nb * P * Q
    seg = P * Q                        # per-batch segment length
    hidden = wbig_ref.shape[0]

    # Reflect-pad boundary masks, computed and pre-broadcast to (Cn, L) ONCE
    # (JAX does not CSE broadcast_in_dim; every select below reuses these).
    lane = lax.broadcasted_iota(jnp.int32, (1, L), 1)
    lane_seg = lane % seg              # position within a batch segment
    col = lane % Q                     # column within a row
    first_row = jnp.broadcast_to(lane_seg < Q, (Cn, L))
    last_row = jnp.broadcast_to(lane_seg >= seg - Q, (Cn, L))
    first_col = jnp.broadcast_to(col == 0, (Cn, L))
    last_col = jnp.broadcast_to(col == Q - 1, (Cn, L))

    inv_n = 1.0 / float(hidden * seg)
    step_scale = 1.0 / float(steps)

    # pltpu.roll follows jnp.roll semantics: roll(a, s)[..., j] = a[..., j - s].
    # Rolls wrap around the full lane length L; the boundary selects repair
    # both the reflect padding AND any cross-segment wrap when nb > 1.
    def shift_p(a, oh):
        up = pltpu.roll(a, Q, 1)          # row p <- row p-1
        dn = pltpu.roll(a, L - Q, 1)      # row p <- row p+1
        if oh == -1:
            return jnp.where(first_row, dn, up)   # reflect: row 0 uses row 1
        return jnp.where(last_row, up, dn)        # reflect: last row uses P-2

    def shift_q(a, ow):
        le = pltpu.roll(a, 1, 1)          # col q <- col q-1
        ri = pltpu.roll(a, L - 1, 1)      # col q <- col q+1
        if ow == -1:
            return jnp.where(first_col, ri, le)   # reflect: col 0 uses col 1
        return jnp.where(last_col, le, ri)        # reflect: last col uses Q-2

    x = x_ref[0]
    # Fully unrolled steps loop (static trip count; only the tiny state `x`
    # is live across iterations, so vreg pressure stays low).
    for s in range(steps):
        # --- perceive: identity + 9 reflect-shifted taps, single matmul ----
        rows = (shift_p(x, -1), x, shift_p(x, 1))
        pieces = [x]
        for r in rows:
            pieces.append(shift_q(r, -1))
            pieces.append(r)
            pieces.append(shift_q(r, 1))
        im2col = jnp.concatenate(pieces, axis=0)               # (10*Cn, L)

        # --- fc0 (conv3x3 + identity branch folded in) + encodings ---------
        h = jnp.dot(wbig_ref[...], im2col,
                    preferred_element_type=jnp.float32) + bias_ref[0]
        if s:                                                  # step encoding
            h = h + wstep_ref[...] * float(s * step_scale)

        # --- GroupNorm(1, hidden) per batch segment, folded scale/shift ----
        gamma = gamma_ref[...]
        beta = beta_ref[...]
        parts = []
        for k in range(nb):
            hk = h[:, k * seg:(k + 1) * seg]
            mean = jnp.sum(hk) * inv_n
            var = jnp.maximum(jnp.sum(hk * hk) * inv_n - mean * mean, 0.0)
            scale = gamma * lax.rsqrt(var + 1e-5)              # (hidden, 1)
            shift = beta - mean * scale
            hn = hk * scale + shift
            parts.append(jnp.maximum(hn, 0.01 * hn))           # leaky_relu
        hl = parts[0] if nb == 1 else jnp.concatenate(parts, axis=1)

        # --- fc1 (frozen channels already zeroed in the weights) -----------
        dxo = (jnp.dot(wfc1_ref[...], hl,
                       preferred_element_type=jnp.float32) + bfc1_ref[...])

        # --- stochastic fire mask + residual update ------------------------
        m = masks_ref[0, s:s + 1, :]                           # (1, L)
        x = x + dxo * m

    out_ref[0] = x


def _stack_lanes(a, nb):
    """(B, M, HW) -> (B//nb, M, nb*HW); lanes ordered [elem 0 | elem 1 | ...]."""
    if nb == 1:
        return a
    B, M, HW = a.shape
    return (a.reshape(B // nb, nb, M, HW)
             .transpose(0, 2, 1, 3)
             .reshape(B // nb, M, nb * HW))


def _unstack_lanes(a, nb, HW):
    """Inverse of _stack_lanes."""
    if nb == 1:
        return a
    G, M, L = a.shape
    return (a.reshape(G, M, nb, HW)
             .transpose(0, 2, 1, 3)
             .reshape(G * nb, M, HW))


def _default_batch_stack(batch):
    """Lane-stack 2 batch elements per grid step when it cannot idle a core.

    v5e/v6e have a single TensorCore, so stacking always helps there; on an
    unknown / 2-TC chip (v7x) we only stack if at least 2 grid points remain.
    """
    if batch % 2 != 0:
        return 1
    if batch >= 4:
        return 2
    try:
        kind = jax.devices()[0].device_kind.lower()
    except Exception:
        return 1
    single_tc = any(tag in kind for tag in
                    ("v5e", "v5 lite", "v5lite", "v6e", "v6 lite", "v6lite"))
    return 2 if single_tc else 1


def init_params(key, channel_n, hidden_size, extra_channels=4):
    """Synthetic parameters in the torch module's (squeezed) shapes."""
    Cin = 2 * channel_n + extra_channels
    ks = jax.random.split(key, 6)
    # real_p0_real: Conv2d(Cn, Cn, 3, reflect) -> weight (out, in, kh, kw)
    w_conv = (jax.random.normal(ks[0], (channel_n, channel_n, 3, 3), jnp.float32)
              / math.sqrt(channel_n * 9))
    b_conv = 0.1 * jax.random.normal(ks[1], (channel_n,), jnp.float32)
    # real_fc0_real: Conv2d(Cin, hidden, 1) -> (hidden, Cin)
    w_fc0 = (jax.random.normal(ks[2], (hidden_size, Cin), jnp.float32)
             / math.sqrt(Cin))
    b_fc0 = 0.1 * jax.random.normal(ks[3], (hidden_size,), jnp.float32)
    # real_norm_real2: GroupNorm(1, hidden) affine (torch default init)
    gamma = jnp.ones((hidden_size,), jnp.float32)
    beta = jnp.zeros((hidden_size,), jnp.float32)
    # real_fc1_real: Conv2d(hidden, Cn, 1) -> (Cn, hidden)
    w_fc1 = (jax.random.normal(ks[4], (channel_n, hidden_size), jnp.float32)
             / math.sqrt(hidden_size))
    b_fc1 = 0.1 * jax.random.normal(ks[5], (channel_n,), jnp.float32)
    return dict(w_conv=w_conv, b_conv=b_conv, w_fc0=w_fc0, b_fc0=b_fc0,
                gamma=gamma, beta=beta, w_fc1=w_fc1, b_fc1=b_fc1)


def diffusion_nca_forward(x, t, params, mask_key, *, steps, fire_rate,
                          input_channels, batch_stack=None):
    """Equivalent of DiffusionNCA_fft2_attention.forward(x, steps, fire_rate, t)."""
    B = x.shape[0]

    # ---- FFT block (plain-JAX glue; exact identity round trip on real x) ----
    # TODO(synk): no Pallas FFT primitive; kept as XLA ops outside the kernel.
    xt = jnp.transpose(x, (0, 3, 2, 1))            # torch x.transpose(1, 3)
    pixel_X = pixel_Y = 16
    X = jnp.fft.fft2(xt, norm='forward')
    X = jnp.fft.fftshift(X, axes=(2, 3))
    x_old = X
    xs, ys = X.shape[2] // 2, X.shape[3] // 2
    Xc = X[..., xs:xs + pixel_X, ys:ys + pixel_Y]
    xr = jnp.concatenate([Xc.real, Xc.imag], axis=1)
    xr = jnp.transpose(xr, (0, 3, 2, 1))
    half = xr.shape[3] // 2
    Xc2 = lax.complex(xr[..., :half], xr[..., half:])
    Xc2 = jnp.transpose(Xc2, (0, 3, 2, 1))
    x_old = x_old.at[:, input_channels:, xs:xs + pixel_X, ys:ys + pixel_Y].set(
        Xc2[:, input_channels:])
    x_old = jnp.fft.ifftshift(x_old, axes=(2, 3))
    x_sp = jnp.fft.ifft2(x_old, norm='forward').real.astype(jnp.float32)

    _, Cn, P, Q = x_sp.shape
    assert P > 1 and Q > 1, "positional linspace requires spatial dims > 1"
    HW = P * Q
    x_flat = x_sp.reshape(B, Cn, HW)               # channels-first, lane-dense

    # ---- fold parameters for the fused kernel --------------------------------
    w_conv = params['w_conv']                      # (Cn, Cn, 3, 3)
    b_conv = params['b_conv']                      # (Cn,)
    w_fc0 = params['w_fc0']                        # (hidden, 2*Cn + 4)
    b_fc0 = params['b_fc0']                        # (hidden,)
    w_fc1 = params['w_fc1']                        # (Cn, hidden)
    b_fc1 = params['b_fc1']                        # (Cn,)
    hidden = w_fc0.shape[0]

    wx = w_fc0[:, :Cn]                             # fc0 identity branch
    wy = w_fc0[:, Cn:2 * Cn]                       # fc0 conv (y1) branch
    taps = [wy @ w_conv[:, :, dh, dw] for dh in range(3) for dw in range(3)]
    w_big = jnp.concatenate([wx] + taps, axis=1)   # (hidden, 10*Cn)

    # positional encodings + fc0 bias + conv bias folded into one map
    pos_x = 1.0 - jnp.arange(Q, dtype=jnp.float32) / (Q - 1)   # linspace(1,0,Q)
    pos_y = 1.0 - jnp.arange(P, dtype=jnp.float32) / (P - 1)   # linspace(1,0,P)
    pos_x_flat = jnp.tile(pos_x, P)                # varies with q
    pos_y_flat = jnp.repeat(pos_y, Q)              # varies with p
    static_bias = (w_fc0[:, 2 * Cn:2 * Cn + 1] * pos_x_flat[None, :]
                   + w_fc0[:, 2 * Cn + 1:2 * Cn + 2] * pos_y_flat[None, :]
                   + (b_fc0 + wy @ b_conv)[:, None])            # (hidden, HW)
    alive_w = w_fc0[:, 2 * Cn + 2]                 # alive_rate column
    bias_full = (static_bias[None, :, :]
                 + t.astype(jnp.float32)[:, None, None] * alive_w[None, :, None])
    w_step = w_fc0[:, 2 * Cn + 3:2 * Cn + 4]       # (hidden, 1)

    # fold the frozen-channel mask (channels < input_channels) into fc1
    cmask = (jnp.arange(Cn) >= input_channels).astype(jnp.float32)
    w_fc1m = w_fc1 * cmask[:, None]
    b_fc1m = (b_fc1 * cmask)[:, None]

    # per-step stochastic fire masks, (B, steps, HW): no degenerate trailing
    # dim -> no 8x sublane padding in HBM or VMEM.
    u = jax.random.uniform(mask_key, (B, steps, HW), jnp.float32)
    masks = (u > fire_rate).astype(jnp.float32)

    # ---- optional lane-stacking of batch elements -----------------------------
    nb = _default_batch_stack(B) if batch_stack is None else batch_stack
    if nb < 1 or B % nb != 0:
        nb = 1
    G = B // nb
    L = nb * HW
    x_stk = _stack_lanes(x_flat, nb)               # (G, Cn, L)
    bias_stk = _stack_lanes(bias_full, nb)         # (G, hidden, L)
    masks_stk = _stack_lanes(masks, nb)            # (G, steps, L)

    kernel = functools.partial(nca_kernel, steps=steps, P=P, Q=Q, nb=nb)

    out_stk = pl.pallas_call(
        kernel,
        out_shape=jax.ShapeDtypeStruct((G, Cn, L), jnp.float32),
        grid=(G,),
        in_specs=[
            pl.BlockSpec((1, Cn, L), lambda g: (g, 0, 0)),        # state
            pl.BlockSpec((1, steps, L), lambda g: (g, 0, 0)),     # fire masks
            pl.BlockSpec((1, hidden, L), lambda g: (g, 0, 0)),    # folded bias
            pl.BlockSpec((hidden, 10 * Cn), lambda g: (0, 0)),    # fused W
            pl.BlockSpec((hidden, 1), lambda g: (0, 0)),          # step col
            pl.BlockSpec((hidden, 1), lambda g: (0, 0)),          # GN gamma
            pl.BlockSpec((hidden, 1), lambda g: (0, 0)),          # GN beta
            pl.BlockSpec((Cn, hidden), lambda g: (0, 0)),         # fc1 w
            pl.BlockSpec((Cn, 1), lambda g: (0, 0)),              # fc1 b
        ],
        out_specs=pl.BlockSpec((1, Cn, L), lambda g: (g, 0, 0)),
        input_output_aliases={0: 0},
        compiler_params=pltpu.CompilerParams(
            dimension_semantics=("parallel",)),
    )(x_stk, masks_stk, bias_stk, w_big, w_step,
      params['gamma'][:, None], params['beta'][:, None], w_fc1m, b_fc1m)

    out_flat = _unstack_lanes(out_stk, nb, HW)
    x_nchw = out_flat.reshape(B, Cn, P, Q)
    return jnp.transpose(x_nchw, (0, 3, 2, 1))     # torch final x.transpose(1, 3)


if __name__ == "__main__":
    key = jax.random.PRNGKey(0)
    k_x, k_t, k_p, k_m = jax.random.split(key, 4)

    B, H0, W0 = 2, 16, 16
    channel_n = 8            # total NCA channels
    input_channels = 1
    hidden_size = 32
    steps = 10
    fire_rate = 0.5

    x = jax.random.normal(k_x, (B, H0, W0, channel_n), jnp.float32)
    t = jax.random.uniform(k_t, (B,), jnp.float32)   # per-batch alive_rate
    params = init_params(k_p, channel_n, hidden_size)

    fwd = jax.jit(functools.partial(
        diffusion_nca_forward, steps=steps, fire_rate=fire_rate,
        input_channels=input_channels))
    out = fwd(x, t, params, k_m)
    out = jax.block_until_ready(out)

    assert out.shape == (B, H0, W0, channel_n), out.shape
    assert out.dtype == jnp.float32
    assert bool(jnp.all(jnp.isfinite(out)))
    print("KERNEL_OK")
</pallas_src>

<mosaic_0001>
module attributes {stable_mosaic.version = 11 : i64} {
  func.func @nca_kernel(%arg0: i32, %arg1: memref<1x8x256xf32, #tpu.memory_space<vmem>>, %arg2: memref<1x10x256xf32, #tpu.memory_space<vmem>>, %arg3: memref<1x32x256xf32, #tpu.memory_space<vmem>>, %arg4: memref<32x80xf32, #tpu.memory_space<vmem>>, %arg5: memref<32x1xf32, #tpu.memory_space<vmem>>, %arg6: memref<32x1xf32, #tpu.memory_space<vmem>>, %arg7: memref<32x1xf32, #tpu.memory_space<vmem>>, %arg8: memref<8x32xf32, #tpu.memory_space<vmem>>, %arg9: memref<8x1xf32, #tpu.memory_space<vmem>>, %arg10: memref<1x8x256xf32, #tpu.memory_space<vmem>>) attributes {dimension_semantics = [#tpu.dimension_semantics<parallel>], iteration_bounds = array<i64: 2>, scalar_prefetch = 0 : i64, scratch_operands = 0 : i64, tpu.core_type = #tpu.core_type<tc>, window_params = [{transform_indices = @transform_0, window_bounds = array<i64: 1, 8, 256>}, {transform_indices = @transform_1, window_bounds = array<i64: 1, 10, 256>}, {transform_indices = @transform_2, window_bounds = array<i64: 1, 32, 256>}, {pipeline_mode = #tpu.pipeline_mode<synchronous>, transform_indices = @transform_3, window_bounds = array<i64: 32, 80>}, {pipeline_mode = #tpu.pipeline_mode<synchronous>, transform_indices = @transform_4, window_bounds = array<i64: 32, 1>}, {pipeline_mode = #tpu.pipeline_mode<synchronous>, transform_indices = @transform_5, window_bounds = array<i64: 32, 1>}, {pipeline_mode = #tpu.pipeline_mode<synchronous>, transform_indices = @transform_6, window_bounds = array<i64: 32, 1>}, {pipeline_mode = #tpu.pipeline_mode<synchronous>, transform_indices = @transform_7, window_bounds = array<i64: 8, 32>}, {pipeline_mode = #tpu.pipeline_mode<synchronous>, transform_indices = @transform_8, window_bounds = array<i64: 8, 1>}, {transform_indices = @transform_9, window_bounds = array<i64: 1, 8, 256>}]} {
    %0 = tpu.iota {dimensions = array<i32: 1>} : vector<1x256xi32>
    %c256_i32 = arith.constant 256 : i32
    %c0_i32 = arith.constant 0 : i32
    %1 = arith.cmpi eq, %c256_i32, %c0_i32 : i32
    %c1_i32 = arith.constant 1 : i32
    %2 = arith.select %1, %c1_i32, %c256_i32 : i32
    %3 = vector.broadcast %2 : i32 to vector<1x256xi32>
    %4 = arith.remsi %0, %3 : vector<1x256xi32>
    %c0_i32_0 = arith.constant 0 : i32
    %5 = vector.broadcast %c0_i32_0 : i32 to vector<1x256xi32>
    %6 = arith.cmpi ne, %4, %5 : vector<1x256xi32>
    %c0_i32_1 = arith.constant 0 : i32
    %7 = vector.broadcast %c0_i32_1 : i32 to vector<1x256xi32>
    %8 = arith.cmpi slt, %4, %7 : vector<1x256xi32>
    %c0_i32_2 = arith.constant 0 : i32
    %9 = arith.cmpi slt, %2, %c0_i32_2 : i32
    %10 = vector.broadcast %9 : i1 to vector<1x256xi1>
    %11 = vector.broadcast %10 : vector<1x256xi1> to vector<1x256xi1>
    %12 = arith.xori %8, %11 : vector<1x256xi1>
    %13 = arith.andi %12, %6 : vector<1x256xi1>
    %14 = vector.broadcast %2 : i32 to vector<1x256xi32>
    %15 = arith.addi %4, %14 : vector<1x256xi32>
    %16 = arith.select %13, %15, %4 : vector<1x256xi1>, vector<1x256xi32>
    %c16_i32 = arith.constant 16 : i32
    %c0_i32_3 = arith.constant 0 : i32
    %17 = arith.cmpi eq, %c16_i32, %c0_i32_3 : i32
    %c1_i32_4 = arith.constant 1 : i32
    %18 = arith.select %17, %c1_i32_4, %c16_i32 : i32
    %19 = vector.broadcast %18 : i32 to vector<1x256xi32>
    %20 = arith.remsi %0, %19 : vector<1x256xi32>
    %c0_i32_5 = arith.constant 0 : i32
    %21 = vector.broadcast %c0_i32_5 : i32 to vector<1x256xi32>
    %22 = arith.cmpi ne, %20, %21 : vector<1x256xi32>
    %c0_i32_6 = arith.constant 0 : i32
    %23 = vector.broadcast %c0_i32_6 : i32 to vector<1x256xi32>
    %24 = arith.cmpi slt, %20, %23 : vector<1x256xi32>
    %c0_i32_7 = arith.constant 0 : i32
    %25 = arith.cmpi slt, %18, %c0_i32_7 : i32
    %26 = vector.broadcast %25 : i1 to vector<1x256xi1>
    %27 = vector.broadcast %26 : vector<1x256xi1> to vector<1x256xi1>
    %28 = arith.xori %24, %27 : vector<1x256xi1>
    %29 = arith.andi %28, %22 : vector<1x256xi1>
    %30 = vector.broadcast %18 : i32 to vector<1x256xi32>
    %31 = arith.addi %20, %30 : vector<1x256xi32>
    %32 = arith.select %29, %31, %20 : vector<1x256xi1>, vector<1x256xi32>
    %c16_i32_8 = arith.constant 16 : i32
    %33 = vector.broadcast %c16_i32_8 : i32 to vector<1x256xi32>
    %34 = arith.cmpi slt, %16, %33 : vector<1x256xi32>
    %35 = vector.shape_cast %34 : vector<1x256xi1> to vector<1x256xi1>
    %36 = vector.broadcast %35 : vector<1x256xi1> to vector<8x256xi1>
    %c240_i32 = arith.constant 240 : i32
    %37 = vector.broadcast %c240_i32 : i32 to vector<1x256xi32>
    %38 = arith.cmpi sge, %16, %37 : vector<1x256xi32>
    %39 = vector.shape_cast %38 : vector<1x256xi1> to vector<1x256xi1>
    %40 = vector.broadcast %39 : vector<1x256xi1> to vector<8x256xi1>
    %c0_i32_9 = arith.constant 0 : i32
    %41 = vector.broadcast %c0_i32_9 : i32 to vector<1x256xi32>
    %42 = arith.cmpi eq, %32, %41 : vector<1x256xi32>
    %43 = vector.shape_cast %42 : vector<1x256xi1> to vector<1x256xi1>
    %44 = vector.broadcast %43 : vector<1x256xi1> to vector<8x256xi1>
    %c15_i32 = arith.constant 15 : i32
    %45 = vector.broadcast %c15_i32 : i32 to vector<1x256xi32>
    %46 = arith.cmpi eq, %32, %45 : vector<1x256xi32>
    %47 = vector.shape_cast %46 : vector<1x256xi1> to vector<1x256xi1>
    %48 = vector.broadcast %47 : vector<1x256xi1> to vector<8x256xi1>
    %c0 = arith.constant 0 : index
    %c0_10 = arith.constant 0 : index
    %c0_11 = arith.constant 0 : index
    %49 = vector.load %arg1[%c0, %c0_10, %c0_11] : memref<1x8x256xf32, #tpu.memory_space<vmem>>, vector<1x8x256xf32>
    %50 = vector.shape_cast %49 : vector<1x8x256xf32> to vector<8x256xf32>
    %c16_i32_12 = arith.constant 16 : i32
    %51 = tpu.dynamic_rotate %50 by %c16_i32_12 dim 1 : vector<8x256xf32>, i32 -> vector<8x256xf32>
    %c240_i32_13 = arith.constant 240 : i32
    %52 = tpu.dynamic_rotate %50 by %c240_i32_13 dim 1 : vector<8x256xf32>, i32 -> vector<8x256xf32>
    %53 = arith.select %36, %52, %51 : vector<8x256xi1>, vector<8x256xf32>
    %c16_i32_14 = arith.constant 16 : i32
    %54 = tpu.dynamic_rotate %50 by %c16_i32_14 dim 1 : vector<8x256xf32>, i32 -> vector<8x256xf32>
    %c240_i32_15 = arith.constant 240 : i32
    %55 = tpu.dynamic_rotate %50 by %c240_i32_15 dim 1 : vector<8x256xf32>, i32 -> vector<8x256xf32>
    %56 = arith.select %40, %54, %55 : vector<8x256xi1>, vector<8x256xf32>
    %c1_i32_16 = arith.constant 1 : i32
    %57 = tpu.dynamic_rotate %53 by %c1_i32_16 dim 1 : vector<8x256xf32>, i32 -> vector<8x256xf32>
    %c255_i32 = arith.constant 255 : i32
    %58 = tpu.dynamic_rotate %53 by %c255_i32 dim 1 : vector<8x256xf32>, i32 -> vector<8x256xf32>
    %59 = arith.select %44, %58, %57 : vector<8x256xi1>, vector<8x256xf32>
    %c1_i32_17 = arith.constant 1 : i32
    %60 = tpu.dynamic_rotate %53 by %c1_i32_17 dim 1 : vector<8x256xf32>, i32 -> vector<8x256xf32>
    %c255_i32_18 = arith.constant 255 : i32
    %61 = tpu.dynamic_rotate %53 by %c255_i32_18 dim 1 : vector<8x256xf32>, i32 -> vector<8x256xf32>
    %62 = arith.select %48, %60, %61 : vector<8x256xi1>, vector<8x256xf32>
    %c1_i32_19 = arith.constant 1 : i32
    %63 = tpu.dynamic_rotate %50 by %c1_i32_19 dim 1 : vector<8x256xf32>, i32 -> vector<8x256xf32>
    %c255_i32_20 = arith.constant 255 : i32
    %64 = tpu.dynamic_rotate %50 by %c255_i32_20 dim 1 : vector<8x256xf32>, i32 -> vector<8x256xf32>
    %65 = arith.select %44, %64, %63 : vector<8x256xi1>, vector<8x256xf32>
    %c1_i32_21 = arith.constant 1 : i32
    %66 = tpu.dynamic_rotate %50 by %c1_i32_21 dim 1 : vector<8x256xf32>, i32 -> vector<8x256xf32>
    %c255_i32_22 = arith.constant 255 : i32
    %67 = tpu.dynamic_rotate %50 by %c255_i32_22 dim 1 : vector<8x256xf32>, i32 -> vector<8x256xf32>
    %68 = arith.select %48, %66, %67 : vector<8x256xi1>, vector<8x256xf32>
    %c1_i32_23 = arith.constant 1 : i32
    %69 = tpu.dynamic_rotate %56 by %c1_i32_23 dim 1 : vector<8x256xf32>, i32 -> vector<8x256xf32>
    %c255_i32_24 = arith.constant 255 : i32
    %70 = tpu.dynamic_rotate %56 by %c255_i32_24 dim 1 : vector<8x256xf32>, i32 -> vector<8x256xf32>
    %71 = arith.select %44, %70, %69 : vector<8x256xi1>, vector<8x256xf32>
    %c1_i32_25 = arith.constant 1 : i32
    %72 = tpu.dynamic_rotate %56 by %c1_i32_25 dim 1 : vector<8x256xf32>, i32 -> vector<8x256xf32>
    %c255_i32_26 = arith.constant 255 : i32
    %73 = tpu.dynamic_rotate %56 by %c255_i32_26 dim 1 : vector<8x256xf32>, i32 -> vector<8x256xf32>
    %74 = arith.select %48, %72, %73 : vector<8x256xi1>, vector<8x256xf32>
    %75 = tpu.concatenate %50, %59, %53, %62, %65, %50, %68, %71, %56, %74 in 0 : vector<8x256xf32>, vector<8x256xf32>, vector<8x256xf32>, vector<8x256xf32>, vector<8x256xf32>, vector<8x256xf32>, vector<8x256xf32>, vector<8x256xf32>, vector<8x256xf32>, vector<8x256xf32> -> vector<80x256xf32>
    %c0_27 = arith.constant 0 : index
    %c0_28 = arith.constant 0 : index
    %76 = vector.load %arg4[%c0_27, %c0_28] : memref<32x80xf32, #tpu.memory_space<vmem>>, vector<32x80xf32>
    %cst = arith.constant dense<0.000000e+00> : vector<32x256xf32>
    %77 = tpu.matmul %76, %75, %cst {dimension_numbers = #tpu.dot_dimension_numbers<[1], [0], [0], [1], [0, 0, 1, 1], [], []>} : vector<32x80xf32>, vector<80x256xf32>, vector<32x256xf32> -> vector<32x256xf32>
    %c0_29 = arith.constant 0 : index
    %c0_30 = arith.constant 0 : index
    %c0_31 = arith.constant 0 : index
    %78 = vector.load %arg3[%c0_29, %c0_30, %c0_31] : memref<1x32x256xf32, #tpu.memory_space<vmem>>, vector<1x32x256xf32>
    %79 = vector.shape_cast %78 : vector<1x32x256xf32> to vector<32x256xf32>
    %80 = arith.addf %77, %79 : vector<32x256xf32>
    %c0_32 = arith.constant 0 : index
    %c0_33 = arith.constant 0 : index
    %81 = vector.load %arg6[%c0_32, %c0_33] : memref<32x1xf32, #tpu.memory_space<vmem>>, vector<32x1xf32>
    %c0_34 = arith.constant 0 : index
    %c0_35 = arith.constant 0 : index
    %82 = vector.load %arg7[%c0_34, %c0_35] : memref<32x1xf32, #tpu.memory_space<vmem>>, vector<32x1xf32>
    %83 = vector.shape_cast %80 : vector<32x256xf32> to vector<1x32x256xf32>
    %cst_36 = arith.constant dense<0.000000e+00> : vector<1xf32>
    %84 = vector.multi_reduction <add>, %83, %cst_36 [1, 2] : vector<1x32x256xf32> to vector<1xf32>
    %85 = vector.shape_cast %84 : vector<1xf32> to vector<1x1x1xf32>
    %86 = vector.extract %85[0, 0, 0] : f32 from vector<1x1x1xf32>
    %cst_37 = arith.constant 1.22070313E-4 : f32
    %87 = arith.mulf %86, %cst_37 : f32
    %88 = arith.mulf %80, %80 : vector<32x256xf32>
    %89 = vector.shape_cast %88 : vector<32x256xf32> to vector<1x32x256xf32>
    %cst_38 = arith.constant dense<0.000000e+00> : vector<1xf32>
    %90 = vector.multi_reduction <add>, %89, %cst_38 [1, 2] : vector<1x32x256xf32> to vector<1xf32>
    %91 = vector.shape_cast %90 : vector<1xf32> to vector<1x1x1xf32>
    %92 = vector.extract %91[0, 0, 0] : f32 from vector<1x1x1xf32>
    %cst_39 = arith.constant 1.22070313E-4 : f32
    %93 = arith.mulf %92, %cst_39 : f32
    %94 = arith.mulf %87, %87 : f32
    %95 = arith.subf %93, %94 : f32
    %cst_40 = arith.constant 0.000000e+00 : f32
    %96 = arith.maximumf %95, %cst_40 : f32
    %cst_41 = arith.constant 9.99999974E-6 : f32
    %97 = arith.addf %96, %cst_41 : f32
    %98 = math.rsqrt %97 : f32
    %99 = vector.broadcast %98 : f32 to vector<32x1xf32>
    %100 = arith.mulf %81, %99 : vector<32x1xf32>
    %101 = vector.broadcast %87 : f32 to vector<32x1xf32>
    %102 = arith.mulf %101, %100 : vector<32x1xf32>
    %103 = arith.subf %82, %102 : vector<32x1xf32>
    %104 = vector.broadcast %100 : vector<32x1xf32> to vector<32x256xf32>
    %105 = arith.mulf %80, %104 : vector<32x256xf32>
    %106 = vector.broadcast %103 : vector<32x1xf32> to vector<32x256xf32>
    %107 = arith.addf %105, %106 : vector<32x256xf32>
    %cst_42 = arith.constant 0.00999999977 : f32
    %108 = vector.broadcast %cst_42 : f32 to vector<32x256xf32>
    %109 = arith.mulf %108, %107 : vector<32x256xf32>
    %110 = arith.maximumf %107, %109 : vector<32x256xf32>
    %c0_43 = arith.constant 0 : index
    %c0_44 = arith.constant 0 : index
    %111 = vector.load %arg8[%c0_43, %c0_44] : memref<8x32xf32, #tpu.memory_space<vmem>>, vector<8x32xf32>
    %cst_45 = arith.constant dense<0.000000e+00> : vector<8x256xf32>
    %112 = tpu.matmul %111, %110, %cst_45 {dimension_numbers = #tpu.dot_dimension_numbers<[1], [0], [0], [1], [0, 0, 1, 1], [], []>} : vector<8x32xf32>, vector<32x256xf32>, vector<8x256xf32> -> vector<8x256xf32>
    %c0_46 = arith.constant 0 : index
    %c0_47 = arith.constant 0 : index
    %113 = vector.load %arg9[%c0_46, %c0_47] : memref<8x1xf32, #tpu.memory_space<vmem>>, vector<8x1xf32>
    %114 = vector.broadcast %113 : vector<8x1xf32> to vector<8x256xf32>
    %115 = arith.addf %112, %114 : vector<8x256xf32>
    %c0_48 = arith.constant 0 : index
    %c0_49 = arith.constant 0 : index
    %c0_50 = arith.constant 0 : index
    %116 = vector.load %arg2[%c0_48, %c0_49, %c0_50] : memref<1x10x256xf32, #tpu.memory_space<vmem>>, vector<1x1x256xf32>
    %117 = vector.shape_cast %116 : vector<1x1x256xf32> to vector<1x256xf32>
    %118 = vector.broadcast %117 : vector<1x256xf32> to vector<8x256xf32>
    %119 = arith.mulf %115, %118 : vector<8x256xf32>
    %120 = arith.addf %50, %119 : vector<8x256xf32>
    %c16_i32_51 = arith.constant 16 : i32
    %121 = tpu.dynamic_rotate %120 by %c16_i32_51 dim 1 : vector<8x256xf32>, i32 -> vector<8x256xf32>
    %c240_i32_52 = arith.constant 240 : i32
    %122 = tpu.dynamic_rotate %120 by %c240_i32_52 dim 1 : vector<8x256xf32>, i32 -> vector<8x256xf32>
    %123 = arith.select %36, %122, %121 : vector<8x256xi1>, vector<8x256xf32>
    %c16_i32_53 = arith.constant 16 : i32
    %124 = tpu.dynamic_rotate %120 by %c16_i32_53 dim 1 : vector<8x256xf32>, i32 -> vector<8x256xf32>
    %c240_i32_54 = arith.constant 240 : i32
    %125 = tpu.dynamic_rotate %120 by %c240_i32_54 dim 1 : vector<8x256xf32>, i32 -> vector<8x256xf32>
    %126 = arith.select %40, %124, %125 : vector<8x256xi1>, vector<8x256xf32>
    %c1_i32_55 = arith.constant 1 : i32
    %127 = tpu.dynamic_rotate %123 by %c1_i32_55 dim 1 : vector<8x256xf32>, i32 -> vector<8x256xf32>
    %c255_i32_56 = arith.constant 255 : i32
    %128 = tpu.dynamic_rotate %123 by %c255_i32_56 dim 1 : vector<8x256xf32>, i32 -> vector<8x256xf32>
    %129 = arith.select %44, %128, %127 : vector<8x256xi1>, vector<8x256xf32>
    %c1_i32_57 = arith.constant 1 : i32
    %130 = tpu.dynamic_rotate %123 by %c1_i32_57 dim 1 : vector<8x256xf32>, i32 -> vector<8x256xf32>
    %c255_i32_58 = arith.constant 255 : i32
    %131 = tpu.dynamic_rotate %123 by %c255_i32_58 dim 1 : vector<8x256xf32>, i32 -> vector<8x256xf32>
    %132 = arith.select %48, %130, %131 : vector<8x256xi1>, vector<8x256xf32>
    %c1_i32_59 = arith.constant 1 : i32
    %133 = tpu.dynamic_rotate %120 by %c1_i32_59 dim 1 : vector<8x256xf32>, i32 -> vector<8x256xf32>
    %c255_i32_60 = arith.constant 255 : i32
    %134 = tpu.dynamic_rotate %120 by %c255_i32_60 dim 1 : vector<8x256xf32>, i32 -> vector<8x256xf32>
    %135 = arith.select %44, %134, %133 : vector<8x256xi1>, vector<8x256xf32>
    %c1_i32_61 = arith.constant 1 : i32
    %136 = tpu.dynamic_rotate %120 by %c1_i32_61 dim 1 : vector<8x256xf32>, i32 -> vector<8x256xf32>
    %c255_i32_62 = arith.constant 255 : i32
    %137 = tpu.dynamic_rotate %120 by %c255_i32_62 dim 1 : vector<8x256xf32>, i32 -> vector<8x256xf32>
    %138 = arith.select %48, %136, %137 : vector<8x256xi1>, vector<8x256xf32>
    %c1_i32_63 = arith.constant 1 : i32
    %139 = tpu.dynamic_rotate %126 by %c1_i32_63 dim 1 : vector<8x256xf32>, i32 -> vector<8x256xf32>
    %c255_i32_64 = arith.constant 255 : i32
    %140 = tpu.dynamic_rotate %126 by %c255_i32_64 dim 1 : vector<8x256xf32>, i32 -> vector<8x256xf32>
    %141 = arith.select %44, %140, %139 : vector<8x256xi1>, vector<8x256xf32>
    %c1_i32_65 = arith.constant 1 : i32
    %142 = tpu.dynamic_rotate %126 by %c1_i32_65 dim 1 : vector<8x256xf32>, i32 -> vector<8x256xf32>
    %c255_i32_66 = arith.constant 255 : i32
    %143 = tpu.dynamic_rotate %126 by %c255_i32_66 dim 1 : vector<8x256xf32>, i32 -> vector<8x256xf32>
    %144 = arith.select %48, %142, %143 : vector<8x256xi1>, vector<8x256xf32>
    %145 = tpu.concatenate %120, %129, %123, %132, %135, %120, %138, %141, %126, %144 in 0 : vector<8x256xf32>, vector<8x256xf32>, vector<8x256xf32>, vector<8x256xf32>, vector<8x256xf32>, vector<8x256xf32>, vector<8x256xf32>, vector<8x256xf32>, vector<8x256xf32>, vector<8x256xf32> -> vector<80x256xf32>
    %c0_67 = arith.constant 0 : index
    %c0_68 = arith.constant 0 : index
    %146 = vector.load %arg4[%c0_67, %c0_68] : memref<32x80xf32, #tpu.memory_space<vmem>>, vector<32x80xf32>
    %cst_69 = arith.constant dense<0.000000e+00> : vector<32x256xf32>
    %147 = tpu.matmul %146, %145, %cst_69 {dimension_numbers = #tpu.dot_dimension_numbers<[1], [0], [0], [1], [0, 0, 1, 1], [], []>} : vector<32x80xf32>, vector<80x256xf32>, vector<32x256xf32> -> vector<32x256xf32>
    %c0_70 = arith.constant 0 : index
    %c0_71 = arith.constant 0 : index
    %c0_72 = arith.constant 0 : index
    %148 = vector.load %arg3[%c0_70, %c0_71, %c0_72] : memref<1x32x256xf32, #tpu.memory_space<vmem>>, vector<1x32x256xf32>
    %149 = vector.shape_cast %148 : vector<1x32x256xf32> to vector<32x256xf32>
    %150 = arith.addf %147, %149 : vector<32x256xf32>
    %c0_73 = arith.constant 0 : index
    %c0_74 = arith.constant 0 : index
    %151 = vector.load %arg5[%c0_73, %c0_74] : memref<32x1xf32, #tpu.memory_space<vmem>>, vector<32x1xf32>
    %cst_75 = arith.constant 1.000000e-01 : f32
    %152 = vector.broadcast %cst_75 : f32 to vector<32x1xf32>
    %153 = arith.mulf %151, %152 : vector<32x1xf32>
    %154 = vector.broadcast %153 : vector<32x1xf32> to vector<32x256xf32>
    %155 = arith.addf %150, %154 : vector<32x256xf32>
    %c0_76 = arith.constant 0 : index
    %c0_77 = arith.constant 0 : index
    %156 = vector.load %arg6[%c0_76, %c0_77] : memref<32x1xf32, #tpu.memory_space<vmem>>, vector<32x1xf32>
    %c0_78 = arith.constant 0 : index
    %c0_79 = arith.constant 0 : index
    %157 = vector.load %arg7[%c0_78, %c0_79] : memref<32x1xf32, #tpu.memory_space<vmem>>, vector<32x1xf32>
    %158 = vector.shape_cast %155 : vector<32x256xf32> to vector<1x32x256xf32>
    %cst_80 = arith.constant dense<0.000000e+00> : vector<1xf32>
    %159 = vector.multi_reduction <add>, %158, %cst_80 [1, 2] : vector<1x32x256xf32> to vector<1xf32>
    %160 = vector.shape_cast %159 : vector<1xf32> to vector<1x1x1xf32>
    %161 = vector.extract %160[0, 0, 0] : f32 from vector<1x1x1xf32>
    %cst_81 = arith.constant 1.22070313E-4 : f32
    %162 = arith.mulf %161, %cst_81 : f32
    %163 = arith.mulf %155, %155 : vector<32x256xf32>
    %164 = vector.shape_cast %163 : vector<32x256xf32> to vector<1x32x256xf32>
    %cst_82 = arith.constant dense<0.000000e+00> : vector<1xf32>
    %165 = vector.multi_reduction <add>, %164, %cst_82 [1, 2] : vector<1x32x256xf32> to vector<1xf32>
    %166 = vector.shape_cast %165 : vector<1xf32> to vector<1x1x1xf32>
    %167 = vector.extract %166[0, 0, 0] : f32 from vector<1x1x1xf32>
    %cst_83 = arith.constant 1.22070313E-4 : f32
    %168 = arith.mulf %167, %cst_83 : f32
    %169 = arith.mulf %162, %162 : f32
    %170 = arith.subf %168, %169 : f32
    %cst_84 = arith.constant 0.000000e+00 : f32
    %171 = arith.maximumf %170, %cst_84 : f32
    %cst_85 = arith.constant 9.99999974E-6 : f32
    %172 = arith.addf %171, %cst_85 : f32
    %173 = math.rsqrt %172 : f32
    %174 = vector.broadcast %173 : f32 to vector<32x1xf32>
    %175 = arith.mulf %156, %174 : vector<32x1xf32>
    %176 = vector.broadcast %162 : f32 to vector<32x1xf32>
    %177 = arith.mulf %176, %175 : vector<32x1xf32>
    %178 = arith.subf %157, %177 : vector<32x1xf32>
    %179 = vector.broadcast %175 : vector<32x1xf32> to vector<32x256xf32>
    %180 = arith.mulf %155, %179 : vector<32x256xf32>
    %181 = vector.broadcast %178 : vector<32x1xf32> to vector<32x256xf32>
    %182 = arith.addf %180, %181 : vector<32x256xf32>
    %cst_86 = arith.constant 0.00999999977 : f32
    %183 = vector.broadcast %cst_86 : f32 to vector<32x256xf32>
    %184 = arith.mulf %183, %182 : vector<32x256xf32>
    %185 = arith.maximumf %182, %184 : vector<32x256xf32>
    %c0_87 = arith.constant 0 : index
    %c0_88 = arith.constant 0 : index
    %186 = vector.load %arg8[%c0_87, %c0_88] : memref<8x32xf32, #tpu.memory_space<vmem>>, vector<8x32xf32>
    %cst_89 = arith.constant dense<0.000000e+00> : vector<8x256xf32>
    %187 = tpu.matmul %186, %185, %cst_89 {dimension_numbers = #tpu.dot_dimension_numbers<[1], [0], [0], [1], [0, 0, 1, 1], [], []>} : vector<8x32xf32>, vector<32x256xf32>, vector<8x256xf32> -> vector<8x256xf32>
    %c0_90 = arith.constant 0 : index
    %c0_91 = arith.constant 0 : index
    %188 = vector.load %arg9[%c0_90, %c0_91] : memref<8x1xf32, #tpu.memory_space<vmem>>, vector<8x1xf32>
    %189 = vector.broadcast %188 : vector<8x1xf32> to vector<8x256xf32>
    %190 = arith.addf %187, %189 : vector<8x256xf32>
    %c0_92 = arith.constant 0 : index
    %c1 = arith.constant 1 : index
    %c0_93 = arith.constant 0 : index
    %191 = vector.load %arg2[%c0_92, %c1, %c0_93] : memref<1x10x256xf32, #tpu.memory_space<vmem>>, vector<1x1x256xf32>
    %192 = vector.shape_cast %191 : vector<1x1x256xf32> to vector<1x256xf32>
    %193 = vector.broadcast %192 : vector<1x256xf32> to vector<8x256xf32>
    %194 = arith.mulf %190, %193 : vector<8x256xf32>
    %195 = arith.addf %120, %194 : vector<8x256xf32>
    %c16_i32_94 = arith.constant 16 : i32
    %196 = tpu.dynamic_rotate %195 by %c16_i32_94 dim 1 : vector<8x256xf32>, i32 -> vector<8x256xf32>
    %c240_i32_95 = arith.constant 240 : i32
    %197 = tpu.dynamic_rotate %195 by %c240_i32_95 dim 1 : vector<8x256xf32>, i32 -> vector<8x256xf32>
    %198 = arith.select %36, %197, %196 : vector<8x256xi1>, vector<8x256xf32>
    %c16_i32_96 = arith.constant 16 : i32
    %199 = tpu.dynamic_rotate %195 by %c16_i32_96 dim 1 : vector<8x256xf32>, i32 -> vector<8x256xf32>
    %c240_i32_97 = arith.constant 240 : i32
    %200 = tpu.dynamic_rotate %195 by %c240_i32_97 dim 1 : vector<8x256xf32>, i32 -> vector<8x256xf32>
    %201 = arith.select %40, %199, %200 : vector<8x256xi1>, vector<8x256xf32>
    %c1_i32_98 = arith.constant 1 : i32
    %202 = tpu.dynamic_rotate %198 by %c1_i32_98 dim 1 : vector<8x256xf32>, i32 -> vector<8x256xf32>
    %c255_i32_99 = arith.constant 255 : i32
    %203 = tpu.dynamic_rotate %198 by %c255_i32_99 dim 1 : vector<8x256xf32>, i32 -> vector<8x256xf32>
    %204 = arith.select %44, %203, %202 : vector<8x256xi1>, vector<8x256xf32>
    %c1_i32_100 = arith.constant 1 : i32
    %205 = tpu.dynamic_rotate %198 by %c1_i32_100 dim 1 : vector<8x256xf32>, i32 -> vector<8x256xf32>
    %c255_i32_101 = arith.constant 255 : i32
    %206 = tpu.dynamic_rotate %198 by %c255_i32_101 dim 1 : vector<8x256xf32>, i32 -> vector<8x256xf32>
    %207 = arith.select %48, %205, %206 : vector<8x256xi1>, vector<8x256xf32>
    %c1_i32_102 = arith.constant 1 : i32
    %208 = tpu.dynamic_rotate %195 by %c1_i32_102 dim 1 : vector<8x256xf32>, i32 -> vector<8x256xf32>
    %c255_i32_103 = arith.constant 255 : i32
    %209 = tpu.dynamic_rotate %195 by %c255_i32_103 dim 1 : vector<8x256xf32>, i32 -> vector<8x256xf32>
    %210 = arith.select %44, %209, %208 : vector<8x256xi1>, vector<8x256xf32>
    %c1_i32_104 = arith.constant 1 : i32
    %211 = tpu.dynamic_rotate %195 by %c1_i32_104 dim 1 : vector<8x256xf32>, i32 -> vector<8x256xf32>
    %c255_i32_105 = arith.constant 255 : i32
    %212 = tpu.dynamic_rotate %195 by %c255_i32_105 dim 1 : vector<8x256xf32>, i32 -> vector<8x256xf32>
    %213 = arith.select %48, %211, %212 : vector<8x256xi1>, vector<8x256xf32>
    %c1_i32_106 = arith.constant 1 : i32
    %214 = tpu.dynamic_rotate %201 by %c1_i32_106 dim 1 : vector<8x256xf32>, i32 -> vector<8x256xf32>
    %c255_i32_107 = arith.constant 255 : i32
    %215 = tpu.dynamic_rotate %201 by %c255_i32_107 dim 1 : vector<8x256xf32>, i32 -> vector<8x256xf32>
    %216 = arith.select %44, %215, %214 : vector<8x256xi1>, vector<8x256xf32>
    %c1_i32_108 = arith.constant 1 : i32
    %217 = tpu.dynamic_rotate %201 by %c1_i32_108 dim 1 : vector<8x256xf32>, i32 -> vector<8x256xf32>
    %c255_i32_109 = arith.constant 255 : i32
    %218 = tpu.dynamic_rotate %201 by %c255_i32_109 dim 1 : vector<8x256xf32>, i32 -> vector<8x256xf32>
    %219 = arith.select %48, %217, %218 : vector<8x256xi1>, vector<8x256xf32>
    %220 = tpu.concatenate %195, %204, %198, %207, %210, %195, %213, %216, %201, %219 in 0 : vector<8x256xf32>, vector<8x256xf32>, vector<8x256xf32>, vector<8x256xf32>, vector<8x256xf32>, vector<8x256xf32>, vector<8x256xf32>, vector<8x256xf32>, vector<8x256xf32>, vector<8x256xf32> -> vector<80x256xf32>
    %c0_110 = arith.constant 0 : index
    %c0_111 = arith.constant 0 : index
    %221 = vector.load %arg4[%c0_110, %c0_111] : memref<32x80xf32, #tpu.memory_space<vmem>>, vector<32x80xf32>
    %cst_112 = arith.constant dense<0.000000e+00> : vector<32x256xf32>
    %222 = tpu.matmul %221, %220, %cst_112 {dimension_numbers = #tpu.dot_dimension_numbers<[1], [0], [0], [1], [0, 0, 1, 1], [], []>} : vector<32x80xf32>, vector<80x256xf32>, vector<32x256xf32> -> vector<32x256xf32>
    %c0_113 = arith.constant 0 : index
    %c0_114 = arith.constant 0 : index
    %c0_115 = arith.constant 0 : index
    %223 = vector.load %arg3[%c0_113, %c0_114, %c0_115] : memref<1x32x256xf32, #tpu.memory_space<vmem>>, vector<1x32x256xf32>
    %224 = vector.shape_cast %223 : vector<1x32x256xf32> to vector<32x256xf32>
    %225 = arith.addf %222, %224 : vector<32x256xf32>
    %c0_116 = arith.constant 0 : index
    %c0_117 = arith.constant 0 : index
    %226 = vector.load %arg5[%c0_116, %c0_117] : memref<32x1xf32, #tpu.memory_space<vmem>>, vector<32x1xf32>
    %cst_118 = arith.constant 2.000000e-01 : f32
    %227 = vector.broadcast %cst_118 : f32 to vector<32x1xf32>
    %228 = arith.mulf %226, %227 : vector<32x1xf32>
    %229 = vector.broadcast %228 : vector<32x1xf32> to vector<32x256xf32>
    %230 = arith.addf %225, %229 : vector<32x256xf32>
    %c0_119 = arith.constant 0 : index
    %c0_120 = arith.constant 0 : index
    %231 = vector.load %arg6[%c0_119, %c0_120] : memref<32x1xf32, #tpu.memory_space<vmem>>, vector<32x1xf32>
    %c0_121 = arith.constant 0 : index
    %c0_122 = arith.constant 0 : index
    %232 = vector.load %arg7[%c0_121, %c0_122] : memref<32x1xf32, #tpu.memory_space<vmem>>, vector<32x1xf32>
    %233 = vector.shape_cast %230 : vector<32x256xf32> to vector<1x32x256xf32>
    %cst_123 = arith.constant dense<0.000000e+00> : vector<1xf32>
    %234 = vector.multi_reduction <add>, %233, %cst_123 [1, 2] : vector<1x32x256xf32> to vector<1xf32>
    %235 = vector.shape_cast %234 : vector<1xf32> to vector<1x1x1xf32>
    %236 = vector.extract %235[0, 0, 0] : f32 from vector<1x1x1xf32>
    %cst_124 = arith.constant 1.22070313E-4 : f32
    %237 = arith.mulf %236, %cst_124 : f32
    %238 = arith.mulf %230, %230 : vector<32x256xf32>
    %239 = vector.shape_cast %238 : vector<32x256xf32> to vector<1x32x256xf32>
    %cst_125 = arith.constant dense<0.000000e+00> : vector<1xf32>
    %240 = vector.multi_reduction <add>, %239, %cst_125 [1, 2] : vector<1x32x256xf32> to vector<1xf32>
    %241 = vector.shape_cast %240 : vector<1xf32> to vector<1x1x1xf32>
    %242 = vector.extract %241[0, 0, 0] : f32 from vector<1x1x1xf32>
    %cst_126 = arith.constant 1.22070313E-4 : f32
    %243 = arith.mulf %242, %cst_126 : f32
    %244 = arith.mulf %237, %237 : f32
    %245 = arith.subf %243, %244 : f32
    %cst_127 = arith.constant 0.000000e+00 : f32
    %246 = arith.maximumf %245, %cst_127 : f32
    %cst_128 = arith.constant 9.99999974E-6 : f32
    %247 = arith.addf %246, %cst_128 : f32
    %248 = math.rsqrt %247 : f32
    %249 = vector.broadcast %248 : f32 to vector<32x1xf32>
    %250 = arith.mulf %231, %249 : vector<32x1xf32>
    %251 = vector.broadcast %237 : f32 to vector<32x1xf32>
    %252 = arith.mulf %251, %250 : vector<32x1xf32>
    %253 = arith.subf %232, %252 : vector<32x1xf32>
    %254 = vector.broadcast %250 : vector<32x1xf32> to vector<32x256xf32>
    %255 = arith.mulf %230, %254 : vector<32x256xf32>
    %256 = vector.broadcast %253 : vector<32x1xf32> to vector<32x256xf32>
    %257 = arith.addf %255, %256 : vector<32x256xf32>
    %cst_129 = arith.constant 0.00999999977 : f32
    %258 = vector.broadcast %cst_129 : f32 to vector<32x256xf32>
    %259 = arith.mulf %258, %257 : vector<32x256xf32>
    %260 = arith.maximumf %257, %259 : vector<32x256xf32>
    %c0_130 = arith.constant 0 : index
    %c0_131 = arith.constant 0 : index
    %261 = vector.load %arg8[%c0_130, %c0_131] : memref<8x32xf32, #tpu.memory_space<vmem>>, vector<8x32xf32>
    %cst_132 = arith.constant dense<0.000000e+00> : vector<8x256xf32>
    %262 = tpu.matmul %261, %260, %cst_132 {dimension_numbers = #tpu.dot_dimension_numbers<[1], [0], [0], [1], [0, 0, 1, 1], [], []>} : vector<8x32xf32>, vector<32x256xf32>, vector<8x256xf32> -> vector<8x256xf32>
    %c0_133 = arith.constant 0 : index
    %c0_134 = arith.constant 0 : index
    %263 = vector.load %arg9[%c0_133, %c0_134] : memref<8x1xf32, #tpu.memory_space<vmem>>, vector<8x1xf32>
    %264 = vector.broadcast %263 : vector<8x1xf32> to vector<8x256xf32>
    %265 = arith.addf %262, %264 : vector<8x256xf32>
    %c0_135 = arith.constant 0 : index
    %c2 = arith.constant 2 : index
    %c0_136 = arith.constant 0 : index
    %266 = vector.load %arg2[%c0_135, %c2, %c0_136] : memref<1x10x256xf32, #tpu.memory_space<vmem>>, vector<1x1x256xf32>
    %267 = vector.shape_cast %266 : vector<1x1x256xf32> to vector<1x256xf32>
    %268 = vector.broadcast %267 : vector<1x256xf32> to vector<8x256xf32>
    %269 = arith.mulf %265, %268 : vector<8x256xf32>
    %270 = arith.addf %195, %269 : vector<8x256xf32>
    %c16_i32_137 = arith.constant 16 : i32
    %271 = tpu.dynamic_rotate %270 by %c16_i32_137 dim 1 : vector<8x256xf32>, i32 -> vector<8x256xf32>
    %c240_i32_138 = arith.constant 240 : i32
    %272 = tpu.dynamic_rotate %270 by %c240_i32_138 dim 1 : vector<8x256xf32>, i32 -> vector<8x256xf32>
    %273 = arith.select %36, %272, %271 : vector<8x256xi1>, vector<8x256xf32>
    %c16_i32_139 = arith.constant 16 : i32
    %274 = tpu.dynamic_rotate %270 by %c16_i32_139 dim 1 : vector<8x256xf32>, i32 -> vector<8x256xf32>
    %c240_i32_140 = arith.constant 240 : i32
    %275 = tpu.dynamic_rotate %270 by %c240_i32_140 dim 1 : vector<8x256xf32>, i32 -> vector<8x256xf32>
    %276 = arith.select %40, %274, %275 : vector<8x256xi1>, vector<8x256xf32>
    %c1_i32_141 = arith.constant 1 : i32
    %277 = tpu.dynamic_rotate %273 by %c1_i32_141 dim 1 : vector<8x256xf32>, i32 -> vector<8x256xf32>
    %c255_i32_142 = arith.constant 255 : i32
    %278 = tpu.dynamic_rotate %273 by %c255_i32_142 dim 1 : vector<8x256xf32>, i32 -> vector<8x256xf32>
    %279 = arith.select %44, %278, %277 : vector<8x256xi1>, vector<8x256xf32>
    %c1_i32_143 = arith.constant 1 : i32
    %280 = tpu.dynamic_rotate %273 by %c1_i32_143 dim 1 : vector<8x256xf32>, i32 -> vector<8x256xf32>
    %c255_i32_144 = arith.constant 255 : i32
    %281 = tpu.dynamic_rotate %273 by %c255_i32_144 dim 1 : vector<8x256xf32>, i32 -> vector<8x256xf32>
    %282 = arith.select %48, %280, %281 : vector<8x256xi1>, vector<8x256xf32>
    %c1_i32_145 = arith.constant 1 : i32
    %283 = tpu.dynamic_rotate %270 by %c1_i32_145 dim 1 : vector<8x256xf32>, i32 -> vector<8x256xf32>
    %c255_i32_146 = arith.constant 255 : i32
    %284 = tpu.dynamic_rotate %270 by %c255_i32_146 dim 1 : vector<8x256xf32>, i32 -> vector<8x256xf32>
    %285 = arith.select %44, %284, %283 : vector<8x256xi1>, vector<8x256xf32>
    %c1_i32_147 = arith.constant 1 : i32
    %286 = tpu.dynamic_rotate %270 by %c1_i32_147 dim 1 : vector<8x256xf32>, i32 -> vector<8x256xf32>
    %c255_i32_148 = arith.constant 255 : i32
    %287 = tpu.dynamic_rotate %270 by %c255_i32_148 dim 1 : vector<8x256xf32>, i32 -> vector<8x256xf32>
    %288 = arith.select %48, %286, %287 : vector<8x256xi1>, vector<8x256xf32>
    %c1_i32_149 = arith.constant 1 : i32
    %289 = tpu.dynamic_rotate %276 by %c1_i32_149 dim 1 : vector<8x256xf32>, i32 -> vector<8x256xf32>
    %c255_i32_150 = arith.constant 255 : i32
    %290 = tpu.dynamic_rotate %276 by %c255_i32_150 dim 1 : vector<8x256xf32>, i32 -> vector<8x256xf32>
    %291 = arith.select %44, %290, %289 : vector<8x256xi1>, vector<8x256xf32>
    %c1_i32_151 = arith.constant 1 : i32
    %292 = tpu.dynamic_rotate %276 by %c1_i32_151 dim 1 : vector<8x256xf32>, i32 -> vector<8x256xf32>
    %c255_i32_152 = arith.constant 255 : i32
    %293 = tpu.dynamic_rotate %276 by %c255_i32_152 dim 1 : vector<8x256xf32>, i32 -> vector<8x256xf32>
    %294 = arith.select %48, %292, %293 : vector<8x256xi1>, vector<8x256xf32>
    %295 = tpu.concatenate %270, %279, %273, %282, %285, %270, %288, %291, %276, %294 in 0 : vector<8x256xf32>, vector<8x256xf32>, vector<8x256xf32>, vector<8x256xf32>, vector<8x256xf32>, vector<8x256xf32>, vector<8x256xf32>, vector<8x256xf32>, vector<8x256xf32>, vector<8x256xf32> -> vector<80x256xf32>
    %c0_153 = arith.constant 0 : index
    %c0_154 = arith.constant 0 : index
    %296 = vector.load %arg4[%c0_153, %c0_154] : memref<32x80xf32, #tpu.memory_space<vmem>>, vector<32x80xf32>
    %cst_155 = arith.constant dense<0.000000e+00> : vector<32x256xf32>
    %297 = tpu.matmul %296, %295, %cst_155 {dimension_numbers = #tpu.dot_dimension_numbers<[1], [0], [0], [1], [0, 0, 1, 1], [], []>} : vector<32x80xf32>, vector<80x256xf32>, vector<32x256xf32> -> vector<32x256xf32>
    %c0_156 = arith.constant 0 : index
    %c0_157 = arith.constant 0 : index
    %c0_158 = arith.constant 0 : index
    %298 = vector.load %arg3[%c0_156, %c0_157, %c0_158] : memref<1x32x256xf32, #tpu.memory_space<vmem>>, vector<1x32x256xf32>
    %299 = vector.shape_cast %298 : vector<1x32x256xf32> to vector<32x256xf32>
    %300 = arith.addf %297, %299 : vector<32x256xf32>
    %c0_159 = arith.constant 0 : index
    %c0_160 = arith.constant 0 : index
    %301 = vector.load %arg5[%c0_159, %c0_160] : memref<32x1xf32, #tpu.memory_space<vmem>>, vector<32x1xf32>
    %cst_161 = arith.constant 3.000000e-01 : f32
    %302 = vector.broadcast %cst_161 : f32 to vector<32x1xf32>
    %303 = arith.mulf %301, %302 : vector<32x1xf32>
    %304 = vector.broadcast %303 : vector<32x1xf32> to vector<32x256xf32>
    %305 = arith.addf %300, %304 : vector<32x256xf32>
    %c0_162 = arith.constant 0 : index
    %c0_163 = arith.constant 0 : index
    %306 = vector.load %arg6[%c0_162, %c0_163] : memref<32x1xf32, #tpu.memory_space<vmem>>, vector<32x1xf32>
    %c0_164 = arith.constant 0 : index
    %c0_165 = arith.constant 0 : index
    %307 = vector.load %arg7[%c0_164, %c0_165] : memref<32x1xf32, #tpu.memory_space<vmem>>, vector<32x1xf32>
    %308 = vector.shape_cast %305 : vector<32x256xf32> to vector<1x32x256xf32>
    %cst_166 = arith.constant dense<0.000000e+00> : vector<1xf32>
    %309 = vector.multi_reduction <add>, %308, %cst_166 [1, 2] : vector<1x32x256xf32> to vector<1xf32>
    %310 = vector.shape_cast %309 : vector<1xf32> to vector<1x1x1xf32>
    %311 = vector.extract %310[0, 0, 0] : f32 from vector<1x1x1xf32>
    %cst_167 = arith.constant 1.22070313E-4 : f32
    %312 = arith.mulf %311, %cst_167 : f32
    %313 = arith.mulf %305, %305 : vector<32x256xf32>
    %314 = vector.shape_cast %313 : vector<32x256xf32> to vector<1x32x256xf32>
    %cst_168 = arith.constant dense<0.000000e+00> : vector<1xf32>
    %315 = vector.multi_reduction <add>, %314, %cst_168 [1, 2] : vector<1x32x256xf32> to vector<1xf32>
    %316 = vector.shape_cast %315 : vector<1xf32> to vector<1x1x1xf32>
    %317 = vector.extract %316[0, 0, 0] : f32 from vector<1x1x1xf32>
    %cst_169 = arith.constant 1.22070313E-4 : f32
    %318 = arith.mulf %317, %cst_169 : f32
    %319 = arith.mulf %312, %312 : f32
    %320 = arith.subf %318, %319 : f32
    %cst_170 = arith.constant 0.000000e+00 : f32
    %321 = arith.maximumf %320, %cst_170 : f32
    %cst_171 = arith.constant 9.99999974E-6 : f32
    %322 = arith.addf %321, %cst_171 : f32
    %323 = math.rsqrt %322 : f32
    %324 = vector.broadcast %323 : f32 to vector<32x1xf32>
    %325 = arith.mulf %306, %324 : vector<32x1xf32>
    %326 = vector.broadcast %312 : f32 to vector<32x1xf32>
    %327 = arith.mulf %326, %325 : vector<32x1xf32>
    %328 = arith.subf %307, %327 : vector<32x1xf32>
    %329 = vector.broadcast %325 : vector<32x1xf32> to vector<32x256xf32>
    %330 = arith.mulf %305, %329 : vector<32x256xf32>
    %331 = vector.broadcast %328 : vector<32x1xf32> to vector<32x256xf32>
    %332 = arith.addf %330, %331 : vector<32x256xf32>
    %cst_172 = arith.constant 0.00999999977 : f32
    %333 = vector.broadcast %cst_172 : f32 to vector<32x256xf32>
    %334 = arith.mulf %333, %332 : vector<32x256xf32>
    %335 = arith.maximumf %332, %334 : vector<32x256xf32>
    %c0_173 = arith.constant 0 : index
    %c0_174 = arith.constant 0 : index
    %336 = vector.load %arg8[%c0_173, %c0_174] : memref<8x32xf32, #tpu.memory_space<vmem>>, vector<8x32xf32>
    %cst_175 = arith.constant dense<0.000000e+00> : vector<8x256xf32>
    %337 = tpu.matmul %336, %335, %cst_175 {dimension_numbers = #tpu.dot_dimension_numbers<[1], [0], [0], [1], [0, 0, 1, 1], [], []>} : vector<8x32xf32>, vector<32x256xf32>, vector<8x256xf32> -> vector<8x256xf32>
    %c0_176 = arith.constant 0 : index
    %c0_177 = arith.constant 0 : index
    %338 = vector.load %arg9[%c0_176, %c0_177] : memref<8x1xf32, #tpu.memory_space<vmem>>, vector<8x1xf32>
    %339 = vector.broadcast %338 : vector<8x1xf32> to vector<8x256xf32>
    %340 = arith.addf %337, %339 : vector<8x256xf32>
    %c0_178 = arith.constant 0 : index
    %c3 = arith.constant 3 : index
    %c0_179 = arith.constant 0 : index
    %341 = vector.load %arg2[%c0_178, %c3, %c0_179] : memref<1x10x256xf32, #tpu.memory_space<vmem>>, vector<1x1x256xf32>
    %342 = vector.shape_cast %341 : vector<1x1x256xf32> to vector<1x256xf32>
    %343 = vector.broadcast %342 : vector<1x256xf32> to vector<8x256xf32>
    %344 = arith.mulf %340, %343 : vector<8x256xf32>
    %345 = arith.addf %270, %344 : vector<8x256xf32>
    %c16_i32_180 = arith.constant 16 : i32
    %346 = tpu.dynamic_rotate %345 by %c16_i32_180 dim 1 : vector<8x256xf32>, i32 -> vector<8x256xf32>
    %c240_i32_181 = arith.constant 240 : i32
    %347 = tpu.dynamic_rotate %345 by %c240_i32_181 dim 1 : vector<8x256xf32>, i32 -> vector<8x256xf32>
    %348 = arith.select %36, %347, %346 : vector<8x256xi1>, vector<8x256xf32>
    %c16_i32_182 = arith.constant 16 : i32
    %349 = tpu.dynamic_rotate %345 by %c16_i32_182 dim 1 : vector<8x256xf32>, i32 -> vector<8x256xf32>
    %c240_i32_183 = arith.constant 240 : i32
    %350 = tpu.dynamic_rotate %345 by %c240_i32_183 dim 1 : vector<8x256xf32>, i32 -> vector<8x256xf32>
    %351 = arith.select %40, %349, %350 : vector<8x256xi1>, vector<8x256xf32>
    %c1_i32_184 = arith.constant 1 : i32
    %352 = tpu.dynamic_rotate %348 by %c1_i32_184 dim 1 : vector<8x256xf32>, i32 -> vector<8x256xf32>
    %c255_i32_185 = arith.constant 255 : i32
    %353 = tpu.dynamic_rotate %348 by %c255_i32_185 dim 1 : vector<8x256xf32>, i32 -> vector<8x256xf32>
    %354 = arith.select %44, %353, %352 : vector<8x256xi1>, vector<8x256xf32>
    %c1_i32_186 = arith.constant 1 : i32
    %355 = tpu.dynamic_rotate %348 by %c1_i32_186 dim 1 : vector<8x256xf32>, i32 -> vector<8x256xf32>
    %c255_i32_187 = arith.constant 255 : i32
    %356 = tpu.dynamic_rotate %348 by %c255_i32_187 dim 1 : vector<8x256xf32>, i32 -> vector<8x256xf32>
    %357 = arith.select %48, %355, %356 : vector<8x256xi1>, vector<8x256xf32>
    %c1_i32_188 = arith.constant 1 : i32
    %358 = tpu.dynamic_rotate %345 by %c1_i32_188 dim 1 : vector<8x256xf32>, i32 -> vector<8x256xf32>
    %c255_i32_189 = arith.constant 255 : i32
    %359 = tpu.dynamic_rotate %345 by %c255_i32_189 dim 1 : vector<8x256xf32>, i32 -> vector<8x256xf32>
    %360 = arith.select %44, %359, %358 : vector<8x256xi1>, vector<8x256xf32>
    %c1_i32_190 = arith.constant 1 : i32
    %361 = tpu.dynamic_rotate %345 by %c1_i32_190 dim 1 : vector<8x256xf32>, i32 -> vector<8x256xf32>
    %c255_i32_191 = arith.constant 255 : i32
    %362 = tpu.dynamic_rotate %345 by %c255_i32_191 dim 1 : vector<8x256xf32>, i32 -> vector<8x256xf32>
    %363 = arith.select %48, %361, %362 : vector<8x256xi1>, vector<8x256xf32>
    %c1_i32_192 = arith.constant 1 : i32
    %364 = tpu.dynamic_rotate %351 by %c1_i32_192 dim 1 : vector<8x256xf32>, i32 -> vector<8x256xf32>
    %c255_i32_193 = arith.constant 255 : i32
    %365 = tpu.dynamic_rotate %351 by %c255_i32_193 dim 1 : vector<8x256xf32>, i32 -> vector<8x256xf32>
    %366 = arith.select %44, %365, %364 : vector<8x256xi1>, vector<8x256xf32>
    %c1_i32_194 = arith.constant 1 : i32
    %367 = tpu.dynamic_rotate %351 by %c1_i32_194 dim 1 : vector<8x256xf32>, i32 -> vector<8x256xf32>
    %c255_i32_195 = arith.constant 255 : i32
    %368 = tpu.dynamic_rotate %351 by %c255_i32_195 dim 1 : vector<8x256xf32>, i32 -> vector<8x256xf32>
    %369 = arith.select %48, %367, %368 : vector<8x256xi1>, vector<8x256xf32>
    %370 = tpu.concatenate %345, %354, %348, %357, %360, %345, %363, %366, %351, %369 in 0 : vector<8x256xf32>, vector<8x256xf32>, vector<8x256xf32>, vector<8x256xf32>, vector<8x256xf32>, vector<8x256xf32>, vector<8x256xf32>, vector<8x256xf32>, vector<8x256xf32>, vector<8x256xf32> -> vector<80x256xf32>
    %c0_196 = arith.constant 0 : index
    %c0_197 = arith.constant 0 : index
    %371 = vector.load %arg4[%c0_196, %c0_197] : memref<32x80xf32, #tpu.memory_space<vmem>>, vector<32x80xf32>
    %cst_198 = arith.constant dense<0.000000e+00> : vector<32x256xf32>
    %372 = tpu.matmul %371, %370, %cst_198 {dimension_numbers = #tpu.dot_dimension_numbers<[1], [0], [0], [1], [0, 0, 1, 1], [], []>} : vector<32x80xf32>, vector<80x256xf32>, vector<32x256xf32> -> vector<32x256xf32>
    %c0_199 = arith.constant 0 : index
    %c0_200 = arith.constant 0 : index
    %c0_201 = arith.constant 0 : index
    %373 = vector.load %arg3[%c0_199, %c0_200, %c0_201] : memref<1x32x256xf32, #tpu.memory_space<vmem>>, vector<1x32x256xf32>
    %374 = vector.shape_cast %373 : vector<1x32x256xf32> to vector<32x256xf32>
    %375 = arith.addf %372, %374 : vector<32x256xf32>
    %c0_202 = arith.constant 0 : index
    %c0_203 = arith.constant 0 : index
    %376 = vector.load %arg5[%c0_202, %c0_203] : memref<32x1xf32, #tpu.memory_space<vmem>>, vector<32x1xf32>
    %cst_204 = arith.constant 4.000000e-01 : f32
    %377 = vector.broadcast %cst_204 : f32 to vector<32x1xf32>
    %378 = arith.mulf %376, %377 : vector<32x1xf32>
    %379 = vector.broadcast %378 : vector<32x1xf32> to vector<32x256xf32>
    %380 = arith.addf %375, %379 : vector<32x256xf32>
    %c0_205 = arith.constant 0 : index
    %c0_206 = arith.constant 0 : index
    %381 = vector.load %arg6[%c0_205, %c0_206] : memref<32x1xf32, #tpu.memory_space<vmem>>, vector<32x1xf32>
    %c0_207 = arith.constant 0 : index
    %c0_208 = arith.constant 0 : index
    %382 = vector.load %arg7[%c0_207, %c0_208] : memref<32x1xf32, #tpu.memory_space<vmem>>, vector<32x1xf32>
    %383 = vector.shape_cast %380 : vector<32x256xf32> to vector<1x32x256xf32>
    %cst_209 = arith.constant dense<0.000000e+00> : vector<1xf32>
    %384 = vector.multi_reduction <add>, %383, %cst_209 [1, 2] : vector<1x32x256xf32> to vector<1xf32>
    %385 = vector.shape_cast %384 : vector<1xf32> to vector<1x1x1xf32>
    %386 = vector.extract %385[0, 0, 0] : f32 from vector<1x1x1xf32>
    %cst_210 = arith.constant 1.22070313E-4 : f32
    %387 = arith.mulf %386, %cst_210 : f32
    %388 = arith.mulf %380, %380 : vector<32x256xf32>
    %389 = vector.shape_cast %388 : vector<32x256xf32> to vector<1x32x256xf32>
    %cst_211 = arith.constant dense<0.000000e+00> : vector<1xf32>
    %390 = vector.multi_reduction <add>, %389, %cst_211 [1, 2] : vector<1x32x256xf32> to vector<1xf32>
    %391 = vector.shape_cast %390 : vector<1xf32> to vector<1x1x1xf32>
    %392 = vector.extract %391[0, 0, 0] : f32 from vector<1x1x1xf32>
    %cst_212 = arith.constant 1.22070313E-4 : f32
    %393 = arith.mulf %392, %cst_212 : f32
    %394 = arith.mulf %387, %387 : f32
    %395 = arith.subf %393, %394 : f32
    %cst_213 = arith.constant 0.000000e+00 : f32
    %396 = arith.maximumf %395, %cst_213 : f32
    %cst_214 = arith.constant 9.99999974E-6 : f32
    %397 = arith.addf %396, %cst_214 : f32
    %398 = math.rsqrt %397 : f32
    %399 = vector.broadcast %398 : f32 to vector<32x1xf32>
    %400 = arith.mulf %381, %399 : vector<32x1xf32>
    %401 = vector.broadcast %387 : f32 to vector<32x1xf32>
    %402 = arith.mulf %401, %400 : vector<32x1xf32>
    %403 = arith.subf %382, %402 : vector<32x1xf32>
    %404 = vector.broadcast %400 : vector<32x1xf32> to vector<32x256xf32>
    %405 = arith.mulf %380, %404 : vector<32x256xf32>
    %406 = vector.broadcast %403 : vector<32x1xf32> to vector<32x256xf32>
    %407 = arith.addf %405, %406 : vector<32x256xf32>
    %cst_215 = arith.constant 0.00999999977 : f32
    %408 = vector.broadcast %cst_215 : f32 to vector<32x256xf32>
    %409 = arith.mulf %408, %407 : vector<32x256xf32>
    %410 = arith.maximumf %407, %409 : vector<32x256xf32>
    %c0_216 = arith.constant 0 : index
    %c0_217 = arith.constant 0 : index
    %411 = vector.load %arg8[%c0_216, %c0_217] : memref<8x32xf32, #tpu.memory_space<vmem>>, vector<8x32xf32>
    %cst_218 = arith.constant dense<0.000000e+00> : vector<8x256xf32>
    %412 = tpu.matmul %411, %410, %cst_218 {dimension_numbers = #tpu.dot_dimension_numbers<[1], [0], [0], [1], [0, 0, 1, 1], [], []>} : vector<8x32xf32>, vector<32x256xf32>, vector<8x256xf32> -> vector<8x256xf32>
    %c0_219 = arith.constant 0 : index
    %c0_220 = arith.constant 0 : index
    %413 = vector.load %arg9[%c0_219, %c0_220] : memref<8x1xf32, #tpu.memory_space<vmem>>, vector<8x1xf32>
    %414 = vector.broadcast %413 : vector<8x1xf32> to vector<8x256xf32>
    %415 = arith.addf %412, %414 : vector<8x256xf32>
    %c0_221 = arith.constant 0 : index
    %c4 = arith.constant 4 : index
    %c0_222 = arith.constant 0 : index
    %416 = vector.load %arg2[%c0_221, %c4, %c0_222] : memref<1x10x256xf32, #tpu.memory_space<vmem>>, vector<1x1x256xf32>
    %417 = vector.shape_cast %416 : vector<1x1x256xf32> to vector<1x256xf32>
    %418 = vector.broadcast %417 : vector<1x256xf32> to vector<8x256xf32>
    %419 = arith.mulf %415, %418 : vector<8x256xf32>
    %420 = arith.addf %345, %419 : vector<8x256xf32>
    %c16_i32_223 = arith.constant 16 : i32
    %421 = tpu.dynamic_rotate %420 by %c16_i32_223 dim 1 : vector<8x256xf32>, i32 -> vector<8x256xf32>
    %c240_i32_224 = arith.constant 240 : i32
    %422 = tpu.dynamic_rotate %420 by %c240_i32_224 dim 1 : vector<8x256xf32>, i32 -> vector<8x256xf32>
    %423 = arith.select %36, %422, %421 : vector<8x256xi1>, vector<8x256xf32>
    %c16_i32_225 = arith.constant 16 : i32
    %424 = tpu.dynamic_rotate %420 by %c16_i32_225 dim 1 : vector<8x256xf32>, i32 -> vector<8x256xf32>
    %c240_i32_226 = arith.constant 240 : i32
    %425 = tpu.dynamic_rotate %420 by %c240_i32_226 dim 1 : vector<8x256xf32>, i32 -> vector<8x256xf32>
    %426 = arith.select %40, %424, %425 : vector<8x256xi1>, vector<8x256xf32>
    %c1_i32_227 = arith.constant 1 : i32
    %427 = tpu.dynamic_rotate %423 by %c1_i32_227 dim 1 : vector<8x256xf32>, i32 -> vector<8x256xf32>
    %c255_i32_228 = arith.constant 255 : i32
    %428 = tpu.dynamic_rotate %423 by %c255_i32_228 dim 1 : vector<8x256xf32>, i32 -> vector<8x256xf32>
    %429 = arith.select %44, %428, %427 : vector<8x256xi1>, vector<8x256xf32>
    %c1_i32_229 = arith.constant 1 : i32
    %430 = tpu.dynamic_rotate %423 by %c1_i32_229 dim 1 : vector<8x256xf32>, i32 -> vector<8x256xf32>
    %c255_i32_230 = arith.constant 255 : i32
    %431 = tpu.dynamic_rotate %423 by %c255_i32_230 dim 1 : vector<8x256xf32>, i32 -> vector<8x256xf32>
    %432 = arith.select %48, %430, %431 : vector<8x256xi1>, vector<8x256xf32>
    %c1_i32_231 = arith.constant 1 : i32
    %433 = tpu.dynamic_rotate %420 by %c1_i32_231 dim 1 : vector<8x256xf32>, i32 -> vector<8x256xf32>
    %c255_i32_232 = arith.constant 255 : i32
    %434 = tpu.dynamic_rotate %420 by %c255_i32_232 dim 1 : vector<8x256xf32>, i32 -> vector<8x256xf32>
    %435 = arith.select %44, %434, %433 : vector<8x256xi1>, vector<8x256xf32>
    %c1_i32_233 = arith.constant 1 : i32
    %436 = tpu.dynamic_rotate %420 by %c1_i32_233 dim 1 : vector<8x256xf32>, i32 -> vector<8x256xf32>
    %c255_i32_234 = arith.constant 255 : i32
    %437 = tpu.dynamic_rotate %420 by %c255_i32_234 dim 1 : vector<8x256xf32>, i32 -> vector<8x256xf32>
    %438 = arith.select %48, %436, %437 : vector<8x256xi1>, vector<8x256xf32>
    %c1_i32_235 = arith.constant 1 : i32
    %439 = tpu.dynamic_rotate %426 by %c1_i32_235 dim 1 : vector<8x256xf32>, i32 -> vector<8x256xf32>
    %c255_i32_236 = arith.constant 255 : i32
    %440 = tpu.dynamic_rotate %426 by %c255_i32_236 dim 1 : vector<8x256xf32>, i32 -> vector<8x256xf32>
    %441 = arith.select %44, %440, %439 : vector<8x256xi1>, vector<8x256xf32>
    %c1_i32_237 = arith.constant 1 : i32
    %442 = tpu.dynamic_rotate %426 by %c1_i32_237 dim 1 : vector<8x256xf32>, i32 -> vector<8x256xf32>
    %c255_i32_238 = arith.constant 255 : i32
    %443 = tpu.dynamic_rotate %426 by %c255_i32_238 dim 1 : vector<8x256xf32>, i32 -> vector<8x256xf32>
    %444 = arith.select %48, %442, %443 : vector<8x256xi1>, vector<8x256xf32>
    %445 = tpu.concatenate %420, %429, %423, %432, %435, %420, %438, %441, %426, %444 in 0 : vector<8x256xf32>, vector<8x256xf32>, vector<8x256xf32>, vector<8x256xf32>, vector<8x256xf32>, vector<8x256xf32>, vector<8x256xf32>, vector<8x256xf32>, vector<8x256xf32>, vector<8x256xf32> -> vector<80x256xf32>
    %c0_239 = arith.constant 0 : index
    %c0_240 = arith.constant 0 : index
    %446 = vector.load %arg4[%c0_239, %c0_240] : memref<32x80xf32, #tpu.memory_space<vmem>>, vector<32x80xf32>
    %cst_241 = arith.constant dense<0.000000e+00> : vector<32x256xf32>
    %447 = tpu.matmul %446, %445, %cst_241 {dimension_numbers = #tpu.dot_dimension_numbers<[1], [0], [0], [1], [0, 0, 1, 1], [], []>} : vector<32x80xf32>, vector<80x256xf32>, vector<32x256xf32> -> vector<32x256xf32>
    %c0_242 = arith.constant 0 : index
    %c0_243 = arith.constant 0 : index
    %c0_244 = arith.constant 0 : index
    %448 = vector.load %arg3[%c0_242, %c0_243, %c0_244] : memref<1x32x256xf32, #tpu.memory_space<vmem>>, vector<1x32x256xf32>
    %449 = vector.shape_cast %448 : vector<1x32x256xf32> to vector<32x256xf32>
    %450 = arith.addf %447, %449 : vector<32x256xf32>
    %c0_245 = arith.constant 0 : index
    %c0_246 = arith.constant 0 : index
    %451 = vector.load %arg5[%c0_245, %c0_246] : memref<32x1xf32, #tpu.memory_space<vmem>>, vector<32x1xf32>
    %cst_247 = arith.constant 5.000000e-01 : f32
    %452 = vector.broadcast %cst_247 : f32 to vector<32x1xf32>
    %453 = arith.mulf %451, %452 : vector<32x1xf32>
    %454 = vector.broadcast %453 : vector<32x1xf32> to vector<32x256xf32>
    %455 = arith.addf %450, %454 : vector<32x256xf32>
    %c0_248 = arith.constant 0 : index
    %c0_249 = arith.constant 0 : index
    %456 = vector.load %arg6[%c0_248, %c0_249] : memref<32x1xf32, #tpu.memory_space<vmem>>, vector<32x1xf32>
    %c0_250 = arith.constant 0 : index
    %c0_251 = arith.constant 0 : index
    %457 = vector.load %arg7[%c0_250, %c0_251] : memref<32x1xf32, #tpu.memory_space<vmem>>, vector<32x1xf32>
    %458 = vector.shape_cast %455 : vector<32x256xf32> to vector<1x32x256xf32>
    %cst_252 = arith.constant dense<0.000000e+00> : vector<1xf32>
    %459 = vector.multi_reduction <add>, %458, %cst_252 [1, 2] : vector<1x32x256xf32> to vector<1xf32>
    %460 = vector.shape_cast %459 : vector<1xf32> to vector<1x1x1xf32>
    %461 = vector.extract %460[0, 0, 0] : f32 from vector<1x1x1xf32>
    %cst_253 = arith.constant 1.22070313E-4 : f32
    %462 = arith.mulf %461, %cst_253 : f32
    %463 = arith.mulf %455, %455 : vector<32x256xf32>
    %464 = vector.shape_cast %463 : vector<32x256xf32> to vector<1x32x256xf32>
    %cst_254 = arith.constant dense<0.000000e+00> : vector<1xf32>
    %465 = vector.multi_reduction <add>, %464, %cst_254 [1, 2] : vector<1x32x256xf32> to vector<1xf32>
    %466 = vector.shape_cast %465 : vector<1xf32> to vector<1x1x1xf32>
    %467 = vector.extract %466[0, 0, 0] : f32 from vector<1x1x1xf32>
    %cst_255 = arith.constant 1.22070313E-4 : f32
    %468 = arith.mulf %467, %cst_255 : f32
    %469 = arith.mulf %462, %462 : f32
    %470 = arith.subf %468, %469 : f32
    %cst_256 = arith.constant 0.000000e+00 : f32
    %471 = arith.maximumf %470, %cst_256 : f32
    %cst_257 = arith.constant 9.99999974E-6 : f32
    %472 = arith.addf %471, %cst_257 : f32
    %473 = math.rsqrt %472 : f32
    %474 = vector.broadcast %473 : f32 to vector<32x1xf32>
    %475 = arith.mulf %456, %474 : vector<32x1xf32>
    %476 = vector.broadcast %462 : f32 to vector<32x1xf32>
    %477 = arith.mulf %476, %475 : vector<32x1xf32>
    %478 = arith.subf %457, %477 : vector<32x1xf32>
    %479 = vector.broadcast %475 : vector<32x1xf32> to vector<32x256xf32>
    %480 = arith.mulf %455, %479 : vector<32x256xf32>
    %481 = vector.broadcast %478 : vector<32x1xf32> to vector<32x256xf32>
    %482 = arith.addf %480, %481 : vector<32x256xf32>
    %cst_258 = arith.constant 0.00999999977 : f32
    %483 = vector.broadcast %cst_258 : f32 to vector<32x256xf32>
    %484 = arith.mulf %483, %482 : vector<32x256xf32>
    %485 = arith.maximumf %482, %484 : vector<32x256xf32>
    %c0_259 = arith.constant 0 : index
    %c0_260 = arith.constant 0 : index
    %486 = vector.load %arg8[%c0_259, %c0_260] : memref<8x32xf32, #tpu.memory_space<vmem>>, vector<8x32xf32>
    %cst_261 = arith.constant dense<0.000000e+00> : vector<8x256xf32>
    %487 = tpu.matmul %486, %485, %cst_261 {dimension_numbers = #tpu.dot_dimension_numbers<[1], [0], [0], [1], [0, 0, 1, 1], [], []>} : vector<8x32xf32>, vector<32x256xf32>, vector<8x256xf32> -> vector<8x256xf32>
    %c0_262 = arith.constant 0 : index
    %c0_263 = arith.constant 0 : index
    %488 = vector.load %arg9[%c0_262, %c0_263] : memref<8x1xf32, #tpu.memory_space<vmem>>, vector<8x1xf32>
    %489 = vector.broadcast %488 : vector<8x1xf32> to vector<8x256xf32>
    %490 = arith.addf %487, %489 : vector<8x256xf32>
    %c0_264 = arith.constant 0 : index
    %c5 = arith.constant 5 : index
    %c0_265 = arith.constant 0 : index
    %491 = vector.load %arg2[%c0_264, %c5, %c0_265] : memref<1x10x256xf32, #tpu.memory_space<vmem>>, vector<1x1x256xf32>
    %492 = vector.shape_cast %491 : vector<1x1x256xf32> to vector<1x256xf32>
    %493 = vector.broadcast %492 : vector<1x256xf32> to vector<8x256xf32>
    %494 = arith.mulf %490, %493 : vector<8x256xf32>
    %495 = arith.addf %420, %494 : vector<8x256xf32>
    %c16_i32_266 = arith.constant 16 : i32
    %496 = tpu.dynamic_rotate %495 by %c16_i32_266 dim 1 : vector<8x256xf32>, i32 -> vector<8x256xf32>
    %c240_i32_267 = arith.constant 240 : i32
    %497 = tpu.dynamic_rotate %495 by %c240_i32_267 dim 1 : vector<8x256xf32>, i32 -> vector<8x256xf32>
    %498 = arith.select %36, %497, %496 : vector<8x256xi1>, vector<8x256xf32>
    %c16_i32_268 = arith.constant 16 : i32
    %499 = tpu.dynamic_rotate %495 by %c16_i32_268 dim 1 : vector<8x256xf32>, i32 -> vector<8x256xf32>
    %c240_i32_269 = arith.constant 240 : i32
    %500 = tpu.dynamic_rotate %495 by %c240_i32_269 dim 1 : vector<8x256xf32>, i32 -> vector<8x256xf32>
    %501 = arith.select %40, %499, %500 : vector<8x256xi1>, vector<8x256xf32>
    %c1_i32_270 = arith.constant 1 : i32
    %502 = tpu.dynamic_rotate %498 by %c1_i32_270 dim 1 : vector<8x256xf32>, i32 -> vector<8x256xf32>
    %c255_i32_271 = arith.constant 255 : i32
    %503 = tpu.dynamic_rotate %498 by %c255_i32_271 dim 1 : vector<8x256xf32>, i32 -> vector<8x256xf32>
    %504 = arith.select %44, %503, %502 : vector<8x256xi1>, vector<8x256xf32>
    %c1_i32_272 = arith.constant 1 : i32
    %505 = tpu.dynamic_rotate %498 by %c1_i32_272 dim 1 : vector<8x256xf32>, i32 -> vector<8x256xf32>
    %c255_i32_273 = arith.constant 255 : i32
    %506 = tpu.dynamic_rotate %498 by %c255_i32_273 dim 1 : vector<8x256xf32>, i32 -> vector<8x256xf32>
    %507 = arith.select %48, %505, %506 : vector<8x256xi1>, vector<8x256xf32>
    %c1_i32_274 = arith.constant 1 : i32
    %508 = tpu.dynamic_rotate %495 by %c1_i32_274 dim 1 : vector<8x256xf32>, i32 -> vector<8x256xf32>
    %c255_i32_275 = arith.constant 255 : i32
    %509 = tpu.dynamic_rotate %495 by %c255_i32_275 dim 1 : vector<8x256xf32>, i32 -> vector<8x256xf32>
    %510 = arith.select %44, %509, %508 : vector<8x256xi1>, vector<8x256xf32>
    %c1_i32_276 = arith.constant 1 : i32
    %511 = tpu.dynamic_rotate %495 by %c1_i32_276 dim 1 : vector<8x256xf32>, i32 -> vector<8x256xf32>
    %c255_i32_277 = arith.constant 255 : i32
    %512 = tpu.dynamic_rotate %495 by %c255_i32_277 dim 1 : vector<8x256xf32>, i32 -> vector<8x256xf32>
    %513 = arith.select %48, %511, %512 : vector<8x256xi1>, vector<8x256xf32>
    %c1_i32_278 = arith.constant 1 : i32
    %514 = tpu.dynamic_rotate %501 by %c1_i32_278 dim 1 : vector<8x256xf32>, i32 -> vector<8x256xf32>
    %c255_i32_279 = arith.constant 255 : i32
    %515 = tpu.dynamic_rotate %501 by %c255_i32_279 dim 1 : vector<8x256xf32>, i32 -> vector<8x256xf32>
    %516 = arith.select %44, %515, %514 : vector<8x256xi1>, vector<8x256xf32>
    %c1_i32_280 = arith.constant 1 : i32
    %517 = tpu.dynamic_rotate %501 by %c1_i32_280 dim 1 : vector<8x256xf32>, i32 -> vector<8x256xf32>
    %c255_i32_281 = arith.constant 255 : i32
    %518 = tpu.dynamic_rotate %501 by %c255_i32_281 dim 1 : vector<8x256xf32>, i32 -> vector<8x256xf32>
    %519 = arith.select %48, %517, %518 : vector<8x256xi1>, vector<8x256xf32>
    %520 = tpu.concatenate %495, %504, %498, %507, %510, %495, %513, %516, %501, %519 in 0 : vector<8x256xf32>, vector<8x256xf32>, vector<8x256xf32>, vector<8x256xf32>, vector<8x256xf32>, vector<8x256xf32>, vector<8x256xf32>, vector<8x256xf32>, vector<8x256xf32>, vector<8x256xf32> -> vector<80x256xf32>
    %c0_282 = arith.constant 0 : index
    %c0_283 = arith.constant 0 : index
    %521 = vector.load %arg4[%c0_282, %c0_283] : memref<32x80xf32, #tpu.memory_space<vmem>>, vector<32x80xf32>
    %cst_284 = arith.constant dense<0.000000e+00> : vector<32x256xf32>
    %522 = tpu.matmul %521, %520, %cst_284 {dimension_numbers = #tpu.dot_dimension_numbers<[1], [0], [0], [1], [0, 0, 1, 1], [], []>} : vector<32x80xf32>, vector<80x256xf32>, vector<32x256xf32> -> vector<32x256xf32>
    %c0_285 = arith.constant 0 : index
    %c0_286 = arith.constant 0 : index
    %c0_287 = arith.constant 0 : index
    %523 = vector.load %arg3[%c0_285, %c0_286, %c0_287] : memref<1x32x256xf32, #tpu.memory_space<vmem>>, vector<1x32x256xf32>
    %524 = vector.shape_cast %523 : vector<1x32x256xf32> to vector<32x256xf32>
    %525 = arith.addf %522, %524 : vector<32x256xf32>
    %c0_288 = arith.constant 0 : index
    %c0_289 = arith.constant 0 : index
    %526 = vector.load %arg5[%c0_288, %c0_289] : memref<32x1xf32, #tpu.memory_space<vmem>>, vector<32x1xf32>
    %cst_290 = arith.constant 6.000000e-01 : f32
    %527 = vector.broadcast %cst_290 : f32 to vector<32x1xf32>
    %528 = arith.mulf %526, %527 : vector<32x1xf32>
    %529 = vector.broadcast %528 : vector<32x1xf32> to vector<32x256xf32>
    %530 = arith.addf %525, %529 : vector<32x256xf32>
    %c0_291 = arith.constant 0 : index
    %c0_292 = arith.constant 0 : index
    %531 = vector.load %arg6[%c0_291, %c0_292] : memref<32x1xf32, #tpu.memory_space<vmem>>, vector<32x1xf32>
    %c0_293 = arith.constant 0 : index
    %c0_294 = arith.constant 0 : index
    %532 = vector.load %arg7[%c0_293, %c0_294] : memref<32x1xf32, #tpu.memory_space<vmem>>, vector<32x1xf32>
    %533 = vector.shape_cast %530 : vector<32x256xf32> to vector<1x32x256xf32>
    %cst_295 = arith.constant dense<0.000000e+00> : vector<1xf32>
    %534 = vector.multi_reduction <add>, %533, %cst_295 [1, 2] : vector<1x32x256xf32> to vector<1xf32>
    %535 = vector.shape_cast %534 : vector<1xf32> to vector<1x1x1xf32>
    %536 = vector.extract %535[0, 0, 0] : f32 from vector<1x1x1xf32>
    %cst_296 = arith.constant 1.22070313E-4 : f32
    %537 = arith.mulf %536, %cst_296 : f32
    %538 = arith.mulf %530, %530 : vector<32x256xf32>
    %539 = vector.shape_cast %538 : vector<32x256xf32> to vector<1x32x256xf32>
    %cst_297 = arith.constant dense<0.000000e+00> : vector<1xf32>
    %540 = vector.multi_reduction <add>, %539, %cst_297 [1, 2] : vector<1x32x256xf32> to vector<1xf32>
    %541 = vector.shape_cast %540 : vector<1xf32> to vector<1x1x1xf32>
    %542 = vector.extract %541[0, 0, 0] : f32 from vector<1x1x1xf32>
    %cst_298 = arith.constant 1.22070313E-4 : f32
    %543 = arith.mulf %542, %cst_298 : f32
    %544 = arith.mulf %537, %537 : f32
    %545 = arith.subf %543, %544 : f32
    %cst_299 = arith.constant 0.000000e+00 : f32
    %546 = arith.maximumf %545, %cst_299 : f32
    %cst_300 = arith.constant 9.99999974E-6 : f32
    %547 = arith.addf %546, %cst_300 : f32
    %548 = math.rsqrt %547 : f32
    %549 = vector.broadcast %548 : f32 to vector<32x1xf32>
    %550 = arith.mulf %531, %549 : vector<32x1xf32>
    %551 = vector.broadcast %537 : f32 to vector<32x1xf32>
    %552 = arith.mulf %551, %550 : vector<32x1xf32>
    %553 = arith.subf %532, %552 : vector<32x1xf32>
    %554 = vector.broadcast %550 : vector<32x1xf32> to vector<32x256xf32>
    %555 = arith.mulf %530, %554 : vector<32x256xf32>
    %556 = vector.broadcast %553 : vector<32x1xf32> to vector<32x256xf32>
    %557 = arith.addf %555, %556 : vector<32x256xf32>
    %cst_301 = arith.constant 0.00999999977 : f32
    %558 = vector.broadcast %cst_301 : f32 to vector<32x256xf32>
    %559 = arith.mulf %558, %557 : vector<32x256xf32>
    %560 = arith.maximumf %557, %559 : vector<32x256xf32>
    %c0_302 = arith.constant 0 : index
    %c0_303 = arith.constant 0 : index
    %561 = vector.load %arg8[%c0_302, %c0_303] : memref<8x32xf32, #tpu.memory_space<vmem>>, vector<8x32xf32>
    %cst_304 = arith.constant dense<0.000000e+00> : vector<8x256xf32>
    %562 = tpu.matmul %561, %560, %cst_304 {dimension_numbers = #tpu.dot_dimension_numbers<[1], [0], [0], [1], [0, 0, 1, 1], [], []>} : vector<8x32xf32>, vector<32x256xf32>, vector<8x256xf32> -> vector<8x256xf32>
    %c0_305 = arith.constant 0 : index
    %c0_306 = arith.constant 0 : index
    %563 = vector.load %arg9[%c0_305, %c0_306] : memref<8x1xf32, #tpu.memory_space<vmem>>, vector<8x1xf32>
    %564 = vector.broadcast %563 : vector<8x1xf32> to vector<8x256xf32>
    %565 = arith.addf %562, %564 : vector<8x256xf32>
    %c0_307 = arith.constant 0 : index
    %c6 = arith.constant 6 : index
    %c0_308 = arith.constant 0 : index
    %566 = vector.load %arg2[%c0_307, %c6, %c0_308] : memref<1x10x256xf32, #tpu.memory_space<vmem>>, vector<1x1x256xf32>
    %567 = vector.shape_cast %566 : vector<1x1x256xf32> to vector<1x256xf32>
    %568 = vector.broadcast %567 : vector<1x256xf32> to vector<8x256xf32>
    %569 = arith.mulf %565, %568 : vector<8x256xf32>
    %570 = arith.addf %495, %569 : vector<8x256xf32>
    %c16_i32_309 = arith.constant 16 : i32
    %571 = tpu.dynamic_rotate %570 by %c16_i32_309 dim 1 : vector<8x256xf32>, i32 -> vector<8x256xf32>
    %c240_i32_310 = arith.constant 240 : i32
    %572 = tpu.dynamic_rotate %570 by %c240_i32_310 dim 1 : vector<8x256xf32>, i32 -> vector<8x256xf32>
    %573 = arith.select %36, %572, %571 : vector<8x256xi1>, vector<8x256xf32>
    %c16_i32_311 = arith.constant 16 : i32
    %574 = tpu.dynamic_rotate %570 by %c16_i32_311 dim 1 : vector<8x256xf32>, i32 -> vector<8x256xf32>
    %c240_i32_312 = arith.constant 240 : i32
    %575 = tpu.dynamic_rotate %570 by %c240_i32_312 dim 1 : vector<8x256xf32>, i32 -> vector<8x256xf32>
    %576 = arith.select %40, %574, %575 : vector<8x256xi1>, vector<8x256xf32>
    %c1_i32_313 = arith.constant 1 : i32
    %577 = tpu.dynamic_rotate %573 by %c1_i32_313 dim 1 : vector<8x256xf32>, i32 -> vector<8x256xf32>
    %c255_i32_314 = arith.constant 255 : i32
    %578 = tpu.dynamic_rotate %573 by %c255_i32_314 dim 1 : vector<8x256xf32>, i32 -> vector<8x256xf32>
    %579 = arith.select %44, %578, %577 : vector<8x256xi1>, vector<8x256xf32>
    %c1_i32_315 = arith.constant 1 : i32
    %580 = tpu.dynamic_rotate %573 by %c1_i32_315 dim 1 : vector<8x256xf32>, i32 -> vector<8x256xf32>
    %c255_i32_316 = arith.constant 255 : i32
    %581 = tpu.dynamic_rotate %573 by %c255_i32_316 dim 1 : vector<8x256xf32>, i32 -> vector<8x256xf32>
    %582 = arith.select %48, %580, %581 : vector<8x256xi1>, vector<8x256xf32>
    %c1_i32_317 = arith.constant 1 : i32
    %583 = tpu.dynamic_rotate %570 by %c1_i32_317 dim 1 : vector<8x256xf32>, i32 -> vector<8x256xf32>
    %c255_i32_318 = arith.constant 255 : i32
    %584 = tpu.dynamic_rotate %570 by %c255_i32_318 dim 1 : vector<8x256xf32>, i32 -> vector<8x256xf32>
    %585 = arith.select %44, %584, %583 : vector<8x256xi1>, vector<8x256xf32>
    %c1_i32_319 = arith.constant 1 : i32
    %586 = tpu.dynamic_rotate %570 by %c1_i32_319 dim 1 : vector<8x256xf32>, i32 -> vector<8x256xf32>
    %c255_i32_320 = arith.constant 255 : i32
    %587 = tpu.dynamic_rotate %570 by %c255_i32_320 dim 1 : vector<8x256xf32>, i32 -> vector<8x256xf32>
    %588 = arith.select %48, %586, %587 : vector<8x256xi1>, vector<8x256xf32>
    %c1_i32_321 = arith.constant 1 : i32
    %589 = tpu.dynamic_rotate %576 by %c1_i32_321 dim 1 : vector<8x256xf32>, i32 -> vector<8x256xf32>
    %c255_i32_322 = arith.constant 255 : i32
    %590 = tpu.dynamic_rotate %576 by %c255_i32_322 dim 1 : vector<8x256xf32>, i32 -> vector<8x256xf32>
    %591 = arith.select %44, %590, %589 : vector<8x256xi1>, vector<8x256xf32>
    %c1_i32_323 = arith.constant 1 : i32
    %592 = tpu.dynamic_rotate %576 by %c1_i32_323 dim 1 : vector<8x256xf32>, i32 -> vector<8x256xf32>
    %c255_i32_324 = arith.constant 255 : i32
    %593 = tpu.dynamic_rotate %576 by %c255_i32_324 dim 1 : vector<8x256xf32>, i32 -> vector<8x256xf32>
    %594 = arith.select %48, %592, %593 : vector<8x256xi1>, vector<8x256xf32>
    %595 = tpu.concatenate %570, %579, %573, %582, %585, %570, %588, %591, %576, %594 in 0 : vector<8x256xf32>, vector<8x256xf32>, vector<8x256xf32>, vector<8x256xf32>, vector<8x256xf32>, vector<8x256xf32>, vector<8x256xf32>, vector<8x256xf32>, vector<8x256xf32>, vector<8x256xf32> -> vector<80x256xf32>
    %c0_325 = arith.constant 0 : index
    %c0_326 = arith.constant 0 : index
    %596 = vector.load %arg4[%c0_325, %c0_326] : memref<32x80xf32, #tpu.memory_space<vmem>>, vector<32x80xf32>
    %cst_327 = arith.constant dense<0.000000e+00> : vector<32x256xf32>
    %597 = tpu.matmul %596, %595, %cst_327 {dimension_numbers = #tpu.dot_dimension_numbers<[1], [0], [0], [1], [0, 0, 1, 1], [], []>} : vector<32x80xf32>, vector<80x256xf32>, vector<32x256xf32> -> vector<32x256xf32>
    %c0_328 = arith.constant 0 : index
    %c0_329 = arith.constant 0 : index
    %c0_330 = arith.constant 0 : index
    %598 = vector.load %arg3[%c0_328, %c0_329, %c0_330] : memref<1x32x256xf32, #tpu.memory_space<vmem>>, vector<1x32x256xf32>
    %599 = vector.shape_cast %598 : vector<1x32x256xf32> to vector<32x256xf32>
    %600 = arith.addf %597, %599 : vector<32x256xf32>
    %c0_331 = arith.constant 0 : index
    %c0_332 = arith.constant 0 : index
    %601 = vector.load %arg5[%c0_331, %c0_332] : memref<32x1xf32, #tpu.memory_space<vmem>>, vector<32x1xf32>
    %cst_333 = arith.constant 0.699999988 : f32
    %602 = vector.broadcast %cst_333 : f32 to vector<32x1xf32>
    %603 = arith.mulf %601, %602 : vector<32x1xf32>
    %604 = vector.broadcast %603 : vector<32x1xf32> to vector<32x256xf32>
    %605 = arith.addf %600, %604 : vector<32x256xf32>
    %c0_334 = arith.constant 0 : index
    %c0_335 = arith.constant 0 : index
    %606 = vector.load %arg6[%c0_334, %c0_335] : memref<32x1xf32, #tpu.memory_space<vmem>>, vector<32x1xf32>
    %c0_336 = arith.constant 0 : index
    %c0_337 = arith.constant 0 : index
    %607 = vector.load %arg7[%c0_336, %c0_337] : memref<32x1xf32, #tpu.memory_space<vmem>>, vector<32x1xf32>
    %608 = vector.shape_cast %605 : vector<32x256xf32> to vector<1x32x256xf32>
    %cst_338 = arith.constant dense<0.000000e+00> : vector<1xf32>
    %609 = vector.multi_reduction <add>, %608, %cst_338 [1, 2] : vector<1x32x256xf32> to vector<1xf32>
    %610 = vector.shape_cast %609 : vector<1xf32> to vector<1x1x1xf32>
    %611 = vector.extract %610[0, 0, 0] : f32 from vector<1x1x1xf32>
    %cst_339 = arith.constant 1.22070313E-4 : f32
    %612 = arith.mulf %611, %cst_339 : f32
    %613 = arith.mulf %605, %605 : vector<32x256xf32>
    %614 = vector.shape_cast %613 : vector<32x256xf32> to vector<1x32x256xf32>
    %cst_340 = arith.constant dense<0.000000e+00> : vector<1xf32>
    %615 = vector.multi_reduction <add>, %614, %cst_340 [1, 2] : vector<1x32x256xf32> to vector<1xf32>
    %616 = vector.shape_cast %615 : vector<1xf32> to vector<1x1x1xf32>
    %617 = vector.extract %616[0, 0, 0] : f32 from vector<1x1x1xf32>
    %cst_341 = arith.constant 1.22070313E-4 : f32
    %618 = arith.mulf %617, %cst_341 : f32
    %619 = arith.mulf %612, %612 : f32
    %620 = arith.subf %618, %619 : f32
    %cst_342 = arith.constant 0.000000e+00 : f32
    %621 = arith.maximumf %620, %cst_342 : f32
    %cst_343 = arith.constant 9.99999974E-6 : f32
    %622 = arith.addf %621, %cst_343 : f32
    %623 = math.rsqrt %622 : f32
    %624 = vector.broadcast %623 : f32 to vector<32x1xf32>
    %625 = arith.mulf %606, %624 : vector<32x1xf32>
    %626 = vector.broadcast %612 : f32 to vector<32x1xf32>
    %627 = arith.mulf %626, %625 : vector<32x1xf32>
    %628 = arith.subf %607, %627 : vector<32x1xf32>
    %629 = vector.broadcast %625 : vector<32x1xf32> to vector<32x256xf32>
    %630 = arith.mulf %605, %629 : vector<32x256xf32>
    %631 = vector.broadcast %628 : vector<32x1xf32> to vector<32x256xf32>
    %632 = arith.addf %630, %631 : vector<32x256xf32>
    %cst_344 = arith.constant 0.00999999977 : f32
    %633 = vector.broadcast %cst_344 : f32 to vector<32x256xf32>
    %634 = arith.mulf %633, %632 : vector<32x256xf32>
    %635 = arith.maximumf %632, %634 : vector<32x256xf32>
    %c0_345 = arith.constant 0 : index
    %c0_346 = arith.constant 0 : index
    %636 = vector.load %arg8[%c0_345, %c0_346] : memref<8x32xf32, #tpu.memory_space<vmem>>, vector<8x32xf32>
    %cst_347 = arith.constant dense<0.000000e+00> : vector<8x256xf32>
    %637 = tpu.matmul %636, %635, %cst_347 {dimension_numbers = #tpu.dot_dimension_numbers<[1], [0], [0], [1], [0, 0, 1, 1], [], []>} : vector<8x32xf32>, vector<32x256xf32>, vector<8x256xf32> -> vector<8x256xf32>
    %c0_348 = arith.constant 0 : index
    %c0_349 = arith.constant 0 : index
    %638 = vector.load %arg9[%c0_348, %c0_349] : memref<8x1xf32, #tpu.memory_space<vmem>>, vector<8x1xf32>
    %639 = vector.broadcast %638 : vector<8x1xf32> to vector<8x256xf32>
    %640 = arith.addf %637, %639 : vector<8x256xf32>
    %c0_350 = arith.constant 0 : index
    %c7 = arith.constant 7 : index
    %c0_351 = arith.constant 0 : index
    %641 = vector.load %arg2[%c0_350, %c7, %c0_351] : memref<1x10x256xf32, #tpu.memory_space<vmem>>, vector<1x1x256xf32>
    %642 = vector.shape_cast %641 : vector<1x1x256xf32> to vector<1x256xf32>
    %643 = vector.broadcast %642 : vector<1x256xf32> to vector<8x256xf32>
    %644 = arith.mulf %640, %643 : vector<8x256xf32>
    %645 = arith.addf %570, %644 : vector<8x256xf32>
    %c16_i32_352 = arith.constant 16 : i32
    %646 = tpu.dynamic_rotate %645 by %c16_i32_352 dim 1 : vector<8x256xf32>, i32 -> vector<8x256xf32>
    %c240_i32_353 = arith.constant 240 : i32
    %647 = tpu.dynamic_rotate %645 by %c240_i32_353 dim 1 : vector<8x256xf32>, i32 -> vector<8x256xf32>
    %648 = arith.select %36, %647, %646 : vector<8x256xi1>, vector<8x256xf32>
    %c16_i32_354 = arith.constant 16 : i32
    %649 = tpu.dynamic_rotate %645 by %c16_i32_354 dim 1 : vector<8x256xf32>, i32 -> vector<8x256xf32>
    %c240_i32_355 = arith.constant 240 : i32
    %650 = tpu.dynamic_rotate %645 by %c240_i32_355 dim 1 : vector<8x256xf32>, i32 -> vector<8x256xf32>
    %651 = arith.select %40, %649, %650 : vector<8x256xi1>, vector<8x256xf32>
    %c1_i32_356 = arith.constant 1 : i32
    %652 = tpu.dynamic_rotate %648 by %c1_i32_356 dim 1 : vector<8x256xf32>, i32 -> vector<8x256xf32>
    %c255_i32_357 = arith.constant 255 : i32
    %653 = tpu.dynamic_rotate %648 by %c255_i32_357 dim 1 : vector<8x256xf32>, i32 -> vector<8x256xf32>
    %654 = arith.select %44, %653, %652 : vector<8x256xi1>, vector<8x256xf32>
    %c1_i32_358 = arith.constant 1 : i32
    %655 = tpu.dynamic_rotate %648 by %c1_i32_358 dim 1 : vector<8x256xf32>, i32 -> vector<8x256xf32>
    %c255_i32_359 = arith.constant 255 : i32
    %656 = tpu.dynamic_rotate %648 by %c255_i32_359 dim 1 : vector<8x256xf32>, i32 -> vector<8x256xf32>
    %657 = arith.select %48, %655, %656 : vector<8x256xi1>, vector<8x256xf32>
    %c1_i32_360 = arith.constant 1 : i32
    %658 = tpu.dynamic_rotate %645 by %c1_i32_360 dim 1 : vector<8x256xf32>, i32 -> vector<8x256xf32>
    %c255_i32_361 = arith.constant 255 : i32
    %659 = tpu.dynamic_rotate %645 by %c255_i32_361 dim 1 : vector<8x256xf32>, i32 -> vector<8x256xf32>
    %660 = arith.select %44, %659, %658 : vector<8x256xi1>, vector<8x256xf32>
    %c1_i32_362 = arith.constant 1 : i32
    %661 = tpu.dynamic_rotate %645 by %c1_i32_362 dim 1 : vector<8x256xf32>, i32 -> vector<8x256xf32>
    %c255_i32_363 = arith.constant 255 : i32
    %662 = tpu.dynamic_rotate %645 by %c255_i32_363 dim 1 : vector<8x256xf32>, i32 -> vector<8x256xf32>
    %663 = arith.select %48, %661, %662 : vector<8x256xi1>, vector<8x256xf32>
    %c1_i32_364 = arith.constant 1 : i32
    %664 = tpu.dynamic_rotate %651 by %c1_i32_364 dim 1 : vector<8x256xf32>, i32 -> vector<8x256xf32>
    %c255_i32_365 = arith.constant 255 : i32
    %665 = tpu.dynamic_rotate %651 by %c255_i32_365 dim 1 : vector<8x256xf32>, i32 -> vector<8x256xf32>
    %666 = arith.select %44, %665, %664 : vector<8x256xi1>, vector<8x256xf32>
    %c1_i32_366 = arith.constant 1 : i32
    %667 = tpu.dynamic_rotate %651 by %c1_i32_366 dim 1 : vector<8x256xf32>, i32 -> vector<8x256xf32>
    %c255_i32_367 = arith.constant 255 : i32
    %668 = tpu.dynamic_rotate %651 by %c255_i32_367 dim 1 : vector<8x256xf32>, i32 -> vector<8x256xf32>
    %669 = arith.select %48, %667, %668 : vector<8x256xi1>, vector<8x256xf32>
    %670 = tpu.concatenate %645, %654, %648, %657, %660, %645, %663, %666, %651, %669 in 0 : vector<8x256xf32>, vector<8x256xf32>, vector<8x256xf32>, vector<8x256xf32>, vector<8x256xf32>, vector<8x256xf32>, vector<8x256xf32>, vector<8x256xf32>, vector<8x256xf32>, vector<8x256xf32> -> vector<80x256xf32>
    %c0_368 = arith.constant 0 : index
    %c0_369 = arith.constant 0 : index
    %671 = vector.load %arg4[%c0_368, %c0_369] : memref<32x80xf32, #tpu.memory_space<vmem>>, vector<32x80xf32>
    %cst_370 = arith.constant dense<0.000000e+00> : vector<32x256xf32>
    %672 = tpu.matmul %671, %670, %cst_370 {dimension_numbers = #tpu.dot_dimension_numbers<[1], [0], [0], [1], [0, 0, 1, 1], [], []>} : vector<32x80xf32>, vector<80x256xf32>, vector<32x256xf32> -> vector<32x256xf32>
    %c0_371 = arith.constant 0 : index
    %c0_372 = arith.constant 0 : index
    %c0_373 = arith.constant 0 : index
    %673 = vector.load %arg3[%c0_371, %c0_372, %c0_373] : memref<1x32x256xf32, #tpu.memory_space<vmem>>, vector<1x32x256xf32>
    %674 = vector.shape_cast %673 : vector<1x32x256xf32> to vector<32x256xf32>
    %675 = arith.addf %672, %674 : vector<32x256xf32>
    %c0_374 = arith.constant 0 : index
    %c0_375 = arith.constant 0 : index
    %676 = vector.load %arg5[%c0_374, %c0_375] : memref<32x1xf32, #tpu.memory_space<vmem>>, vector<32x1xf32>
    %cst_376 = arith.constant 8.000000e-01 : f32
    %677 = vector.broadcast %cst_376 : f32 to vector<32x1xf32>
    %678 = arith.mulf %676, %677 : vector<32x1xf32>
    %679 = vector.broadcast %678 : vector<32x1xf32> to vector<32x256xf32>
    %680 = arith.addf %675, %679 : vector<32x256xf32>
    %c0_377 = arith.constant 0 : index
    %c0_378 = arith.constant 0 : index
    %681 = vector.load %arg6[%c0_377, %c0_378] : memref<32x1xf32, #tpu.memory_space<vmem>>, vector<32x1xf32>
    %c0_379 = arith.constant 0 : index
    %c0_380 = arith.constant 0 : index
    %682 = vector.load %arg7[%c0_379, %c0_380] : memref<32x1xf32, #tpu.memory_space<vmem>>, vector<32x1xf32>
    %683 = vector.shape_cast %680 : vector<32x256xf32> to vector<1x32x256xf32>
    %cst_381 = arith.constant dense<0.000000e+00> : vector<1xf32>
    %684 = vector.multi_reduction <add>, %683, %cst_381 [1, 2] : vector<1x32x256xf32> to vector<1xf32>
    %685 = vector.shape_cast %684 : vector<1xf32> to vector<1x1x1xf32>
    %686 = vector.extract %685[0, 0, 0] : f32 from vector<1x1x1xf32>
    %cst_382 = arith.constant 1.22070313E-4 : f32
    %687 = arith.mulf %686, %cst_382 : f32
    %688 = arith.mulf %680, %680 : vector<32x256xf32>
    %689 = vector.shape_cast %688 : vector<32x256xf32> to vector<1x32x256xf32>
    %cst_383 = arith.constant dense<0.000000e+00> : vector<1xf32>
    %690 = vector.multi_reduction <add>, %689, %cst_383 [1, 2] : vector<1x32x256xf32> to vector<1xf32>
    %691 = vector.shape_cast %690 : vector<1xf32> to vector<1x1x1xf32>
    %692 = vector.extract %691[0, 0, 0] : f32 from vector<1x1x1xf32>
    %cst_384 = arith.constant 1.22070313E-4 : f32
    %693 = arith.mulf %692, %cst_384 : f32
    %694 = arith.mulf %687, %687 : f32
    %695 = arith.subf %693, %694 : f32
    %cst_385 = arith.constant 0.000000e+00 : f32
    %696 = arith.maximumf %695, %cst_385 : f32
    %cst_386 = arith.constant 9.99999974E-6 : f32
    %697 = arith.addf %696, %cst_386 : f32
    %698 = math.rsqrt %697 : f32
    %699 = vector.broadcast %698 : f32 to vector<32x1xf32>
    %700 = arith.mulf %681, %699 : vector<32x1xf32>
    %701 = vector.broadcast %687 : f32 to vector<32x1xf32>
    %702 = arith.mulf %701, %700 : vector<32x1xf32>
    %703 = arith.subf %682, %702 : vector<32x1xf32>
    %704 = vector.broadcast %700 : vector<32x1xf32> to vector<32x256xf32>
    %705 = arith.mulf %680, %704 : vector<32x256xf32>
    %706 = vector.broadcast %703 : vector<32x1xf32> to vector<32x256xf32>
    %707 = arith.addf %705, %706 : vector<32x256xf32>
    %cst_387 = arith.constant 0.00999999977 : f32
    %708 = vector.broadcast %cst_387 : f32 to vector<32x256xf32>
    %709 = arith.mulf %708, %707 : vector<32x256xf32>
    %710 = arith.maximumf %707, %709 : vector<32x256xf32>
    %c0_388 = arith.constant 0 : index
    %c0_389 = arith.constant 0 : index
    %711 = vector.load %arg8[%c0_388, %c0_389] : memref<8x32xf32, #tpu.memory_space<vmem>>, vector<8x32xf32>
    %cst_390 = arith.constant dense<0.000000e+00> : vector<8x256xf32>
    %712 = tpu.matmul %711, %710, %cst_390 {dimension_numbers = #tpu.dot_dimension_numbers<[1], [0], [0], [1], [0, 0, 1, 1], [], []>} : vector<8x32xf32>, vector<32x256xf32>, vector<8x256xf32> -> vector<8x256xf32>
    %c0_391 = arith.constant 0 : index
    %c0_392 = arith.constant 0 : index
    %713 = vector.load %arg9[%c0_391, %c0_392] : memref<8x1xf32, #tpu.memory_space<vmem>>, vector<8x1xf32>
    %714 = vector.broadcast %713 : vector<8x1xf32> to vector<8x256xf32>
    %715 = arith.addf %712, %714 : vector<8x256xf32>
    %c0_393 = arith.constant 0 : index
    %c8 = arith.constant 8 : index
    %c0_394 = arith.constant 0 : index
    %716 = vector.load %arg2[%c0_393, %c8, %c0_394] : memref<1x10x256xf32, #tpu.memory_space<vmem>>, vector<1x1x256xf32>
    %717 = vector.shape_cast %716 : vector<1x1x256xf32> to vector<1x256xf32>
    %718 = vector.broadcast %717 : vector<1x256xf32> to vector<8x256xf32>
    %719 = arith.mulf %715, %718 : vector<8x256xf32>
    %720 = arith.addf %645, %719 : vector<8x256xf32>
    %c16_i32_395 = arith.constant 16 : i32
    %721 = tpu.dynamic_rotate %720 by %c16_i32_395 dim 1 : vector<8x256xf32>, i32 -> vector<8x256xf32>
    %c240_i32_396 = arith.constant 240 : i32
    %722 = tpu.dynamic_rotate %720 by %c240_i32_396 dim 1 : vector<8x256xf32>, i32 -> vector<8x256xf32>
    %723 = arith.select %36, %722, %721 : vector<8x256xi1>, vector<8x256xf32>
    %c16_i32_397 = arith.constant 16 : i32
    %724 = tpu.dynamic_rotate %720 by %c16_i32_397 dim 1 : vector<8x256xf32>, i32 -> vector<8x256xf32>
    %c240_i32_398 = arith.constant 240 : i32
    %725 = tpu.dynamic_rotate %720 by %c240_i32_398 dim 1 : vector<8x256xf32>, i32 -> vector<8x256xf32>
    %726 = arith.select %40, %724, %725 : vector<8x256xi1>, vector<8x256xf32>
    %c1_i32_399 = arith.constant 1 : i32
    %727 = tpu.dynamic_rotate %723 by %c1_i32_399 dim 1 : vector<8x256xf32>, i32 -> vector<8x256xf32>
    %c255_i32_400 = arith.constant 255 : i32
    %728 = tpu.dynamic_rotate %723 by %c255_i32_400 dim 1 : vector<8x256xf32>, i32 -> vector<8x256xf32>
    %729 = arith.select %44, %728, %727 : vector<8x256xi1>, vector<8x256xf32>
    %c1_i32_401 = arith.constant 1 : i32
    %730 = tpu.dynamic_rotate %723 by %c1_i32_401 dim 1 : vector<8x256xf32>, i32 -> vector<8x256xf32>
    %c255_i32_402 = arith.constant 255 : i32
    %731 = tpu.dynamic_rotate %723 by %c255_i32_402 dim 1 : vector<8x256xf32>, i32 -> vector<8x256xf32>
    %732 = arith.select %48, %730, %731 : vector<8x256xi1>, vector<8x256xf32>
    %c1_i32_403 = arith.constant 1 : i32
    %733 = tpu.dynamic_rotate %720 by %c1_i32_403 dim 1 : vector<8x256xf32>, i32 -> vector<8x256xf32>
    %c255_i32_404 = arith.constant 255 : i32
    %734 = tpu.dynamic_rotate %720 by %c255_i32_404 dim 1 : vector<8x256xf32>, i32 -> vector<8x256xf32>
    %735 = arith.select %44, %734, %733 : vector<8x256xi1>, vector<8x256xf32>
    %c1_i32_405 = arith.constant 1 : i32
    %736 = tpu.dynamic_rotate %720 by %c1_i32_405 dim 1 : vector<8x256xf32>, i32 -> vector<8x256xf32>
    %c255_i32_406 = arith.constant 255 : i32
    %737 = tpu.dynamic_rotate %720 by %c255_i32_406 dim 1 : vector<8x256xf32>, i32 -> vector<8x256xf32>
    %738 = arith.select %48, %736, %737 : vector<8x256xi1>, vector<8x256xf32>
    %c1_i32_407 = arith.constant 1 : i32
    %739 = tpu.dynamic_rotate %726 by %c1_i32_407 dim 1 : vector<8x256xf32>, i32 -> vector<8x256xf32>
    %c255_i32_408 = arith.constant 255 : i32
    %740 = tpu.dynamic_rotate %726 by %c255_i32_408 dim 1 : vector<8x256xf32>, i32 -> vector<8x256xf32>
    %741 = arith.select %44, %740, %739 : vector<8x256xi1>, vector<8x256xf32>
    %c1_i32_409 = arith.constant 1 : i32
    %742 = tpu.dynamic_rotate %726 by %c1_i32_409 dim 1 : vector<8x256xf32>, i32 -> vector<8x256xf32>
    %c255_i32_410 = arith.constant 255 : i32
    %743 = tpu.dynamic_rotate %726 by %c255_i32_410 dim 1 : vector<8x256xf32>, i32 -> vector<8x256xf32>
    %744 = arith.select %48, %742, %743 : vector<8x256xi1>, vector<8x256xf32>
    %745 = tpu.concatenate %720, %729, %723, %732, %735, %720, %738, %741, %726, %744 in 0 : vector<8x256xf32>, vector<8x256xf32>, vector<8x256xf32>, vector<8x256xf32>, vector<8x256xf32>, vector<8x256xf32>, vector<8x256xf32>, vector<8x256xf32>, vector<8x256xf32>, vector<8x256xf32> -> vector<80x256xf32>
    %c0_411 = arith.constant 0 : index
    %c0_412 = arith.constant 0 : index
    %746 = vector.load %arg4[%c0_411, %c0_412] : memref<32x80xf32, #tpu.memory_space<vmem>>, vector<32x80xf32>
    %cst_413 = arith.constant dense<0.000000e+00> : vector<32x256xf32>
    %747 = tpu.matmul %746, %745, %cst_413 {dimension_numbers = #tpu.dot_dimension_numbers<[1], [0], [0], [1], [0, 0, 1, 1], [], []>} : vector<32x80xf32>, vector<80x256xf32>, vector<32x256xf32> -> vector<32x256xf32>
    %c0_414 = arith.constant 0 : index
    %c0_415 = arith.constant 0 : index
    %c0_416 = arith.constant 0 : index
    %748 = vector.load %arg3[%c0_414, %c0_415, %c0_416] : memref<1x32x256xf32, #tpu.memory_space<vmem>>, vector<1x32x256xf32>
    %749 = vector.shape_cast %748 : vector<1x32x256xf32> to vector<32x256xf32>
    %750 = arith.addf %747, %749 : vector<32x256xf32>
    %c0_417 = arith.constant 0 : index
    %c0_418 = arith.constant 0 : index
    %751 = vector.load %arg5[%c0_417, %c0_418] : memref<32x1xf32, #tpu.memory_space<vmem>>, vector<32x1xf32>
    %cst_419 = arith.constant 0.899999976 : f32
    %752 = vector.broadcast %cst_419 : f32 to vector<32x1xf32>
    %753 = arith.mulf %751, %752 : vector<32x1xf32>
    %754 = vector.broadcast %753 : vector<32x1xf32> to vector<32x256xf32>
    %755 = arith.addf %750, %754 : vector<32x256xf32>
    %c0_420 = arith.constant 0 : index
    %c0_421 = arith.constant 0 : index
    %756 = vector.load %arg6[%c0_420, %c0_421] : memref<32x1xf32, #tpu.memory_space<vmem>>, vector<32x1xf32>
    %c0_422 = arith.constant 0 : index
    %c0_423 = arith.constant 0 : index
    %757 = vector.load %arg7[%c0_422, %c0_423] : memref<32x1xf32, #tpu.memory_space<vmem>>, vector<32x1xf32>
    %758 = vector.shape_cast %755 : vector<32x256xf32> to vector<1x32x256xf32>
    %cst_424 = arith.constant dense<0.000000e+00> : vector<1xf32>
    %759 = vector.multi_reduction <add>, %758, %cst_424 [1, 2] : vector<1x32x256xf32> to vector<1xf32>
    %760 = vector.shape_cast %759 : vector<1xf32> to vector<1x1x1xf32>
    %761 = vector.extract %760[0, 0, 0] : f32 from vector<1x1x1xf32>
    %cst_425 = arith.constant 1.22070313E-4 : f32
    %762 = arith.mulf %761, %cst_425 : f32
    %763 = arith.mulf %755, %755 : vector<32x256xf32>
    %764 = vector.shape_cast %763 : vector<32x256xf32> to vector<1x32x256xf32>
    %cst_426 = arith.constant dense<0.000000e+00> : vector<1xf32>
    %765 = vector.multi_reduction <add>, %764, %cst_426 [1, 2] : vector<1x32x256xf32> to vector<1xf32>
    %766 = vector.shape_cast %765 : vector<1xf32> to vector<1x1x1xf32>
    %767 = vector.extract %766[0, 0, 0] : f32 from vector<1x1x1xf32>
    %cst_427 = arith.constant 1.22070313E-4 : f32
    %768 = arith.mulf %767, %cst_427 : f32
    %769 = arith.mulf %762, %762 : f32
    %770 = arith.subf %768, %769 : f32
    %cst_428 = arith.constant 0.000000e+00 : f32
    %771 = arith.maximumf %770, %cst_428 : f32
    %cst_429 = arith.constant 9.99999974E-6 : f32
    %772 = arith.addf %771, %cst_429 : f32
    %773 = math.rsqrt %772 : f32
    %774 = vector.broadcast %773 : f32 to vector<32x1xf32>
    %775 = arith.mulf %756, %774 : vector<32x1xf32>
    %776 = vector.broadcast %762 : f32 to vector<32x1xf32>
    %777 = arith.mulf %776, %775 : vector<32x1xf32>
    %778 = arith.subf %757, %777 : vector<32x1xf32>
    %779 = vector.broadcast %775 : vector<32x1xf32> to vector<32x256xf32>
    %780 = arith.mulf %755, %779 : vector<32x256xf32>
    %781 = vector.broadcast %778 : vector<32x1xf32> to vector<32x256xf32>
    %782 = arith.addf %780, %781 : vector<32x256xf32>
    %cst_430 = arith.constant 0.00999999977 : f32
    %783 = vector.broadcast %cst_430 : f32 to vector<32x256xf32>
    %784 = arith.mulf %783, %782 : vector<32x256xf32>
    %785 = arith.maximumf %782, %784 : vector<32x256xf32>
    %c0_431 = arith.constant 0 : index
    %c0_432 = arith.constant 0 : index
    %786 = vector.load %arg8[%c0_431, %c0_432] : memref<8x32xf32, #tpu.memory_space<vmem>>, vector<8x32xf32>
    %cst_433 = arith.constant dense<0.000000e+00> : vector<8x256xf32>
    %787 = tpu.matmul %786, %785, %cst_433 {dimension_numbers = #tpu.dot_dimension_numbers<[1], [0], [0], [1], [0, 0, 1, 1], [], []>} : vector<8x32xf32>, vector<32x256xf32>, vector<8x256xf32> -> vector<8x256xf32>
    %c0_434 = arith.constant 0 : index
    %c0_435 = arith.constant 0 : index
    %788 = vector.load %arg9[%c0_434, %c0_435] : memref<8x1xf32, #tpu.memory_space<vmem>>, vector<8x1xf32>
    %789 = vector.broadcast %788 : vector<8x1xf32> to vector<8x256xf32>
    %790 = arith.addf %787, %789 : vector<8x256xf32>
    %c0_436 = arith.constant 0 : index
    %c9 = arith.constant 9 : index
    %c0_437 = arith.constant 0 : index
    %791 = vector.load %arg2[%c0_436, %c9, %c0_437] : memref<1x10x256xf32, #tpu.memory_space<vmem>>, vector<1x1x256xf32>
    %792 = vector.shape_cast %791 : vector<1x1x256xf32> to vector<1x256xf32>
    %793 = vector.broadcast %792 : vector<1x256xf32> to vector<8x256xf32>
    %794 = arith.mulf %790, %793 : vector<8x256xf32>
    %795 = arith.addf %720, %794 : vector<8x256xf32>
    %c0_438 = arith.constant 0 : index
    %c0_439 = arith.constant 0 : index
    %c0_440 = arith.constant 0 : index
    %796 = vector.load %arg10[%c0_438, %c0_439, %c0_440] : memref<1x8x256xf32, #tpu.memory_space<vmem>>, vector<1x8x256xf32>
    %797 = vector.shape_cast %796 : vector<1x8x256xf32> to vector<8x256xf32>
    %798 = vector.shape_cast %795 : vector<8x256xf32> to vector<1x8x256xf32>
    tpu.vector_store %arg10[%c0_438, %c0_439, %c0_440], %798 {strides = array<i32>} : memref<1x8x256xf32, #tpu.memory_space<vmem>>, vector<1x8x256xf32>,
    return
  }
  func.func @transform_0(%arg0: i32) -> (i32, i32, i32) {
    %c0_i32 = arith.constant 0 : i32
    %c0_i32_0 = arith.constant 0 : i32
    %c0_i32_1 = arith.constant 0 : i32
    return %arg0, %c0_i32, %c0_i32_0 : i32, i32, i32
  }
  func.func @transform_1(%arg0: i32) -> (i32, i32, i32) {
    %c0_i32 = arith.constant 0 : i32
    %c0_i32_0 = arith.constant 0 : i32
    %c0_i32_1 = arith.constant 0 : i32
    return %arg0, %c0_i32, %c0_i32_0 : i32, i32, i32
  }
  func.func @transform_2(%arg0: i32) -> (i32, i32, i32) {
    %c0_i32 = arith.constant 0 : i32
    %c0_i32_0 = arith.constant 0 : i32
    %c0_i32_1 = arith.constant 0 : i32
    return %arg0, %c0_i32, %c0_i32_0 : i32, i32, i32
  }
  func.func @transform_3(%arg0: i32) -> (i32, i32) {
    %c0_i32 = arith.constant 0 : i32
    %c0_i32_0 = arith.constant 0 : i32
    %c0_i32_1 = arith.constant 0 : i32
    return %c0_i32, %c0_i32_0 : i32, i32
  }
  func.func @transform_4(%arg0: i32) -> (i32, i32) {
    %c0_i32 = arith.constant 0 : i32
    %c0_i32_0 = arith.constant 0 : i32
    %c0_i32_1 = arith.constant 0 : i32
    return %c0_i32, %c0_i32_0 : i32, i32
  }
  func.func @transform_5(%arg0: i32) -> (i32, i32) {
    %c0_i32 = arith.constant 0 : i32
    %c0_i32_0 = arith.constant 0 : i32
    %c0_i32_1 = arith.constant 0 : i32
    return %c0_i32, %c0_i32_0 : i32, i32
  }
  func.func @transform_6(%arg0: i32) -> (i32, i32) {
    %c0_i32 = arith.constant 0 : i32
    %c0_i32_0 = arith.constant 0 : i32
    %c0_i32_1 = arith.constant 0 : i32
    return %c0_i32, %c0_i32_0 : i32, i32
  }
  func.func @transform_7(%arg0: i32) -> (i32, i32) {
    %c0_i32 = arith.constant 0 : i32
    %c0_i32_0 = arith.constant 0 : i32
    %c0_i32_1 = arith.constant 0 : i32
    return %c0_i32, %c0_i32_0 : i32, i32
  }
  func.func @transform_8(%arg0: i32) -> (i32, i32) {
    %c0_i32 = arith.constant 0 : i32
    %c0_i32_0 = arith.constant 0 : i32
    %c0_i32_1 = arith.constant 0 : i32
    return %c0_i32, %c0_i32_0 : i32, i32
  }
  func.func @transform_9(%arg0: i32) -> (i32, i32, i32) {
    %c0_i32 = arith.constant 0 : i32
    %c0_i32_0 = arith.constant 0 : i32
    %c0_i32_1 = arith.constant 0 : i32
    return %arg0, %c0_i32, %c0_i32_0 : i32, i32, i32
  }
}

</mosaic_0001>

<bundles_post_ra>
// kernel: tile.8
= control target key start
LH: loop header
LB: loop body
LE: loop exit
PB: predicated region body
PF: predicated region fallthrough
CT: control target
= control target key end

     0   :  { %s28_s0 = inlined_call_operand.vmem [shape: f32[16], index: 0, kind: input, shape index: {}]   ;;  %s29_s1 = inlined_call_operand.vmem [shape: f32[16,16], index: 1, kind: output, shape index: {}]  }
   0x1   :  { %v4_v0 = vld [vmem:[%s28_s0] ss:$0 sm:$0xff] }
   0x2   :  { %5 = vst [vmem:[%s29_s1] sm:$0xff] %v4_v0  ;;  %8 = vst [vmem:[%s29_s1 + $0x8] sm:$0xff] %v4_v0 }

// kernel: diffusion_nca_forward.1
= control target key start
LH: loop header
LB: loop body
LE: loop exit
PB: predicated region body
PF: predicated region fallthrough
CT: control target
= control target key end

     0   :  { %s4970_s30 = smov 0   ;;  %s7499_s0 = inlined_call_operand.vmem [shape: f32[2,8,256], index: 0, kind: input, shape index: {}, may-alias: {0,9}]   ;;  %s7500_s1 = inlined_call_operand.vmem [shape: f32[2,10,256], index: 1, kind: input, shape index: {}]   ;;  %s7501_s2 = inlined_call_operand.vmem [shape: f32[2,32,256], index: 2, kind: input, shape index: {}]   ;;  %s7502_s3 = inlined_call_operand.vmem [shape: f32[32,80], index: 3, kind: input, shape index: {}]   ;;  %s7503_s4 = inlined_call_operand.vmem [shape: f32[32,1], index: 4, kind: input, shape index: {}]   ;;  %s7504_s5 = inlined_call_operand.vmem [shape: f32[32,1], index: 5, kind: input, shape index: {}]   ;;  %s7505_s6 = inlined_call_operand.vmem [shape: f32[32,1], index: 6, kind: input, shape index: {}]   ;;  %s7506_s7 = inlined_call_operand.vmem [shape: f32[8,32], index: 7, kind: input, shape index: {}]   ;;  %s7507_s8 = inlined_call_operand.vmem [shape: f32[8,1], index: 8, kind: input, shape index: {}]   ;;  %s7508_s9 = inlined_call_operand.vmem [shape: f32[2,8,256], index: 9, kind: output, shape index: {}, may-alias: {0,9}]  }
   0x1 LB: > { %s4630_s10 = sadd.s32 4294967295, %s4911_s30   ;;  %p4634_p0 = scmp.ge.s32.totalorder %s4911_s30, 1  ;;  %s4911_s30 = sphi %s4970_s30, %s19_s30  }
   0x2   : > { %p307_p1 = scmp.lt.s32.totalorder %s4911_s30, 3 }
   0x4   : > { %p308_p2 = pnand %p4634_p0, %p307_p1 }
   0x5   : > { %p353_p3 = scmp.lt.s32.totalorder (!%p308_p2), %s4630_s10, 1  ;;  %s4913_s15 = smov (!%p308_p2), 112  }
   0x6   : > { %311 = sbr.rel (%p308_p2) target bundleno = 11040 (0x2b20), region = 56  ;;  %s4914_s16 = smov (!%p308_p2), 16  }
   0x7   : > { %s4915_s17 = smov (!%p308_p2), 1   ;;  %s4916_s18 = smov (!%p308_p2), 127  }
   0x8   : > { %s4919_s23 = smov (!%p308_p2), 0.0  }
   0xb   : > { %s7524_s10 = smov (!%p353_p3, %s4630_s10), 1  ;;  %v373_v2 = vlaneseq  ;;  %v4917_v19 = vmov 0.0   ;;  %v5126_v62 = vld [vmem:[%s7502_s3] sm:$0xff]  ;;  %vm530_vm10 = vcmask 654336   ;;  %v5136_v63 = vld [vmem:[%s7502_s3 + $0x8] sm:$0xff]  ;;  %vm782_vm11 = vcmask 261120  }
   0xc   : > { %s7509_s11 = sshll.u32 %s7524_s10, 4  ;;  %607 = vmatprep.mubr.f32.mxu0 %v4917_v19  ;;  %850 = vmatprep.mubr.f32.mxu1 %v4917_v19  ;;  %s4706_s27 = sshll.u32 %s7524_s10, 6  ;;  %v4901_v8 = vld [vmem:[%s7503_s4] sm:$0xff]  ;;  %v4902_v17 = vld [vmem:[%s7503_s4 + $0x8] sm:$0xff] }
   0xd   : > { %s357_s14 = scalar_lea.vmem %s7499_s0, %s7509_s11  ;;  %v5003_v3 = vand.u32 127, %v373_v2  ;;  %s5161_s12 = scalar_lea.vmem %s7501_s2, %s4706_s27 }
   0xe   : > { %v4986_v0 = vld [vmem:[%s357_s14] sm:$0xff]  ;;  %v4992_v1 = vld [vmem:[%s357_s14 + $0x8] sm:$0xff] }
   0xf   : > { %457 = vrot.lane.b32.xlu1 %v4986_v0, %s4913_s15  ;;  %450 = vrot.lane.b32.xlu0 %v4986_v0, %s4914_s16  ;;  %v375_v4 = vadd.s32 128, %v5003_v3  ;;  %vm461_vm0 = vcmp.lt.s32.totalorder %v5003_v3, 112  ;;  %vm454_vm1 = vcmp.lt.s32.totalorder %v5003_v3, 16  ;;  %v380_v15 = vand.u32 255, %v5003_v3 }
  0x10   : > { %v404_v22 = vand.u32 15, %v5003_v3  ;;  %vm479_vm4 = vcmp.lt.s32.totalorder %v5003_v3, 127  ;;  %vm472_vm7 = vcmp.lt.s32.totalorder %v5003_v3, 1 }
  0x11   : > { %v387_v5 = vand.u32 255, %v375_v4  ;;  %vm5032_vm3 = vcmp.lt.s32.totalorder %v380_v15, 16  ;;  %v411_v23 = vand.u32 15, %v375_v4  ;;  %v5144_v4 = vld [vmem:[%s7502_s3 + $0x10] sm:$0xff]  ;;  %v5179_v15 = vld [vmem:[%s5161_s12 + $0x18] sm:$0xff] }
  0x12   : > { %vm5054_vm5 = vcmp.eq.s32.totalorder %v404_v22, 15  ;;  %vm5079_vm9 = vcmp.eq.s32.totalorder %v404_v22, 0 }
  0x13   : > { %459 = vrot.lane.b32.xlu1 %v4992_v1, %s4913_s15  ;;  %452 = vrot.lane.b32.xlu0 %v4992_v1, %s4914_s16  ;;  %vm5008_vm2 = vcmp.ge.s32.totalorder %v387_v5, 240  ;;  %vm5058_vm6 = vcmp.eq.s32.totalorder %v411_v23, 15  ;;  %vm5075_vm8 = vcmp.eq.s32.totalorder %v411_v23, 0  ;;  %v5152_v5 = vld [vmem:[%s7502_s3 + $0x18] sm:$0xff]  ;;  %v5191_v23 = vld [vmem:[%s5161_s12 + $0x20] sm:$0xff] }
  0x17   : > { %486 = vrot.lane.b32.xlu0 %v4986_v0, %s4915_s17  ;;  %488 = vrot.lane.b32.xlu1 %v4992_v1, %s4915_s17 }
  0x81   : > { %v458_v6 = vpop.permute.xlu1 %457  ;;  %v451_v7 = vpop.permute.xlu0 %450 }
  0x85   : > { %v460_v9 = vpop.permute.xlu1 %459  ;;  %v453_v10 = vpop.permute.xlu0 %452 }
  0x86   : > { %v463_v11 = vsel %vm461_vm0, %v460_v9, %v458_v6  ;;  %v5016_v12 = vsel %vm454_vm1, %v451_v7, %v453_v10  ;;  %v462_v13 = vsel %vm461_vm0, %v458_v6, %v460_v9  ;;  %v456_v16 = vsel %vm454_vm1, %v453_v10, %v451_v7  ;;  %v5164_v6 = vld [vmem:[%s5161_s12] sm:$0xff]  ;;  %v5167_v9 = vld [vmem:[%s5161_s12 + $0x8] sm:$0xff] }
  0x87   : > { %502 = vrot.lane.b32.xlu0 %v462_v13, %s4915_s17  ;;  %v467_v14 = vsel %vm5008_vm2, %v5016_v12, %v463_v11  ;;  %v5040_v18 = vsel %vm5032_vm3, %v462_v13, %v456_v16 }
  0x88   : > { %504 = vrot.lane.b32.xlu1 %v467_v14, %s4915_s17 }
  0x89   : > { %v487_v20 = vpop.permute.xlu0 %486  ;;  %v489_v21 = vpop.permute.xlu1 %488 }
  0x8a   : > { %v490_v43 = vsel %vm472_vm7, %v487_v20, %v489_v21  ;;  %v491_v46 = vsel %vm472_vm7, %v489_v21, %v487_v20 }
  0x8b   : > { %508 = vrot.lane.b32.xlu0 %v462_v13, %s4916_s18 }
  0x8c   : > { %510 = vrot.lane.b32.xlu1 %v467_v14, %s4916_s18 }
  0x8f   : > { %492 = vrot.lane.b32.xlu0 %v4986_v0, %s4916_s18 }
  0x90   : > { %494 = vrot.lane.b32.xlu1 %v4992_v1, %s4916_s18 }
  0x93   : > { %468 = vrot.lane.b32.xlu0 %v5040_v18, %s4915_s17 }
  0x94   : > { %470 = vrot.lane.b32.xlu1 %v5016_v12, %s4915_s17 }
  0x97   : > { %475 = vrot.lane.b32.xlu0 %v5040_v18, %s4916_s18 }
  0x98   : > { %477 = vrot.lane.b32.xlu1 %v5016_v12, %s4916_s18 }
  0xf9   : > { %v503_v24 = vpop.permute.xlu0 %502 }
  0xfa   : > { %v505_v25 = vpop.permute.xlu1 %504 }
  0xfb   : > { %v506_v30 = vsel %vm472_vm7, %v503_v24, %v505_v25  ;;  %v507_v32 = vsel %vm472_vm7, %v505_v25, %v503_v24 }
  0xfd   : > { %v509_v28 = vpop.permute.xlu0 %508 }
  0xfe   : > { %v511_v29 = vpop.permute.xlu1 %510 }
  0xff   : > { %v513_v31 = vsel %vm479_vm4, %v511_v29, %v509_v28  ;;  %v512_v33 = vsel %vm479_vm4, %v509_v28, %v511_v29 }
 0x100   : > { %v517_v34 = vsel %vm5058_vm6, %v506_v30, %v513_v31  ;;  %v516_v35 = vsel %vm5054_vm5, %v507_v32, %v512_v33  ;;  %v515_v42 = vsel %vm5075_vm8, %v513_v31, %v506_v30  ;;  %v514_v45 = vsel %vm5079_vm9, %v512_v33, %v507_v32  ;;  %v5200_v31 = vld [vmem:[%s5161_s12 + $0x28] sm:$0xff] }
 0x101   : > { %555 = vmatprep.subr.mxu0 %v517_v34  ;;  %v493_v37 = vpop.permute.xlu0 %492 }
 0x102   : > { %v495_v39 = vpop.permute.xlu1 %494  ;;  %556 = vmatpush1.msra.mxu0 %v516_v35 }
 0x103   : > { %v497_v40 = vsel %vm479_vm4, %v495_v39, %v493_v37  ;;  %557 = vmatprep.subr.mxu0 %v467_v14  ;;  %v496_v41 = vsel %vm479_vm4, %v493_v37, %v495_v39  ;;  %v5209_v39 = vld [vmem:[%s5161_s12 + $0x30] sm:$0xff] }
 0x104   : > { %558 = vmatpush1.msra.mxu0 %v462_v13  ;;  %v501_v48 = vsel %vm5058_vm6, %v490_v43, %v497_v40  ;;  %v500_v49 = vsel %vm5054_vm5, %v491_v46, %v496_v41  ;;  %v499_v52 = vsel %vm5075_vm8, %v497_v40, %v490_v43  ;;  %v498_v53 = vsel %vm5079_vm9, %v496_v41, %v491_v46 }
 0x105   : > { %559 = vmatprep.subr.mxu0 %v515_v42  ;;  %v469_v44 = vpop.permute.xlu0 %468 }
 0x106   : > { %v471_v47 = vpop.permute.xlu1 %470  ;;  %560 = vmatpush1.msra.mxu0 %v514_v45  ;;  %v5218_v45 = vld [vmem:[%s5161_s12 + $0x38] sm:$0xff] }
 0x107   : > { %561 = vmatprep.subr.mxu0 %v501_v48  ;;  %v473_v54 = vsel %vm472_vm7, %v469_v44, %v471_v47  ;;  %v474_v55 = vsel %vm472_vm7, %v471_v47, %v469_v44 }
 0x108   : > { %562 = vmatpush1.msra.mxu0 %v500_v49 }
 0x109   : > { %563 = vmatprep.subr.mxu0 %v4992_v1  ;;  %v476_v50 = vpop.permute.xlu0 %475 }
 0x10a   : > { %v478_v51 = vpop.permute.xlu1 %477  ;;  %564 = vmatpush1.msra.mxu0 %v4986_v0 }
 0x10b   : > { %v480_v56 = vsel %vm479_vm4, %v476_v50, %v478_v51  ;;  %v481_v57 = vsel %vm479_vm4, %v478_v51, %v476_v50  ;;  %565 = vmatprep.subr.mxu0 %v499_v52 }
 0x10c   : > { %566 = vmatpush1.msra.mxu0 %v498_v53  ;;  %v485_v58 = vsel %vm5058_vm6, %v473_v54, %v481_v57  ;;  %v484_v59 = vsel %vm5054_vm5, %v474_v55, %v480_v56  ;;  %v483_v60 = vsel %vm5075_vm8, %v481_v57, %v473_v54  ;;  %v482_v61 = vsel %vm5079_vm9, %v480_v56, %v474_v55 }
 0x10d   : > { %567 = vmatprep.subr.mxu0 %v485_v58 }
 0x10e   : > { %568 = vmatpush1.msra.mxu0 %v484_v59 }
 0x10f   : > { %569 = vmatprep.subr.mxu0 %v5016_v12  ;;  %v5173_v12 = vld [vmem:[%s5161_s12 + $0x10] sm:$0xff] }
 0x110   : > { %570 = vmatpush1.msra.mxu0 %v5040_v18 }
 0x111   : > { %571 = vmatprep.subr.mxu0 %v483_v60 }
 0x112   : > { %572 = vmatpush1.msra.mxu0 %v482_v61 }
 0x113   : > { %573 = vmatprep.subr.mxu0 %v4992_v1 }
 0x114   : > { %574 = vmatpush1.msra.mxu0 %v4986_v0 }
 0x115   : > { %4643 = vmatmul.mubr.msk.f32.vlgmr.msra.gmra.mxu0 %vm530_vm10, %v5126_v62 }
 0x116   : > { %613 = vmatprep.mubr.f32.mxu0 %v4917_v19 }
 0x119   : > { %4644 = vmatmul.mubr.msk.f32.gmra.mxu0 %vm530_vm10, %v5136_v63 }
 0x11a   : > { %619 = vmatprep.mubr.f32.mxu0 %v4917_v19 }
 0x11d   : > { %4645 = vmatmul.mubr.msk.f32.gmra.mxu0 %vm530_vm10, %v5144_v4 }
 0x11e   : > { %625 = vmatprep.mubr.f32.mxu0 %v4917_v19 }
 0x121   : > { %4646 = vmatmul.mubr.msk.f32.gmra.mxu0 %vm530_vm10, %v5152_v5 }
 0x122   : > { %1261 = vmatprep.mubr.f32.mxu0 %v4917_v19 }
 0x1d5   : > { %v609_v7 = vpop.f32.mrf.mxu0 }
 0x1d6   : > { %v5170_v10 = vadd.f32 %v609_v7, %v5164_v6 }
 0x1d7   : > { %v611_v11 = vpop.f32.mrf.mxu0 }
 0x1d8   : > { %v5176_v13 = vadd.f32 %v611_v11, %v5167_v9  ;;  %v657_v16 = vmul.f32 %v5170_v10, %v5170_v10 }
 0x1d9   : > { %v615_v14 = vpop.f32.mrf.mxu0 }
 0x1da   : > { %v640_v18 = vadd.f32 %v5176_v13, %v5170_v10  ;;  %v658_v20 = vmul.f32 %v5176_v13, %v5176_v13  ;;  %v5188_v21 = vadd.f32 %v615_v14, %v5173_v12 }
 0x1db   : > { %v617_v22 = vpop.f32.mrf.mxu0 }
 0x1dc   : > { %v665_v24 = vadd.f32 %v658_v20, %v657_v16  ;;  %v641_v25 = vadd.f32 %v640_v18, %v5188_v21  ;;  %v659_v28 = vmul.f32 %v5188_v21, %v5188_v21  ;;  %v5197_v29 = vadd.f32 %v617_v22, %v5179_v15 }
 0x1dd   : > { %v621_v30 = vpop.f32.mrf.mxu0 }
 0x1de   : > { %v666_v32 = vadd.f32 %v665_v24, %v659_v28  ;;  %v642_v33 = vadd.f32 %v641_v25, %v5197_v29  ;;  %v660_v34 = vmul.f32 %v5197_v29, %v5197_v29  ;;  %v5206_v35 = vadd.f32 %v621_v30, %v5191_v23 }
 0x1df   : > { %v623_v37 = vpop.f32.mrf.mxu0  ;;  %v4918_v30 = vmov 0  }
 0x1e0   : > { %v667_v40 = vadd.f32 %v666_v32, %v660_v34  ;;  %v643_v41 = vadd.f32 %v642_v33, %v5206_v35  ;;  %v661_v42 = vmul.f32 %v5206_v35, %v5206_v35  ;;  %v5215_v43 = vadd.f32 %v623_v37, %v5200_v31  ;;  %4784 = vset.pattern.permute.xlu1 %v4918_v30  ;;  %v5239_v37 = vld [vmem:[%s7504_s5 + $0x18] sm:$0xff] }
 0x1e1   : > { %v627_v44 = vpop.f32.mrf.mxu0  ;;  %4783 = vset.pattern.permute.xlu0 %v4918_v30 }
 0x1e2   : > { %v668_v46 = vadd.f32 %v667_v40, %v661_v42  ;;  %v644_v47 = vadd.f32 %v643_v41, %v5215_v43  ;;  %v662_v48 = vmul.f32 %v5215_v43, %v5215_v43  ;;  %v5224_v49 = vadd.f32 %v627_v44, %v5209_v39  ;;  %v5244_v40 = vld [vmem:[%s7504_s5 + $0x10] sm:$0xff] }
 0x1e3   : > { %v629_v50 = vpop.f32.mrf.mxu0 }
 0x1e4   : > { %v663_v51 = vmul.f32 %v5224_v49, %v5224_v49  ;;  %v5229_v52 = vadd.f32 %v629_v50, %v5218_v45  ;;  %v645_v53 = vadd.f32 %v644_v47, %v5224_v49  ;;  %v669_v54 = vadd.f32 %v668_v46, %v662_v48  ;;  %v5251_v46 = vld [vmem:[%s7504_s5 + $0x8] sm:$0xff]  ;;  %v776_v47 = vld [vmem:[%s7507_s8] sm:$0xff] }
 0x1e5   : > { %v5260_v50 = vld [vmem:[%s7504_s5] sm:$0xff] }
 0x1e6   : > { %v646_v55 = vadd.f32 %v645_v53, %v5229_v52  ;;  %v664_v56 = vmul.f32 %v5229_v52, %v5229_v52  ;;  %v670_v57 = vadd.f32 %v669_v54, %v663_v51 }
 0x1e8   : > { %647 = vadd.xlane.f32.xlu0 %v646_v55  ;;  %v671_v58 = vadd.f32 %v670_v57, %v664_v56  ;;  %v5266_v55 = vld [vmem:[%s7505_s6 + $0x18] sm:$0xff] }
 0x1ea   : > { %672 = vadd.xlane.f32.xlu1 %v671_v58  ;;  %v5272_v58 = vld [vmem:[%s7505_s6 + $0x10] sm:$0xff] }
 0x271   : > { %v648_v59 = vpop.xlane.xlu0 %647 }
 0x272   : > { %v649_v60 = vrot.slane %v648_v59, 4 }
 0x273   : > { %v673_v61 = vpop.xlane.xlu1 %672 }
 0x274   : > { %v650_v7 = vadd.f32 %v649_v60, %v648_v59  ;;  %v674_v11 = vrot.slane %v673_v61, 4 }
 0x276   : > { %v675_v14 = vadd.f32 %v674_v11, %v673_v61  ;;  %v651_v16 = vrot.slane %v650_v7, 2  ;;  %v5278_v61 = vld [vmem:[%s7505_s6 + $0x8] sm:$0xff] }
 0x278   : > { %v652_v18 = vadd.f32 %v651_v16, %v650_v7  ;;  %v676_v20 = vrot.slane %v675_v14, 2 }
 0x27a   : > { %v653_v22 = vrot.slane %v652_v18, 1  ;;  %v677_v24 = vadd.f32 %v676_v20, %v675_v14  ;;  %v5284_v14 = vld [vmem:[%s7505_s6] sm:$0xff] }
 0x27c   : > { %v654_v25 = vadd.f32 %v653_v22, %v652_v18  ;;  %v678_v28 = vrot.slane %v677_v24, 1 }
 0x27e   : > { %4708 = vpush %v654_v25  ;;  %v679_v32 = vadd.f32 %v678_v28, %v677_v24 }
 0x280   : > { %4710 = vpush %v679_v32 }
 0x2af   : > { %s4709_s13 = spop %4708 }
 0x2b0   : > { %s656_s14 = smul.f32 0.00012207031, %s4709_s13 }
 0x2b1   : > { %s4711_s19 = spop %4710 }
 0x2b2   : > { %s682_s20 = smul.f32 %s656_s14, %s656_s14  ;;  %v694_v51 = vstv %s656_s14 }
 0x2b3   : > { %s681_s21 = smul.f32 0.00012207031, %s4711_s19 }
 0x2b5   : > { %s683_s22 = ssub.f32 %s681_s21, %s682_s20 }
 0x2b7   : > { %s684_s24 = smax.f32 %s4919_s23, %s683_s22 }
 0x2b8   : > { %s685_s25 = sadd.f32 1e-05, %s684_s24  ;;  %s4705_s24 = sshll.u32 %s7524_s10, 5 }
 0x2b9   : > { %s5308_s27 = scalar_lea.vmem %s7500_s1, %s4705_s24 }
 0x2ba   : > { %v686_v33 = vstv %s685_s25 }
 0x2bb   : > { %4785 = vrsqrt.f32 %v686_v33 }
 0x2c8   : > { %v4786_v34 = vpop.eup %4785 }
 0x2c9   : > { %4712 = vpush %v4786_v34 }
 0x2fa   : > { %s4713_s13 = spop %4712 }
 0x2fb   : > { %v689_v41 = vstv %s4713_s13 }
 0x2fc   : > { %v693_v42 = vmul.f32 %v689_v41, %v5239_v37  ;;  %v692_v44 = vmul.f32 %v689_v41, %v5244_v40  ;;  %v691_v48 = vmul.f32 %v689_v41, %v5251_v46  ;;  %v690_v53 = vmul.f32 %v689_v41, %v5260_v50 }
 0x2fe   : > { %720 = vperm.xlu0 %4783, %v693_v42   ;;  %715 = vperm.xlu1 %4784, %v692_v44   ;;  %v698_v54 = vmul.f32 %v694_v51, %v693_v42  ;;  %v697_v57 = vmul.f32 %v694_v51, %v692_v44  ;;  %v696_v60 = vmul.f32 %v694_v51, %v691_v48 }
 0x2ff   : > { %v695_v11 = vmul.f32 %v694_v51, %v690_v53 }
 0x300   : > { %v702_v56 = vsub.f32 %v5266_v55, %v698_v54  ;;  %v701_v59 = vsub.f32 %v5272_v58, %v697_v57  ;;  %v700_v7 = vsub.f32 %v5278_v61, %v696_v60 }
 0x301   : > { %v699_v16 = vsub.f32 %v5284_v14, %v695_v11 }
 0x302   : > { %710 = vperm.xlu1 %4784, %v691_v48   ;;  %779 = vperm.xlu0 %4783, %v776_v47  }
 0x306   : > { %705 = vperm.xlu1 %4784, %v690_v53  }
 0x30a   : > { %748 = vperm.xlu1 %4784, %v702_v56  }
 0x30e   : > { %743 = vperm.xlu1 %4784, %v701_v59  }
 0x312   : > { %738 = vperm.xlu1 %4784, %v700_v7  }
 0x316   : > { %733 = vperm.xlu1 %4784, %v699_v16  }
 0x379   : > { %v716_v18 = vpop.permute.xlu1 %715  ;;  %v721_v22 = vpop.permute.xlu0 %720 }
 0x37a   : > { %v729_v25 = vmul.f32 %v721_v22, %v5224_v49  ;;  %v730_v28 = vmul.f32 %v721_v22, %v5229_v52  ;;  %v727_v34 = vmul.f32 %v716_v18, %v5206_v35  ;;  %v728_v41 = vmul.f32 %v716_v18, %v5215_v43 }
 0x37d   : > { %v711_v20 = vpop.permute.xlu1 %710 }
 0x37e   : > { %v725_v56 = vmul.f32 %v711_v20, %v5188_v21  ;;  %v726_v49 = vmul.f32 %v711_v20, %v5197_v29 }
 0x381   : > { %v706_v24 = vpop.permute.xlu1 %705 }
 0x382   : > { %v723_v11 = vmul.f32 %v706_v24, %v5170_v10  ;;  %v724_v16 = vmul.f32 %v706_v24, %v5176_v13  ;;  %v5298_v10 = vld [vmem:[%s7506_s7] sm:$0xff]  ;;  %v860_v13 = vshrl.u32 %v373_v2, 7 }
 0x384   : > { %v5310_v24 = vsub.s32 0, %v860_v13 }
 0x385   : > { %v749_v30 = vpop.permute.xlu1 %748 }
 0x386   : > { %v758_v32 = vadd.f32 %v749_v30, %v730_v28  ;;  %v757_v33 = vadd.f32 %v749_v30, %v729_v25 }
 0x388   : > { %v766_v42 = vmul.f32 0.01, %v758_v32  ;;  %v765_v44 = vmul.f32 0.01, %v757_v33 }
 0x389   : > { %v744_v47 = vpop.permute.xlu1 %743 }
 0x38a   : > { %v755_v48 = vadd.f32 %v744_v47, %v727_v34  ;;  %v756_v51 = vadd.f32 %v744_v47, %v728_v41  ;;  %v774_v53 = vmax.f32 %v758_v32, %v766_v42  ;;  %v773_v54 = vmax.f32 %v757_v33, %v765_v44  ;;  %v857_v41 = vld [vmem:[%s5308_s27] ss:$8 sm:$0x3]  ;;  %v5316_v47 = vpop.permute.xlu0 %779 }
 0x38b   : > { %v5313_v42 = vsub.s32 1, %v860_v13  ;;  %v862_v44 = vrot.slane %v857_v41, %v5310_v24 }
 0x38c   : > { %v763_v57 = vmul.f32 0.01, %v755_v48  ;;  %v764_v52 = vmul.f32 0.01, %v756_v51  ;;  %810 = vmatprep.subr.mxu1 %v774_v53 }
 0x38d   : > { %811 = vmatpush1.msra.mxu1 %v773_v54  ;;  %v739_v59 = vpop.permute.xlu1 %738  ;;  %v866_v2 = vrot.slane %v857_v41, %v5313_v42 }
 0x38e   : > { %v753_v60 = vadd.f32 %v739_v59, %v725_v56  ;;  %v754_v35 = vadd.f32 %v739_v59, %v726_v49  ;;  %v772_v7 = vmax.f32 %v756_v51, %v764_v52  ;;  %v771_v43 = vmax.f32 %v755_v48, %v763_v57 }
 0x390   : > { %v761_v18 = vmul.f32 0.01, %v753_v60  ;;  %v762_v22 = vmul.f32 0.01, %v754_v35  ;;  %812 = vmatprep.subr.mxu1 %v772_v7 }
 0x391   : > { %813 = vmatpush1.msra.mxu1 %v771_v43  ;;  %v734_v21 = vpop.permute.xlu1 %733 }
 0x392   : > { %v751_v25 = vadd.f32 %v734_v21, %v723_v11  ;;  %v752_v29 = vadd.f32 %v734_v21, %v724_v16  ;;  %v770_v20 = vmax.f32 %v754_v35, %v762_v22  ;;  %v769_v28 = vmax.f32 %v753_v60, %v761_v18  ;;  %v5371_v22 = vld [vmem:[%s7503_s4] sm:$0xff]  ;;  %v5376_v21 = vld [vmem:[%s7503_s4 + $0x8] sm:$0xff] }
 0x394   : > { %v759_v30 = vmul.f32 0.01, %v751_v25  ;;  %v760_v32 = vmul.f32 0.01, %v752_v29  ;;  %814 = vmatprep.subr.mxu1 %v770_v20  ;;  %v5387_v20 = vld [vmem:[%s7503_s4 + $0x10] sm:$0xff] }
 0x395   : > { %815 = vmatpush1.msra.mxu1 %v769_v28  ;;  %v5392_v28 = vld [vmem:[%s7503_s4 + $0x18] sm:$0xff] }
 0x396   : > { %v768_v33 = vmax.f32 %v752_v29, %v760_v32  ;;  %v767_v34 = vmax.f32 %v751_v25, %v759_v30  ;;  %v1030_v25 = vmul.f32 0.1, %v5371_v22  ;;  %v1031_v29 = vmul.f32 0.1, %v5376_v21 }
 0x397   : > { %v1032_v30 = vmul.f32 0.1, %v5387_v20  ;;  %v1033_v32 = vmul.f32 0.1, %v5392_v28 }
 0x398   : > { %816 = vmatprep.subr.mxu1 %v768_v33 }
 0x399   : > { %817 = vmatpush1.msra.mxu1 %v767_v34 }
 0x39a   : > { %4647 = vmatmul.mubr.msk.f32.vlgmr.msra.gmra.mxu1 %vm782_vm11, %v5298_v10 }
 0x39b   : > { %1001 = vmatprep.mubr.f32.mxu1 %v4917_v19 }
 0x45a   : > { %v852_v48 = vpop.f32.mrf.mxu1 }
 0x45b   : > { %v853_v51 = vadd.f32 %v852_v48, %v5316_v47 }
 0x45c   : > { %v854_v53 = vpop.f32.mrf.mxu1 }
 0x45d   : > { %v869_v54 = vmul.f32 %v862_v44, %v853_v51  ;;  %v855_v56 = vadd.f32 %v854_v53, %v5316_v47 }
 0x45f   : > { %v5322_v49 = vadd.f32 %v869_v54, %v4986_v0  ;;  %v870_v57 = vmul.f32 %v866_v2, %v855_v56 }
 0x461   : > { %v5325_v52 = vadd.f32 %v870_v57, %v4992_v1  ;;  %873 = vrot.lane.b32.xlu1 %v5322_v49, %s4914_s16 }
 0x463   : > { %875 = vrot.lane.b32.xlu0 %v5325_v52, %s4914_s16 }
 0x465   : > { %879 = vrot.lane.b32.xlu1 %v5322_v49, %s4913_s15 }
 0x467   : > { %881 = vrot.lane.b32.xlu0 %v5325_v52, %s4913_s15 }
 0x469   : > { %905 = vrot.lane.b32.xlu1 %v5322_v49, %s4915_s17 }
 0x46b   : > { %907 = vrot.lane.b32.xlu0 %v5325_v52, %s4915_s17 }
 0x4d3   : > { %v874_v0 = vpop.permute.xlu1 %873 }
 0x4d5   : > { %v876_v1 = vpop.permute.xlu0 %875 }
 0x4d6   : > { %v5341_v35 = vsel %vm454_vm1, %v874_v0, %v876_v1  ;;  %v878_v16 = vsel %vm454_vm1, %v876_v1, %v874_v0 }
 0x4d7   : > { %v880_v59 = vpop.permute.xlu1 %879 }
 0x4d9   : > { %v882_v60 = vpop.permute.xlu0 %881 }
 0x4da   : > { %v884_v7 = vsel %vm461_vm0, %v882_v60, %v880_v59  ;;  %v883_v43 = vsel %vm461_vm0, %v880_v59, %v882_v60 }
 0x4db   : > { %921 = vrot.lane.b32.xlu1 %v883_v43, %s4915_s17  ;;  %v888_v11 = vsel %vm5008_vm2, %v5341_v35, %v884_v7  ;;  %v5362_v18 = vsel %vm5032_vm3, %v883_v43, %v878_v16  ;;  %v906_v33 = vpop.permute.xlu1 %905 }
 0x4dc   : > { %923 = vrot.lane.b32.xlu0 %v888_v11, %s4915_s17 }
 0x4dd   : > { %v908_v34 = vpop.permute.xlu0 %907 }
 0x4de   : > { %v909_v16 = vsel %vm472_vm7, %v906_v33, %v908_v34 }
 0x4df   : > { %927 = vrot.lane.b32.xlu1 %v883_v43, %s4916_s18 }
 0x4e0   : > { %929 = vrot.lane.b32.xlu0 %v888_v11, %s4916_s18 }
 0x4e3   : > { %911 = vrot.lane.b32.xlu1 %v5322_v49, %s4916_s18 }
 0x4e4   : > { %913 = vrot.lane.b32.xlu0 %v5325_v52, %s4916_s18 }
 0x4e7   : > { %889 = vrot.lane.b32.xlu1 %v5362_v18, %s4915_s17 }
 0x4e8   : > { %891 = vrot.lane.b32.xlu0 %v5341_v35, %s4915_s17 }
 0x4eb   : > { %895 = vrot.lane.b32.xlu1 %v5362_v18, %s4916_s18 }
 0x4ec   : > { %897 = vrot.lane.b32.xlu0 %v5341_v35, %s4916_s18 }
 0x4ef   : > { %1036 = vperm.xlu1 %4784, %v1030_v25  }
 0x4f0   : > { %1041 = vperm.xlu0 %4783, %v1031_v29  }
 0x4f3   : > { %1046 = vperm.xlu1 %4784, %v1032_v30   ;;  %v910_v30 = vsel %vm472_vm7, %v908_v34, %v906_v33 }
 0x4f4   : > { %1051 = vperm.xlu0 %4783, %v1033_v32  }
 0x54d   : > { %v922_v13 = vpop.permute.xlu1 %921 }
 0x54e   : > { %v924_v41 = vpop.permute.xlu0 %923 }
 0x54f   : > { %v925_v51 = vsel %vm472_vm7, %v922_v13, %v924_v41  ;;  %v926_v2 = vsel %vm472_vm7, %v924_v41, %v922_v13 }
 0x551   : > { %v928_v44 = vpop.permute.xlu1 %927 }
 0x552   : > { %v930_v48 = vpop.permute.xlu0 %929 }
 0x553   : > { %v931_v53 = vsel %vm479_vm4, %v928_v44, %v930_v48  ;;  %v932_v54 = vsel %vm479_vm4, %v930_v48, %v928_v44 }
 0x554   : > { %v936_v56 = vsel %vm5058_vm6, %v925_v51, %v932_v54  ;;  %v935_v57 = vsel %vm5054_vm5, %v926_v2, %v931_v53  ;;  %v934_v7 = vsel %vm5075_vm8, %v932_v54, %v925_v51  ;;  %v933_v29 = vsel %vm5079_vm9, %v931_v53, %v926_v2 }
 0x555   : > { %949 = vmatprep.subr.mxu1 %v936_v56  ;;  %v912_v0 = vpop.permute.xlu1 %911 }
 0x556   : > { %v914_v1 = vpop.permute.xlu0 %913  ;;  %950 = vmatpush1.msra.mxu1 %v935_v57 }
 0x557   : > { %v916_v59 = vsel %vm479_vm4, %v914_v1, %v912_v0  ;;  %951 = vmatprep.subr.mxu1 %v888_v11  ;;  %v915_v60 = vsel %vm479_vm4, %v912_v0, %v914_v1 }
 0x558   : > { %952 = vmatpush1.msra.mxu1 %v883_v43  ;;  %v920_v11 = vsel %vm5058_vm6, %v909_v16, %v916_v59  ;;  %v919_v43 = vsel %vm5054_vm5, %v910_v30, %v915_v60  ;;  %v918_v44 = vsel %vm5075_vm8, %v916_v59, %v909_v16  ;;  %v917_v33 = vsel %vm5079_vm9, %v915_v60, %v910_v30 }
 0x559   : > { %953 = vmatprep.subr.mxu1 %v934_v7  ;;  %v890_v25 = vpop.permute.xlu1 %889 }
 0x55a   : > { %v892_v32 = vpop.permute.xlu0 %891  ;;  %954 = vmatpush1.msra.mxu1 %v933_v29 }
 0x55b   : > { %955 = vmatprep.subr.mxu1 %v920_v11  ;;  %v893_v34 = vsel %vm472_vm7, %v890_v25, %v892_v32  ;;  %v894_v48 = vsel %vm472_vm7, %v892_v32, %v890_v25 }
 0x55c   : > { %956 = vmatpush1.msra.mxu1 %v919_v43 }
 0x55d   : > { %957 = vmatprep.subr.mxu1 %v5325_v52  ;;  %v896_v13 = vpop.permute.xlu1 %895 }
 0x55e   : > { %v898_v41 = vpop.permute.xlu0 %897  ;;  %958 = vmatpush1.msra.mxu1 %v5322_v49 }
 0x55f   : > { %v899_v51 = vsel %vm479_vm4, %v896_v13, %v898_v41  ;;  %v900_v2 = vsel %vm479_vm4, %v898_v41, %v896_v13  ;;  %959 = vmatprep.subr.mxu1 %v918_v44 }
 0x560   : > { %960 = vmatpush1.msra.mxu1 %v917_v33  ;;  %v904_v53 = vsel %vm5058_vm6, %v893_v34, %v900_v2  ;;  %v903_v54 = vsel %vm5054_vm5, %v894_v48, %v899_v51  ;;  %v902_v56 = vsel %vm5075_vm8, %v900_v2, %v893_v34  ;;  %v901_v57 = vsel %vm5079_vm9, %v899_v51, %v894_v48 }
 0x561   : > { %961 = vmatprep.subr.mxu1 %v904_v53 }
 0x562   : > { %962 = vmatpush1.msra.mxu1 %v903_v54 }
 0x563   : > { %963 = vmatprep.subr.mxu1 %v5341_v35 }
 0x564   : > { %964 = vmatpush1.msra.mxu1 %v5362_v18 }
 0x565   : > { %965 = vmatprep.subr.mxu1 %v902_v56 }
 0x566   : > { %966 = vmatpush1.msra.mxu1 %v901_v57 }
 0x567   : > { %967 = vmatprep.subr.mxu1 %v5325_v52 }
 0x568   : > { %968 = vmatpush1.msra.mxu1 %v5322_v49 }
 0x569   : > { %4648 = vmatmul.mubr.msk.f32.vlgmr.msra.gmra.mxu1 %vm530_vm10, %v5126_v62 }
 0x56a   : > { %1007 = vmatprep.mubr.f32.mxu1 %v4917_v19  ;;  %v1037_v18 = vpop.permute.xlu1 %1036 }
 0x56b   : > { %v1042_v7 = vpop.permute.xlu0 %1041 }
 0x56d   : > { %4649 = vmatmul.mubr.msk.f32.gmra.mxu1 %vm530_vm10, %v5136_v63 }
 0x56e   : > { %1013 = vmatprep.mubr.f32.mxu1 %v4917_v19  ;;  %v1047_v44 = vpop.permute.xlu1 %1046 }
 0x56f   : > { %v1052_v57 = vpop.permute.xlu0 %1051 }
 0x571   : > { %4650 = vmatmul.mubr.msk.f32.gmra.mxu1 %vm530_vm10, %v5144_v4 }
 0x572   : > { %1019 = vmatprep.mubr.f32.mxu1 %v4917_v19 }
 0x575   : > { %4651 = vmatmul.mubr.msk.f32.gmra.mxu1 %vm530_vm10, %v5152_v5 }
 0x576   : > { %1413 = vmatprep.mubr.f32.mxu1 %v4917_v19 }
 0x629   : > { %v1003_v35 = vpop.f32.mrf.mxu1 }
 0x62a   : > { %v1004_v62 = vadd.f32 %v1003_v35, %v5164_v6 }
 0x62b   : > { %v1005_v0 = vpop.f32.mrf.mxu1 }
 0x62c   : > { %v5463_v1 = vadd.f32 %v1037_v18, %v1004_v62  ;;  %v1006_v63 = vadd.f32 %v1005_v0, %v5167_v9 }
 0x62d   : > { %v1009_v59 = vpop.f32.mrf.mxu1 }
 0x62e   : > { %v5466_v60 = vadd.f32 %v1037_v18, %v1006_v63  ;;  %v1010_v4 = vadd.f32 %v1009_v59, %v5173_v12  ;;  %v1079_v5 = vmul.f32 %v5463_v1, %v5463_v1 }
 0x62f   : > { %v1011_v16 = vpop.f32.mrf.mxu1 }
 0x630   : > { %v1062_v25 = vadd.f32 %v5466_v60, %v5463_v1  ;;  %v1080_v6 = vmul.f32 %v5466_v60, %v5466_v60  ;;  %v5475_v29 = vadd.f32 %v1042_v7, %v1010_v4  ;;  %v1012_v9 = vadd.f32 %v1011_v16, %v5179_v15 }
 0x631   : > { %v1015_v30 = vpop.f32.mrf.mxu1 }
 0x632   : > { %v1087_v32 = vadd.f32 %v1080_v6, %v1079_v5  ;;  %v1063_v11 = vadd.f32 %v1062_v25, %v5475_v29  ;;  %v1081_v12 = vmul.f32 %v5475_v29, %v5475_v29  ;;  %v5481_v43 = vadd.f32 %v1042_v7, %v1012_v9 }
 0x633   : > { %v1016_v13 = vadd.f32 %v1015_v30, %v5191_v23  ;;  %v1017_v41 = vpop.f32.mrf.mxu1 }
 0x634   : > { %v1088_v33 = vadd.f32 %v1087_v32, %v1081_v12  ;;  %v1064_v34 = vadd.f32 %v1063_v11, %v5481_v43  ;;  %v1082_v48 = vmul.f32 %v5481_v43, %v5481_v43  ;;  %v1018_v15 = vadd.f32 %v1017_v41, %v5200_v31 }
 0x635   : > { %v5488_v51 = vadd.f32 %v1047_v44, %v1016_v13  ;;  %v1021_v2 = vpop.f32.mrf.mxu1 }
 0x636   : > { %v1089_v53 = vadd.f32 %v1088_v33, %v1082_v48  ;;  %v5490_v54 = vadd.f32 %v1047_v44, %v1018_v15  ;;  %v1022_v56 = vadd.f32 %v1021_v2, %v5209_v39 }
 0x637   : > { %v1065_v23 = vadd.f32 %v1064_v34, %v5488_v51  ;;  %v1083_v35 = vmul.f32 %v5488_v51, %v5488_v51  ;;  %v1023_v62 = vpop.f32.mrf.mxu1 }
 0x638   : > { %v1084_v18 = vmul.f32 %v5490_v54, %v5490_v54  ;;  %v5498_v0 = vadd.f32 %v1052_v57, %v1022_v56  ;;  %v1024_v31 = vadd.f32 %v1023_v62, %v5218_v45 }
 0x639   : > { %v1066_v63 = vadd.f32 %v1065_v23, %v5490_v54  ;;  %v1090_v59 = vadd.f32 %v1089_v53, %v1083_v35 }
 0x63a   : > { %v5502_v4 = vadd.f32 %v1052_v57, %v1024_v31  ;;  %v1085_v39 = vmul.f32 %v5498_v0, %v5498_v0 }
 0x63b   : > { %v1067_v7 = vadd.f32 %v1066_v63, %v5498_v0  ;;  %v1091_v5 = vadd.f32 %v1090_v59, %v1084_v18 }
 0x63c   : > { %v1086_v16 = vmul.f32 %v5502_v4, %v5502_v4 }
 0x63d   : > { %v1068_v25 = vadd.f32 %v1067_v7, %v5502_v4  ;;  %v1092_v6 = vadd.f32 %v1091_v5, %v1085_v39 }
 0x63f   : > { %1069 = vadd.xlane.f32.xlu1 %v1068_v25  ;;  %v1093_v9 = vadd.f32 %v1092_v6, %v1086_v16 }
 0x641   : > { %1094 = vadd.xlane.f32.xlu0 %v1093_v9 }
 0x6c8   : > { %v1070_v45 = vpop.xlane.xlu1 %1069 }
 0x6c9   : > { %v1071_v30 = vrot.slane %v1070_v45, 4 }
 0x6ca   : > { %v1095_v32 = vpop.xlane.xlu0 %1094 }
 0x6cb   : > { %v1072_v11 = vadd.f32 %v1071_v30, %v1070_v45  ;;  %v1096_v12 = vrot.slane %v1095_v32, 4 }
 0x6cd   : > { %v1097_v13 = vadd.f32 %v1096_v12, %v1095_v32  ;;  %v1073_v41 = vrot.slane %v1072_v11, 2 }
 0x6cf   : > { %v1074_v44 = vadd.f32 %v1073_v41, %v1072_v11  ;;  %v1098_v33 = vrot.slane %v1097_v13, 2 }
 0x6d1   : > { %v1075_v34 = vrot.slane %v1074_v44, 1  ;;  %v1099_v48 = vadd.f32 %v1098_v33, %v1097_v13 }
 0x6d3   : > { %v1076_v15 = vadd.f32 %v1075_v34, %v1074_v44  ;;  %v1100_v2 = vrot.slane %v1099_v48, 1 }
 0x6d5   : > { %4714 = vpush %v1076_v15  ;;  %v1101_v53 = vadd.f32 %v1100_v2, %v1099_v48 }
 0x6d7   : > { %4716 = vpush %v1101_v53 }
 0x706   : > { %s4715_s24 = spop %4714 }
 0x707   : > { %s1078_s25 = smul.f32 0.00012207031, %s4715_s24 }
 0x708   : > { %s4717_s26 = spop %4716 }
 0x709   : > { %s1104_s28 = smul.f32 %s1078_s25, %s1078_s25  ;;  %v1116_v18 = vstv %s1078_s25 }
 0x70a   : > { %s1103_s29 = smul.f32 0.00012207031, %s4717_s26 }
 0x70c   : > { %s1105_s14 = ssub.f32 %s1103_s29, %s1104_s28 }
 0x70e   : > { %s1106_s13 = smax.f32 %s4919_s23, %s1105_s14 }
 0x70f   : > { %s1107_s19 = sadd.f32 1e-05, %s1106_s13 }
 0x711   : > { %v1108_v56 = vstv %s1107_s19 }
 0x712   : > { %4787 = vrsqrt.f32 %v1108_v56 }
 0x71f   : > { %v4788_v57 = vpop.eup %4787 }
 0x720   : > { %4718 = vpush %v4788_v57 }
 0x751   : > { %s4719_s20 = spop %4718 }
 0x752   : > { %v1111_v23 = vstv %s4719_s20 }
 0x753   : > { %v1115_v35 = vmul.f32 %v1111_v23, %v5239_v37  ;;  %v1114_v62 = vmul.f32 %v1111_v23, %v5244_v40  ;;  %v1113_v59 = vmul.f32 %v1111_v23, %v5251_v46  ;;  %v1112_v7 = vmul.f32 %v1111_v23, %v5260_v50 }
 0x755   : > { %1142 = vperm.xlu0 %4783, %v1115_v35   ;;  %1137 = vperm.xlu1 %4784, %v1114_v62   ;;  %v1120_v31 = vmul.f32 %v1116_v18, %v1115_v35  ;;  %v1119_v39 = vmul.f32 %v1116_v18, %v1114_v62  ;;  %v1118_v16 = vmul.f32 %v1116_v18, %v1113_v59 }
 0x756   : > { %v1117_v25 = vmul.f32 %v1116_v18, %v1112_v7 }
 0x757   : > { %v1124_v63 = vsub.f32 %v5266_v55, %v1120_v31  ;;  %v1123_v5 = vsub.f32 %v5272_v58, %v1119_v39  ;;  %v1122_v37 = vsub.f32 %v5278_v61, %v1118_v16 }
 0x758   : > { %v1121_v40 = vsub.f32 %v5284_v14, %v1117_v25 }
 0x759   : > { %1170 = vperm.xlu1 %4784, %v1124_v63   ;;  %1132 = vperm.xlu0 %4783, %v1113_v59  }
 0x75d   : > { %1165 = vperm.xlu1 %4784, %v1123_v5   ;;  %1127 = vperm.xlu0 %4783, %v1112_v7   ;;  %v4653_v7 = vld [vmem:[%s5308_s27 + $0x1] ss:$8 sm:$0x3] }
 0x75e   : > { %v1274_v5 = vrot.slane %v4653_v7, %v5310_v24 }
 0x761   : > { %1160 = vperm.xlu1 %4784, %v1122_v37   ;;  %1155 = vperm.xlu0 %4783, %v1121_v40   ;;  %v1278_v37 = vrot.slane %v4653_v7, %v5313_v42 }
 0x7d0   : > { %v1143_v55 = vpop.permute.xlu0 %1142  ;;  %v1138_v6 = vpop.permute.xlu1 %1137 }
 0x7d1   : > { %v1151_v46 = vmul.f32 %v1143_v55, %v5498_v0  ;;  %v1152_v50 = vmul.f32 %v1143_v55, %v5502_v4  ;;  %v1149_v32 = vmul.f32 %v1138_v6, %v5488_v51  ;;  %v1150_v11 = vmul.f32 %v1138_v6, %v5490_v54 }
 0x7d4   : > { %v1171_v9 = vpop.permute.xlu1 %1170  ;;  %v1133_v45 = vpop.permute.xlu0 %1132 }
 0x7d5   : > { %v1179_v30 = vadd.f32 %v1171_v9, %v1151_v46  ;;  %v1180_v58 = vadd.f32 %v1171_v9, %v1152_v50  ;;  %v1147_v34 = vmul.f32 %v1133_v45, %v5475_v29  ;;  %v1148_v4 = vmul.f32 %v1133_v45, %v5481_v43 }
 0x7d7   : > { %v1187_v12 = vmul.f32 0.01, %v1179_v30  ;;  %v1188_v61 = vmul.f32 0.01, %v1180_v58 }
 0x7d8   : > { %v1166_v13 = vpop.permute.xlu1 %1165  ;;  %v1128_v14 = vpop.permute.xlu0 %1127 }
 0x7d9   : > { %v1195_v41 = vmax.f32 %v1179_v30, %v1187_v12  ;;  %v1177_v44 = vadd.f32 %v1166_v13, %v1149_v32  ;;  %v1178_v33 = vadd.f32 %v1166_v13, %v1150_v11  ;;  %v1196_v0 = vmax.f32 %v1180_v58, %v1188_v61 }
 0x7da   : > { %v1145_v2 = vmul.f32 %v1128_v14, %v5463_v1  ;;  %v1146_v51 = vmul.f32 %v1128_v14, %v5466_v60  ;;  %v1438_v13 = vmul.f32 0.2, %v5371_v22  ;;  %v1439_v14 = vmul.f32 0.2, %v5376_v21 }
 0x7db   : > { %v1185_v48 = vmul.f32 0.01, %v1177_v44  ;;  %v1186_v15 = vmul.f32 0.01, %v1178_v33  ;;  %1221 = vmatprep.subr.mxu0 %v1196_v0 }
 0x7dc   : > { %v1161_v54 = vpop.permute.xlu1 %1160  ;;  %v1156_v53 = vpop.permute.xlu0 %1155  ;;  %1222 = vmatpush1.msra.mxu0 %v1195_v41  ;;  %v1440_v41 = vmul.f32 0.2, %v5387_v20 }
 0x7dd   : > { %v1193_v56 = vmax.f32 %v1177_v44, %v1185_v48  ;;  %v1175_v57 = vadd.f32 %v1161_v54, %v1147_v34  ;;  %v1176_v23 = vadd.f32 %v1161_v54, %v1148_v4  ;;  %v1173_v35 = vadd.f32 %v1156_v53, %v1145_v2 }
 0x7de   : > { %v1174_v62 = vadd.f32 %v1156_v53, %v1146_v51  ;;  %v1194_v18 = vmax.f32 %v1178_v33, %v1186_v15  ;;  %v1441_v44 = vmul.f32 0.2, %v5392_v28 }
 0x7df   : > { %v1183_v29 = vmul.f32 0.01, %v1175_v57  ;;  %v1184_v31 = vmul.f32 0.01, %v1176_v23  ;;  %v1181_v43 = vmul.f32 0.01, %v1173_v35 }
 0x7e0   : > { %v1182_v63 = vmul.f32 0.01, %v1174_v62  ;;  %1223 = vmatprep.subr.mxu0 %v1194_v18 }
 0x7e1   : > { %v1191_v59 = vmax.f32 %v1175_v57, %v1183_v29  ;;  %1224 = vmatpush1.msra.mxu0 %v1193_v56  ;;  %v1192_v1 = vmax.f32 %v1176_v23, %v1184_v31  ;;  %v1189_v39 = vmax.f32 %v1173_v35, %v1181_v43 }
 0x7e2   : > { %v1190_v60 = vmax.f32 %v1174_v62, %v1182_v63 }
 0x7e3   : > { %1225 = vmatprep.subr.mxu0 %v1192_v1 }
 0x7e4   : > { %1226 = vmatpush1.msra.mxu0 %v1191_v59 }
 0x7e5   : > { %1227 = vmatprep.subr.mxu0 %v1190_v60 }
 0x7e6   : > { %1228 = vmatpush1.msra.mxu0 %v1189_v39 }
 0x7e7   : > { %4652 = vmatmul.mubr.msk.f32.vlgmr.msra.gmra.mxu0 %vm782_vm11, %v5298_v10 }
 0x7e8   : > { %1669 = vmatprep.mubr.f32.mxu0 %v4917_v19 }
 0x8a7   : > { %v1263_v16 = vpop.f32.mrf.mxu0 }
 0x8a8   : > { %v1264_v25 = vadd.f32 %v1263_v16, %v5316_v47 }
 0x8a9   : > { %v1265_v40 = vpop.f32.mrf.mxu0 }
 0x8aa   : > { %v1281_v55 = vmul.f32 %v1274_v5, %v1264_v25  ;;  %v1266_v6 = vadd.f32 %v1265_v40, %v5316_v47 }
 0x8ac   : > { %v5536_v46 = vadd.f32 %v1281_v55, %v5322_v49  ;;  %v1282_v50 = vmul.f32 %v1278_v37, %v1266_v6 }
 0x8ae   : > { %v5539_v10 = vadd.f32 %v1282_v50, %v5325_v52  ;;  %1285 = vrot.lane.b32.xlu1 %v5536_v46, %s4914_s16  ;;  %v5642_v50 = vld [vmem:[%s7502_s3] sm:$0xff] }
 0x8b0   : > { %1287 = vrot.lane.b32.xlu0 %v5539_v10, %s4914_s16 }
 0x8b2   : > { %1291 = vrot.lane.b32.xlu1 %v5536_v46, %s4913_s15 }
 0x8b4   : > { %1293 = vrot.lane.b32.xlu0 %v5539_v10, %s4913_s15 }
 0x8b6   : > { %1317 = vrot.lane.b32.xlu1 %v5536_v46, %s4915_s17 }
 0x8b8   : > { %1319 = vrot.lane.b32.xlu0 %v5539_v10, %s4915_s17 }
 0x920   : > { %v1286_v49 = vpop.permute.xlu1 %1285 }
 0x922   : > { %v1288_v52 = vpop.permute.xlu0 %1287 }
 0x923   : > { %v5555_v30 = vsel %vm454_vm1, %v1286_v49, %v1288_v52  ;;  %v1290_v12 = vsel %vm454_vm1, %v1288_v52, %v1286_v49  ;;  %v5650_v49 = vld [vmem:[%s7502_s3 + $0x8] sm:$0xff]  ;;  %v5658_v52 = vld [vmem:[%s7502_s3 + $0x10] sm:$0xff] }
 0x924   : > { %v1292_v9 = vpop.permute.xlu1 %1291 }
 0x926   : > { %v1294_v45 = vpop.permute.xlu0 %1293 }
 0x927   : > { %v1296_v58 = vsel %vm461_vm0, %v1294_v45, %v1292_v9  ;;  %v1295_v32 = vsel %vm461_vm0, %v1292_v9, %v1294_v45  ;;  %v5666_v9 = vld [vmem:[%s7502_s3 + $0x18] sm:$0xff] }
 0x928   : > { %1333 = vrot.lane.b32.xlu1 %v1295_v32, %s4915_s17  ;;  %v1300_v11 = vsel %vm5008_vm2, %v5555_v30, %v1296_v58  ;;  %v1297_v61 = vsel %vm5032_vm3, %v1295_v32, %v1290_v12  ;;  %v1318_v33 = vpop.permute.xlu1 %1317 }
 0x929   : > { %1335 = vrot.lane.b32.xlu0 %v1300_v11, %s4915_s17 }
 0x92a   : > { %v1320_v34 = vpop.permute.xlu0 %1319 }
 0x92b   : > { %v1321_v35 = vsel %vm472_vm7, %v1318_v33, %v1320_v34  ;;  %v1322_v29 = vsel %vm472_vm7, %v1320_v34, %v1318_v33 }
 0x92c   : > { %1339 = vrot.lane.b32.xlu1 %v1295_v32, %s4916_s18 }
 0x92d   : > { %1341 = vrot.lane.b32.xlu0 %v1300_v11, %s4916_s18 }
 0x930   : > { %1323 = vrot.lane.b32.xlu1 %v5536_v46, %s4916_s18 }
 0x931   : > { %1325 = vrot.lane.b32.xlu0 %v5539_v10, %s4916_s18 }
 0x934   : > { %1301 = vrot.lane.b32.xlu1 %v1297_v61, %s4915_s17 }
 0x935   : > { %1303 = vrot.lane.b32.xlu0 %v5555_v30, %s4915_s17 }
 0x938   : > { %1307 = vrot.lane.b32.xlu1 %v1297_v61, %s4916_s18 }
 0x939   : > { %1309 = vrot.lane.b32.xlu0 %v5555_v30, %s4916_s18 }
 0x93c   : > { %1444 = vperm.xlu1 %4784, %v1438_v13  }
 0x93d   : > { %1449 = vperm.xlu0 %4783, %v1439_v14  }
 0x940   : > { %1454 = vperm.xlu1 %4784, %v1440_v41  }
 0x941   : > { %1459 = vperm.xlu0 %4783, %v1441_v44   ;;  %v5684_v44 = vld [vmem:[%s5161_s12 + $0x10] sm:$0xff] }
 0x99a   : > { %v1334_v0 = vpop.permute.xlu1 %1333 }
 0x99b   : > { %v1336_v4 = vpop.permute.xlu0 %1335 }
 0x99c   : > { %v1337_v22 = vsel %vm472_vm7, %v1334_v0, %v1336_v4  ;;  %v1338_v21 = vsel %vm472_vm7, %v1336_v4, %v1334_v0 }
 0x99e   : > { %v1340_v48 = vpop.permute.xlu1 %1339 }
 0x99f   : > { %v1342_v15 = vpop.permute.xlu0 %1341 }
 0x9a0   : > { %v1343_v20 = vsel %vm479_vm4, %v1340_v48, %v1342_v15  ;;  %v1344_v28 = vsel %vm479_vm4, %v1342_v15, %v1340_v48 }
 0x9a1   : > { %v1348_v2 = vsel %vm5058_vm6, %v1337_v22, %v1344_v28  ;;  %v1347_v51 = vsel %vm5054_vm5, %v1338_v21, %v1343_v20  ;;  %v1346_v23 = vsel %vm5075_vm8, %v1344_v28, %v1337_v22  ;;  %v1345_v18 = vsel %vm5079_vm9, %v1343_v20, %v1338_v21  ;;  %v5696_v21 = vld [vmem:[%s5161_s12 + $0x18] sm:$0xff] }
 0x9a2   : > { %1361 = vmatprep.subr.mxu1 %v1348_v2  ;;  %v1324_v54 = vpop.permute.xlu1 %1323 }
 0x9a3   : > { %v1326_v53 = vpop.permute.xlu0 %1325  ;;  %1362 = vmatpush1.msra.mxu1 %v1347_v51 }
 0x9a4   : > { %v1328_v56 = vsel %vm479_vm4, %v1326_v53, %v1324_v54  ;;  %1363 = vmatprep.subr.mxu1 %v1300_v11  ;;  %v1327_v57 = vsel %vm479_vm4, %v1324_v54, %v1326_v53 }
 0x9a5   : > { %1364 = vmatpush1.msra.mxu1 %v1295_v32  ;;  %v1332_v43 = vsel %vm5058_vm6, %v1321_v35, %v1328_v56  ;;  %v1331_v63 = vsel %vm5054_vm5, %v1322_v29, %v1327_v57  ;;  %v1330_v60 = vsel %vm5075_vm8, %v1328_v56, %v1321_v35  ;;  %v1329_v39 = vsel %vm5079_vm9, %v1327_v57, %v1322_v29  ;;  %v5705_v56 = vld [vmem:[%s5161_s12 + $0x20] sm:$0xff] }
 0x9a6   : > { %1365 = vmatprep.subr.mxu1 %v1346_v23  ;;  %v1302_v62 = vpop.permute.xlu1 %1301 }
 0x9a7   : > { %v1304_v31 = vpop.permute.xlu0 %1303  ;;  %1366 = vmatpush1.msra.mxu1 %v1345_v18 }
 0x9a8   : > { %1367 = vmatprep.subr.mxu1 %v1332_v43  ;;  %v1305_v7 = vsel %vm472_vm7, %v1302_v62, %v1304_v31  ;;  %v1306_v5 = vsel %vm472_vm7, %v1304_v31, %v1302_v62  ;;  %v5712_v31 = vld [vmem:[%s5161_s12 + $0x28] sm:$0xff] }
 0x9a9   : > { %1368 = vmatpush1.msra.mxu1 %v1331_v63 }
 0x9aa   : > { %1369 = vmatprep.subr.mxu1 %v5539_v10  ;;  %v1308_v59 = vpop.permute.xlu1 %1307 }
 0x9ab   : > { %v1310_v1 = vpop.permute.xlu0 %1309  ;;  %1370 = vmatpush1.msra.mxu1 %v5536_v46 }
 0x9ac   : > { %v1311_v16 = vsel %vm479_vm4, %v1308_v59, %v1310_v1  ;;  %v1312_v25 = vsel %vm479_vm4, %v1310_v1, %v1308_v59  ;;  %1371 = vmatprep.subr.mxu1 %v1330_v60 }
 0x9ad   : > { %1372 = vmatpush1.msra.mxu1 %v1329_v39  ;;  %v1316_v37 = vsel %vm5058_vm6, %v1305_v7, %v1312_v25  ;;  %v1315_v40 = vsel %vm5054_vm5, %v1306_v5, %v1311_v16  ;;  %v1314_v55 = vsel %vm5075_vm8, %v1312_v25, %v1305_v7  ;;  %v1313_v6 = vsel %vm5079_vm9, %v1311_v16, %v1306_v5  ;;  %v5720_v39 = vld [vmem:[%s5161_s12 + $0x30] sm:$0xff] }
 0x9ae   : > { %1373 = vmatprep.subr.mxu1 %v1316_v37 }
 0x9af   : > { %1374 = vmatpush1.msra.mxu1 %v1315_v40 }
 0x9b0   : > { %1375 = vmatprep.subr.mxu1 %v5555_v30  ;;  %v5672_v30 = vld [vmem:[%s5161_s12] sm:$0xff] }
 0x9b1   : > { %1376 = vmatpush1.msra.mxu1 %v1297_v61  ;;  %v5678_v61 = vld [vmem:[%s5161_s12 + $0x8] sm:$0xff] }
 0x9b2   : > { %1377 = vmatprep.subr.mxu1 %v1314_v55 }
 0x9b3   : > { %1378 = vmatpush1.msra.mxu1 %v1313_v6  ;;  %v5731_v6 = vld [vmem:[%s5161_s12 + $0x38] sm:$0xff] }
 0x9b4   : > { %1379 = vmatprep.subr.mxu1 %v5539_v10 }
 0x9b5   : > { %1380 = vmatpush1.msra.mxu1 %v5536_v46 }
 0x9b6   : > { %4654 = vmatmul.mubr.msk.f32.vlgmr.msra.gmra.mxu1 %vm530_vm10, %v5642_v50 }
 0x9b7   : > { %1419 = vmatprep.mubr.f32.mxu1 %v4917_v19  ;;  %v1445_v32 = vpop.permute.xlu1 %1444 }
 0x9b8   : > { %v1450_v34 = vpop.permute.xlu0 %1449 }
 0x9ba   : > { %4655 = vmatmul.mubr.msk.f32.gmra.mxu1 %vm530_vm10, %v5650_v49 }
 0x9bb   : > { %1425 = vmatprep.mubr.f32.mxu1 %v4917_v19  ;;  %v1455_v35 = vpop.permute.xlu1 %1454 }
 0x9bc   : > { %v1460_v5 = vpop.permute.xlu0 %1459 }
 0x9be   : > { %4656 = vmatmul.mubr.msk.f32.gmra.mxu1 %vm530_vm10, %v5658_v52 }
 0x9bf   : > { %1431 = vmatprep.mubr.f32.mxu1 %v4917_v19 }
 0x9c2   : > { %4657 = vmatmul.mubr.msk.f32.gmra.mxu1 %vm530_vm10, %v5666_v9 }
 0x9c3   : > { %2077 = vmatprep.mubr.f32.mxu1 %v4917_v19 }
 0xa76   : > { %v1415_v45 = vpop.f32.mrf.mxu1 }
 0xa77   : > { %v1416_v58 = vadd.f32 %v5672_v30, %v1415_v45 }
 0xa78   : > { %v1417_v11 = vpop.f32.mrf.mxu1 }
 0xa79   : > { %v5675_v12 = vadd.f32 %v1445_v32, %v1416_v58  ;;  %v1418_v13 = vadd.f32 %v5678_v61, %v1417_v11 }
 0xa7a   : > { %v1421_v14 = vpop.f32.mrf.mxu1 }
 0xa7b   : > { %v5681_v41 = vadd.f32 %v1445_v32, %v1418_v13  ;;  %v1422_v33 = vadd.f32 %v5684_v44, %v1421_v14  ;;  %v1487_v0 = vmul.f32 %v5675_v12, %v5675_v12 }
 0xa7c   : > { %v1423_v4 = vpop.f32.mrf.mxu1 }
 0xa7d   : > { %v1470_v48 = vadd.f32 %v5681_v41, %v5675_v12  ;;  %v1488_v15 = vmul.f32 %v5681_v41, %v5681_v41  ;;  %v5693_v22 = vadd.f32 %v1450_v34, %v1422_v33  ;;  %v1424_v20 = vadd.f32 %v5696_v21, %v1423_v4 }
 0xa7e   : > { %v1427_v28 = vpop.f32.mrf.mxu1 }
 0xa7f   : > { %v1495_v2 = vadd.f32 %v1488_v15, %v1487_v0  ;;  %v1471_v51 = vadd.f32 %v1470_v48, %v5693_v22  ;;  %v1489_v54 = vmul.f32 %v5693_v22, %v5693_v22  ;;  %v5702_v53 = vadd.f32 %v1450_v34, %v1424_v20 }
 0xa80   : > { %v1428_v57 = vadd.f32 %v5705_v56, %v1427_v28  ;;  %v1429_v23 = vpop.f32.mrf.mxu1 }
 0xa81   : > { %v1496_v62 = vadd.f32 %v1495_v2, %v1489_v54  ;;  %v1472_v18 = vadd.f32 %v1471_v51, %v5702_v53  ;;  %v1490_v29 = vmul.f32 %v5702_v53, %v5702_v53  ;;  %v1430_v43 = vadd.f32 %v5712_v31, %v1429_v23 }
 0xa82   : > { %v5715_v63 = vadd.f32 %v1455_v35, %v1428_v57  ;;  %v1433_v59 = vpop.f32.mrf.mxu1 }
 0xa83   : > { %v1497_v1 = vadd.f32 %v1496_v62, %v1490_v29  ;;  %v5717_v60 = vadd.f32 %v1455_v35, %v1430_v43  ;;  %v1434_v7 = vadd.f32 %v5720_v39, %v1433_v59 }
 0xa84   : > { %v1473_v16 = vadd.f32 %v1472_v18, %v5715_v63  ;;  %v1491_v25 = vmul.f32 %v5715_v63, %v5715_v63  ;;  %v1435_v37 = vpop.f32.mrf.mxu1 }
 0xa85   : > { %v1492_v40 = vmul.f32 %v5717_v60, %v5717_v60  ;;  %v5728_v55 = vadd.f32 %v1460_v5, %v1434_v7  ;;  %v1436_v45 = vadd.f32 %v5731_v6, %v1435_v37  ;;  %v5753_v37 = vld [vmem:[%s7504_s5 + $0x10] sm:$0xff] }
 0xa86   : > { %v1474_v58 = vadd.f32 %v1473_v16, %v5717_v60  ;;  %v1498_v32 = vadd.f32 %v1497_v1, %v1491_v25  ;;  %v5747_v16 = vld [vmem:[%s7504_s5 + $0x18] sm:$0xff] }
 0xa87   : > { %v5735_v11 = vadd.f32 %v1460_v5, %v1436_v45  ;;  %v1493_v13 = vmul.f32 %v5728_v55, %v5728_v55 }
 0xa88   : > { %v1475_v14 = vadd.f32 %v1474_v58, %v5728_v55  ;;  %v1499_v33 = vadd.f32 %v1498_v32, %v1492_v40  ;;  %v5759_v32 = vld [vmem:[%s7505_s6 + $0x18] sm:$0xff] }
 0xa89   : > { %v1494_v34 = vmul.f32 %v5735_v11, %v5735_v11 }
 0xa8a   : > { %v1476_v0 = vadd.f32 %v1475_v14, %v5735_v11  ;;  %v1500_v4 = vadd.f32 %v1499_v33, %v1493_v13  ;;  %v5765_v14 = vld [vmem:[%s7504_s5 + $0x8] sm:$0xff] }
 0xa8c   : > { %1477 = vadd.xlane.f32.xlu1 %v1476_v0  ;;  %v1501_v48 = vadd.f32 %v1500_v4, %v1494_v34  ;;  %v5771_v0 = vld [vmem:[%s7504_s5] sm:$0xff] }
 0xa8e   : > { %1502 = vadd.xlane.f32.xlu0 %v1501_v48  ;;  %v5777_v48 = vld [vmem:[%s7505_s6 + $0x10] sm:$0xff] }
 0xb15   : > { %v1478_v15 = vpop.xlane.xlu1 %1477 }
 0xb16   : > { %v1479_v20 = vrot.slane %v1478_v15, 4 }
 0xb17   : > { %v1503_v28 = vpop.xlane.xlu0 %1502 }
 0xb18   : > { %v1480_v2 = vadd.f32 %v1479_v20, %v1478_v15  ;;  %v1504_v51 = vrot.slane %v1503_v28, 4 }
 0xb1a   : > { %v1505_v54 = vadd.f32 %v1504_v51, %v1503_v28  ;;  %v1481_v57 = vrot.slane %v1480_v2, 2 }
 0xb1c   : > { %v1482_v23 = vadd.f32 %v1481_v57, %v1480_v2  ;;  %v1506_v35 = vrot.slane %v1505_v54, 2  ;;  %v5783_v2 = vld [vmem:[%s7505_s6 + $0x8] sm:$0xff] }
 0xb1e   : > { %v1483_v62 = vrot.slane %v1482_v23, 1  ;;  %v1507_v18 = vadd.f32 %v1506_v35, %v1505_v54  ;;  %v5789_v54 = vld [vmem:[%s7505_s6] sm:$0xff] }
 0xb20   : > { %v1484_v29 = vadd.f32 %v1483_v62, %v1482_v23  ;;  %v1508_v43 = vrot.slane %v1507_v18, 1 }
 0xb22   : > { %4720 = vpush %v1484_v29  ;;  %v1509_v59 = vadd.f32 %v1508_v43, %v1507_v18 }
 0xb24   : > { %4722 = vpush %v1509_v59 }
 0xb53   : > { %s4721_s13 = spop %4720 }
 0xb54   : > { %s1486_s19 = smul.f32 0.00012207031, %s4721_s13 }
 0xb55   : > { %s4723_s20 = spop %4722 }
 0xb56   : > { %s1512_s21 = smul.f32 %s1486_s19, %s1486_s19  ;;  %v1524_v45 = vstv %s1486_s19 }
 0xb57   : > { %s1511_s22 = smul.f32 0.00012207031, %s4723_s20 }
 0xb59   : > { %s1513_s24 = ssub.f32 %s1511_s22, %s1512_s21 }
 0xb5b   : > { %s1514_s25 = smax.f32 %s4919_s23, %s1513_s24 }
 0xb5c   : > { %s1515_s26 = sadd.f32 1e-05, %s1514_s25 }
 0xb5e   : > { %v1516_v1 = vstv %s1515_s26 }
 0xb5f   : > { %4789 = vrsqrt.f32 %v1516_v1 }
 0xb6c   : > { %v4790_v7 = vpop.eup %4789 }
 0xb6d   : > { %4724 = vpush %v4790_v7 }
 0xb9e   : > { %s4725_s28 = spop %4724 }
 0xb9f   : > { %v1519_v5 = vstv %s4725_s28 }
 0xba0   : > { %v1523_v25 = vmul.f32 %v5747_v16, %v1519_v5  ;;  %v1522_v40 = vmul.f32 %v5753_v37, %v1519_v5  ;;  %v1521_v33 = vmul.f32 %v5765_v14, %v1519_v5  ;;  %v1520_v4 = vmul.f32 %v5771_v0, %v1519_v5 }
 0xba2   : > { %1550 = vperm.xlu0 %4783, %v1523_v25   ;;  %1545 = vperm.xlu1 %4784, %v1522_v40   ;;  %v1528_v58 = vmul.f32 %v1524_v45, %v1523_v25  ;;  %v1527_v34 = vmul.f32 %v1524_v45, %v1522_v40  ;;  %v1526_v20 = vmul.f32 %v1524_v45, %v1521_v33 }
 0xba3   : > { %v1525_v28 = vmul.f32 %v1524_v45, %v1520_v4 }
 0xba4   : > { %v1532_v13 = vsub.f32 %v5759_v32, %v1528_v58  ;;  %v1531_v15 = vsub.f32 %v5777_v48, %v1527_v34  ;;  %v1530_v51 = vsub.f32 %v5783_v2, %v1526_v20 }
 0xba5   : > { %v1529_v57 = vsub.f32 %v5789_v54, %v1525_v28 }
 0xba6   : > { %1578 = vperm.xlu1 %4784, %v1532_v13   ;;  %1540 = vperm.xlu0 %4783, %v1521_v33  }
 0xbaa   : > { %1573 = vperm.xlu1 %4784, %v1531_v15   ;;  %1535 = vperm.xlu0 %4783, %v1520_v4  }
 0xbae   : > { %1568 = vperm.xlu1 %4784, %v1530_v51   ;;  %1563 = vperm.xlu0 %4783, %v1529_v57  }
 0xc1d   : > { %v1551_v23 = vpop.permute.xlu0 %1550  ;;  %v1546_v35 = vpop.permute.xlu1 %1545 }
 0xc1e   : > { %v1559_v62 = vmul.f32 %v1551_v23, %v5728_v55  ;;  %v1560_v18 = vmul.f32 %v1551_v23, %v5735_v11  ;;  %v1557_v7 = vmul.f32 %v1546_v35, %v5715_v63  ;;  %v1558_v5 = vmul.f32 %v1546_v35, %v5717_v60 }
 0xc21   : > { %v1579_v29 = vpop.permute.xlu1 %1578  ;;  %v1541_v43 = vpop.permute.xlu0 %1540 }
 0xc22   : > { %v1587_v59 = vadd.f32 %v1579_v29, %v1559_v62  ;;  %v1588_v1 = vadd.f32 %v1579_v29, %v1560_v18  ;;  %v1555_v4 = vmul.f32 %v1541_v43, %v5693_v22  ;;  %v1556_v11 = vmul.f32 %v1541_v43, %v5702_v53 }
 0xc24   : > { %v1595_v25 = vmul.f32 0.01, %v1587_v59  ;;  %v1596_v40 = vmul.f32 0.01, %v1588_v1 }
 0xc25   : > { %v1574_v45 = vpop.permute.xlu1 %1573  ;;  %v1536_v58 = vpop.permute.xlu0 %1535 }
 0xc26   : > { %v1603_v13 = vmax.f32 %v1587_v59, %v1595_v25  ;;  %v1585_v33 = vadd.f32 %v1574_v45, %v1557_v7  ;;  %v1586_v34 = vadd.f32 %v1574_v45, %v1558_v5  ;;  %v1604_v55 = vmax.f32 %v1588_v1, %v1596_v40  ;;  %v5803_v5 = vld [vmem:[%s7506_s7] sm:$0xff] }
 0xc27   : > { %v1553_v28 = vmul.f32 %v1536_v58, %v5675_v12  ;;  %v1554_v63 = vmul.f32 %v1536_v58, %v5681_v41  ;;  %v4659_v25 = vld [vmem:[%s5308_s27 + $0x2] ss:$8 sm:$0x3] }
 0xc28   : > { %v1593_v15 = vmul.f32 0.01, %v1585_v33  ;;  %v1594_v20 = vmul.f32 0.01, %v1586_v34  ;;  %1629 = vmatprep.subr.mxu0 %v1604_v55  ;;  %v1682_v40 = vrot.slane %v4659_v25, %v5310_v24 }
 0xc29   : > { %v1569_v60 = vpop.permute.xlu1 %1568  ;;  %v1564_v51 = vpop.permute.xlu0 %1563  ;;  %1630 = vmatpush1.msra.mxu0 %v1603_v13  ;;  %v1686_v13 = vrot.slane %v4659_v25, %v5313_v42 }
 0xc2a   : > { %v1601_v57 = vmax.f32 %v1585_v33, %v1593_v15  ;;  %v1583_v23 = vadd.f32 %v1569_v60, %v1555_v4  ;;  %v1584_v35 = vadd.f32 %v1569_v60, %v1556_v11  ;;  %v1581_v62 = vadd.f32 %v1564_v51, %v1553_v28 }
 0xc2b   : > { %v1582_v18 = vadd.f32 %v1564_v51, %v1554_v63  ;;  %v1602_v29 = vmax.f32 %v1586_v34, %v1594_v20 }
 0xc2c   : > { %v1591_v22 = vmul.f32 0.01, %v1583_v23  ;;  %v1592_v59 = vmul.f32 0.01, %v1584_v35  ;;  %v1589_v53 = vmul.f32 0.01, %v1581_v62 }
 0xc2d   : > { %v1590_v43 = vmul.f32 0.01, %v1582_v18  ;;  %1631 = vmatprep.subr.mxu0 %v1602_v29  ;;  %v5873_v29 = vld [vmem:[%s7503_s4 + $0x8] sm:$0xff] }
 0xc2e   : > { %v1599_v1 = vmax.f32 %v1583_v23, %v1591_v22  ;;  %1632 = vmatpush1.msra.mxu0 %v1601_v57  ;;  %v1600_v12 = vmax.f32 %v1584_v35, %v1592_v59  ;;  %v1597_v7 = vmax.f32 %v1581_v62, %v1589_v53  ;;  %v5865_v62 = vld [vmem:[%s7503_s4] sm:$0xff]  ;;  %v1847_v22 = vmul.f32 0.3, %v5873_v29  ;;  %v5879_v59 = vld [vmem:[%s7503_s4 + $0x10] sm:$0xff] }
 0xc2f   : > { %v1598_v41 = vmax.f32 %v1582_v18, %v1590_v43  ;;  %v1846_v18 = vmul.f32 0.3, %v5865_v62  ;;  %v1848_v53 = vmul.f32 0.3, %v5879_v59  ;;  %v5885_v43 = vld [vmem:[%s7503_s4 + $0x18] sm:$0xff] }
 0xc30   : > { %1633 = vmatprep.subr.mxu0 %v1600_v12 }
 0xc31   : > { %1634 = vmatpush1.msra.mxu0 %v1599_v1  ;;  %v1849_v1 = vmul.f32 0.3, %v5885_v43 }
 0xc32   : > { %1635 = vmatprep.subr.mxu0 %v1598_v41 }
 0xc33   : > { %1636 = vmatpush1.msra.mxu0 %v1597_v7 }
 0xc34   : > { %4658 = vmatmul.mubr.msk.f32.vlgmr.msra.gmra.mxu0 %vm782_vm11, %v5803_v5 }
 0xc35   : > { %1821 = vmatprep.mubr.f32.mxu0 %v4917_v19 }
 0xcf4   : > { %v1671_v45 = vpop.f32.mrf.mxu0 }
 0xcf5   : > { %v1672_v58 = vadd.f32 %v1671_v45, %v5316_v47 }
 0xcf6   : > { %v1673_v33 = vpop.f32.mrf.mxu0 }
 0xcf7   : > { %v1689_v34 = vmul.f32 %v1682_v40, %v1672_v58  ;;  %v1674_v4 = vadd.f32 %v1673_v33, %v5316_v47 }
 0xcf9   : > { %v5814_v55 = vadd.f32 %v1689_v34, %v5536_v46  ;;  %v1690_v11 = vmul.f32 %v1686_v13, %v1674_v4 }
 0xcfb   : > { %v5817_v15 = vadd.f32 %v1690_v11, %v5539_v10  ;;  %1693 = vrot.lane.b32.xlu1 %v5814_v55, %s4914_s16 }
 0xcfd   : > { %1695 = vrot.lane.b32.xlu0 %v5817_v15, %s4914_s16 }
 0xcff   : > { %1699 = vrot.lane.b32.xlu1 %v5814_v55, %s4913_s15 }
 0xd01   : > { %1701 = vrot.lane.b32.xlu0 %v5817_v15, %s4913_s15 }
 0xd03   : > { %1725 = vrot.lane.b32.xlu1 %v5814_v55, %s4915_s17 }
 0xd05   : > { %1727 = vrot.lane.b32.xlu0 %v5817_v15, %s4915_s17 }
 0xd6d   : > { %v1694_v46 = vpop.permute.xlu1 %1693 }
 0xd6f   : > { %v1696_v10 = vpop.permute.xlu0 %1695 }
 0xd70   : > { %v5833_v63 = vsel %vm454_vm1, %v1694_v46, %v1696_v10  ;;  %v1698_v23 = vsel %vm454_vm1, %v1696_v10, %v1694_v46 }
 0xd71   : > { %v1700_v20 = vpop.permute.xlu1 %1699 }
 0xd73   : > { %v1702_v28 = vpop.permute.xlu0 %1701 }
 0xd74   : > { %v1704_v60 = vsel %vm461_vm0, %v1702_v28, %v1700_v20  ;;  %v1703_v51 = vsel %vm461_vm0, %v1700_v20, %v1702_v28 }
 0xd75   : > { %1741 = vrot.lane.b32.xlu1 %v1703_v51, %s4915_s17  ;;  %v1708_v57 = vsel %vm5008_vm2, %v5833_v63, %v1704_v60  ;;  %v5854_v35 = vsel %vm5032_vm3, %v1703_v51, %v1698_v23  ;;  %v1726_v12 = vpop.permute.xlu1 %1725 }
 0xd76   : > { %1743 = vrot.lane.b32.xlu0 %v1708_v57, %s4915_s17 }
 0xd77   : > { %v1728_v41 = vpop.permute.xlu0 %1727 }
 0xd78   : > { %v1729_v23 = vsel %vm472_vm7, %v1726_v12, %v1728_v41 }
 0xd79   : > { %1747 = vrot.lane.b32.xlu1 %v1703_v51, %s4916_s18 }
 0xd7a   : > { %1749 = vrot.lane.b32.xlu0 %v1708_v57, %s4916_s18 }
 0xd7d   : > { %1731 = vrot.lane.b32.xlu1 %v5814_v55, %s4916_s18 }
 0xd7e   : > { %1733 = vrot.lane.b32.xlu0 %v5817_v15, %s4916_s18 }
 0xd81   : > { %1709 = vrot.lane.b32.xlu1 %v5854_v35, %s4915_s17 }
 0xd82   : > { %1711 = vrot.lane.b32.xlu0 %v5833_v63, %s4915_s17 }
 0xd85   : > { %1715 = vrot.lane.b32.xlu1 %v5854_v35, %s4916_s18 }
 0xd86   : > { %1717 = vrot.lane.b32.xlu0 %v5833_v63, %s4916_s18 }
 0xd89   : > { %1852 = vperm.xlu1 %4784, %v1846_v18  }
 0xd8a   : > { %1857 = vperm.xlu0 %4783, %v1847_v22  }
 0xd8d   : > { %1862 = vperm.xlu1 %4784, %v1848_v53   ;;  %v1730_v53 = vsel %vm472_vm7, %v1728_v41, %v1726_v12 }
 0xd8e   : > { %1867 = vperm.xlu0 %4783, %v1849_v1  }
 0xde7   : > { %v1742_v7 = vpop.permute.xlu1 %1741 }
 0xde8   : > { %v1744_v25 = vpop.permute.xlu0 %1743 }
 0xde9   : > { %v1745_v58 = vsel %vm472_vm7, %v1742_v7, %v1744_v25  ;;  %v1746_v13 = vsel %vm472_vm7, %v1744_v25, %v1742_v7 }
 0xdeb   : > { %v1748_v40 = vpop.permute.xlu1 %1747 }
 0xdec   : > { %v1750_v45 = vpop.permute.xlu0 %1749 }
 0xded   : > { %v1751_v33 = vsel %vm479_vm4, %v1748_v40, %v1750_v45  ;;  %v1752_v34 = vsel %vm479_vm4, %v1750_v45, %v1748_v40 }
 0xdee   : > { %v1756_v4 = vsel %vm5058_vm6, %v1745_v58, %v1752_v34  ;;  %v1755_v11 = vsel %vm5054_vm5, %v1746_v13, %v1751_v33  ;;  %v1754_v60 = vsel %vm5075_vm8, %v1752_v34, %v1745_v58  ;;  %v1753_v22 = vsel %vm5079_vm9, %v1751_v33, %v1746_v13 }
 0xdef   : > { %1769 = vmatprep.subr.mxu0 %v1756_v4  ;;  %v1732_v46 = vpop.permute.xlu1 %1731 }
 0xdf0   : > { %v1734_v10 = vpop.permute.xlu0 %1733  ;;  %1770 = vmatpush1.msra.mxu0 %v1755_v11 }
 0xdf1   : > { %v1736_v20 = vsel %vm479_vm4, %v1734_v10, %v1732_v46  ;;  %1771 = vmatprep.subr.mxu0 %v1708_v57  ;;  %v1735_v28 = vsel %vm479_vm4, %v1732_v46, %v1734_v10 }
 0xdf2   : > { %1772 = vmatpush1.msra.mxu0 %v1703_v51  ;;  %v1740_v57 = vsel %vm5058_vm6, %v1729_v23, %v1736_v20  ;;  %v1739_v51 = vsel %vm5054_vm5, %v1730_v53, %v1735_v28  ;;  %v1738_v40 = vsel %vm5075_vm8, %v1736_v20, %v1729_v23  ;;  %v1737_v12 = vsel %vm5079_vm9, %v1735_v28, %v1730_v53 }
 0xdf3   : > { %1773 = vmatprep.subr.mxu0 %v1754_v60  ;;  %v1710_v18 = vpop.permute.xlu1 %1709 }
 0xdf4   : > { %v1712_v1 = vpop.permute.xlu0 %1711  ;;  %1774 = vmatpush1.msra.mxu0 %v1753_v22 }
 0xdf5   : > { %1775 = vmatprep.subr.mxu0 %v1740_v57  ;;  %v1713_v41 = vsel %vm472_vm7, %v1710_v18, %v1712_v1  ;;  %v1714_v45 = vsel %vm472_vm7, %v1712_v1, %v1710_v18 }
 0xdf6   : > { %1776 = vmatpush1.msra.mxu0 %v1739_v51 }
 0xdf7   : > { %1777 = vmatprep.subr.mxu0 %v5817_v15  ;;  %v1716_v7 = vpop.permute.xlu1 %1715 }
 0xdf8   : > { %v1718_v25 = vpop.permute.xlu0 %1717  ;;  %1778 = vmatpush1.msra.mxu0 %v5814_v55 }
 0xdf9   : > { %v1719_v58 = vsel %vm479_vm4, %v1716_v7, %v1718_v25  ;;  %v1720_v13 = vsel %vm479_vm4, %v1718_v25, %v1716_v7  ;;  %1779 = vmatprep.subr.mxu0 %v1738_v40 }
 0xdfa   : > { %1780 = vmatpush1.msra.mxu0 %v1737_v12  ;;  %v1724_v33 = vsel %vm5058_vm6, %v1713_v41, %v1720_v13  ;;  %v1723_v34 = vsel %vm5054_vm5, %v1714_v45, %v1719_v58  ;;  %v1722_v4 = vsel %vm5075_vm8, %v1720_v13, %v1713_v41  ;;  %v1721_v11 = vsel %vm5079_vm9, %v1719_v58, %v1714_v45 }
 0xdfb   : > { %1781 = vmatprep.subr.mxu0 %v1724_v33 }
 0xdfc   : > { %1782 = vmatpush1.msra.mxu0 %v1723_v34 }
 0xdfd   : > { %1783 = vmatprep.subr.mxu0 %v5833_v63 }
 0xdfe   : > { %1784 = vmatpush1.msra.mxu0 %v5854_v35 }
 0xdff   : > { %1785 = vmatprep.subr.mxu0 %v1722_v4 }
 0xe00   : > { %1786 = vmatpush1.msra.mxu0 %v1721_v11 }
 0xe01   : > { %1787 = vmatprep.subr.mxu0 %v5817_v15 }
 0xe02   : > { %1788 = vmatpush1.msra.mxu0 %v5814_v55 }
 0xe03   : > { %4660 = vmatmul.mubr.msk.f32.vlgmr.msra.gmra.mxu0 %vm530_vm10, %v5642_v50 }
 0xe04   : > { %1827 = vmatprep.mubr.f32.mxu0 %v4917_v19  ;;  %v1853_v35 = vpop.permute.xlu1 %1852 }
 0xe05   : > { %v1858_v60 = vpop.permute.xlu0 %1857 }
 0xe07   : > { %4661 = vmatmul.mubr.msk.f32.gmra.mxu0 %vm530_vm10, %v5650_v49 }
 0xe08   : > { %1833 = vmatprep.mubr.f32.mxu0 %v4917_v19  ;;  %v1863_v40 = vpop.permute.xlu1 %1862 }
 0xe09   : > { %v1868_v11 = vpop.permute.xlu0 %1867 }
 0xe0b   : > { %4662 = vmatmul.mubr.msk.f32.gmra.mxu0 %vm530_vm10, %v5658_v52 }
 0xe0c   : > { %1839 = vmatprep.mubr.f32.mxu0 %v4917_v19 }
 0xe0f   : > { %4663 = vmatmul.mubr.msk.f32.gmra.mxu0 %vm530_vm10, %v5666_v9 }
 0xe10   : > { %2229 = vmatprep.mubr.f32.mxu0 %v4917_v19 }
 0xec3   : > { %v1823_v63 = vpop.f32.mrf.mxu0 }
 0xec4   : > { %v1824_v50 = vadd.f32 %v5672_v30, %v1823_v63 }
 0xec5   : > { %v1825_v46 = vpop.f32.mrf.mxu0 }
 0xec6   : > { %v5955_v10 = vadd.f32 %v1853_v35, %v1824_v50  ;;  %v1826_v49 = vadd.f32 %v5678_v61, %v1825_v46 }
 0xec7   : > { %v1829_v20 = vpop.f32.mrf.mxu0 }
 0xec8   : > { %v5958_v28 = vadd.f32 %v1853_v35, %v1826_v49  ;;  %v1830_v52 = vadd.f32 %v5684_v44, %v1829_v20  ;;  %v1895_v9 = vmul.f32 %v5955_v10, %v5955_v10 }
 0xec9   : > { %v1831_v23 = vpop.f32.mrf.mxu0 }
 0xeca   : > { %v1878_v18 = vadd.f32 %v5958_v28, %v5955_v10  ;;  %v1896_v30 = vmul.f32 %v5958_v28, %v5958_v28  ;;  %v5967_v22 = vadd.f32 %v1858_v60, %v1830_v52  ;;  %v1832_v61 = vadd.f32 %v5696_v21, %v1831_v23 }
 0xecb   : > { %v1835_v53 = vpop.f32.mrf.mxu0 }
 0xecc   : > { %v1903_v1 = vadd.f32 %v1896_v30, %v1895_v9  ;;  %v1879_v57 = vadd.f32 %v1878_v18, %v5967_v22  ;;  %v1897_v44 = vmul.f32 %v5967_v22, %v5967_v22  ;;  %v5973_v51 = vadd.f32 %v1858_v60, %v1832_v61 }
 0xecd   : > { %v1836_v7 = vadd.f32 %v5705_v56, %v1835_v53  ;;  %v1837_v25 = vpop.f32.mrf.mxu0 }
 0xece   : > { %v1904_v12 = vadd.f32 %v1903_v1, %v1897_v44  ;;  %v1880_v41 = vadd.f32 %v1879_v57, %v5973_v51  ;;  %v1898_v45 = vmul.f32 %v5973_v51, %v5973_v51  ;;  %v1838_v21 = vadd.f32 %v5712_v31, %v1837_v25 }
 0xecf   : > { %v5980_v58 = vadd.f32 %v1863_v40, %v1836_v7  ;;  %v1841_v13 = vpop.f32.mrf.mxu0 }
 0xed0   : > { %v1905_v33 = vadd.f32 %v1904_v12, %v1898_v45  ;;  %v5982_v34 = vadd.f32 %v1863_v40, %v1838_v21  ;;  %v1842_v4 = vadd.f32 %v5720_v39, %v1841_v13 }
 0xed1   : > { %v1881_v56 = vadd.f32 %v1880_v41, %v5980_v58  ;;  %v1899_v63 = vmul.f32 %v5980_v58, %v5980_v58  ;;  %v1843_v50 = vpop.f32.mrf.mxu0 }
 0xed2   : > { %v1900_v35 = vmul.f32 %v5982_v34, %v5982_v34  ;;  %v5990_v46 = vadd.f32 %v1868_v11, %v1842_v4  ;;  %v1844_v31 = vadd.f32 %v5731_v6, %v1843_v50 }
 0xed3   : > { %v1906_v49 = vadd.f32 %v1905_v33, %v1899_v63  ;;  %v1882_v20 = vadd.f32 %v1881_v56, %v5982_v34 }
 0xed4   : > { %v1901_v39 = vmul.f32 %v5990_v46, %v5990_v46  ;;  %v5996_v52 = vadd.f32 %v1868_v11, %v1844_v31 }
 0xed5   : > { %v1883_v60 = vadd.f32 %v1882_v20, %v5990_v46  ;;  %v1907_v9 = vadd.f32 %v1906_v49, %v1900_v35 }
 0xed6   : > { %v1902_v23 = vmul.f32 %v5996_v52, %v5996_v52 }
 0xed7   : > { %v1884_v18 = vadd.f32 %v1883_v60, %v5996_v52  ;;  %v1908_v30 = vadd.f32 %v1907_v9, %v1901_v39 }
 0xed9   : > { %1885 = vadd.xlane.f32.xlu1 %v1884_v18  ;;  %v1909_v61 = vadd.f32 %v1908_v30, %v1902_v23 }
 0xedb   : > { %1910 = vadd.xlane.f32.xlu0 %v1909_v61 }
 0xf62   : > { %v1886_v6 = vpop.xlane.xlu1 %1885 }
 0xf63   : > { %v1887_v53 = vrot.slane %v1886_v6, 4 }
 0xf64   : > { %v1911_v1 = vpop.xlane.xlu0 %1910 }
 0xf65   : > { %v1888_v57 = vadd.f32 %v1887_v53, %v1886_v6  ;;  %v1912_v44 = vrot.slane %v1911_v1, 4 }
 0xf67   : > { %v1913_v7 = vadd.f32 %v1912_v44, %v1911_v1  ;;  %v1889_v25 = vrot.slane %v1888_v57, 2 }
 0xf69   : > { %v1890_v40 = vadd.f32 %v1889_v25, %v1888_v57  ;;  %v1914_v12 = vrot.slane %v1913_v7, 2 }
 0xf6b   : > { %v1891_v41 = vrot.slane %v1890_v40, 1  ;;  %v1915_v45 = vadd.f32 %v1914_v12, %v1913_v7 }
 0xf6d   : > { %v1892_v21 = vadd.f32 %v1891_v41, %v1890_v40  ;;  %v1916_v13 = vrot.slane %v1915_v45, 1 }
 0xf6f   : > { %4726 = vpush %v1892_v21  ;;  %v1917_v33 = vadd.f32 %v1916_v13, %v1915_v45 }
 0xf71   : > { %4728 = vpush %v1917_v33 }
 0xfa0   : > { %s4727_s14 = spop %4726 }
 0xfa1   : > { %s1894_s13 = smul.f32 0.00012207031, %s4727_s14 }
 0xfa2   : > { %s4729_s20 = spop %4728 }
 0xfa3   : > { %s1920_s21 = smul.f32 %s1894_s13, %s1894_s13  ;;  %v1932_v35 = vstv %s1894_s13 }
 0xfa4   : > { %s1919_s22 = smul.f32 0.00012207031, %s4729_s20 }
 0xfa6   : > { %s1921_s24 = ssub.f32 %s1919_s22, %s1920_s21 }
 0xfa8   : > { %s1922_s11 = smax.f32 %s4919_s23, %s1921_s24 }
 0xfa9   : > { %s1923_s19 = sadd.f32 1e-05, %s1922_s11 }
 0xfab   : > { %v1924_v4 = vstv %s1923_s19 }
 0xfac   : > { %4791 = vrsqrt.f32 %v1924_v4 }
 0xfb9   : > { %v4792_v11 = vpop.eup %4791 }
 0xfba   : > { %4730 = vpush %v4792_v11 }
 0xfeb   : > { %s4731_s25 = spop %4730 }
 0xfec   : > { %v1927_v56 = vstv %s4731_s25 }
 0xfed   : > { %v1930_v63 = vmul.f32 %v5753_v37, %v1927_v56  ;;  %v1931_v50 = vmul.f32 %v5747_v16, %v1927_v56  ;;  %v1928_v49 = vmul.f32 %v5771_v0, %v1927_v56  ;;  %v1929_v20 = vmul.f32 %v5765_v14, %v1927_v56 }
 0xfef   : > { %v1936_v31 = vmul.f32 %v1932_v35, %v1931_v50  ;;  %1958 = vperm.xlu0 %4783, %v1931_v50   ;;  %1953 = vperm.xlu1 %4784, %v1930_v63   ;;  %v1935_v60 = vmul.f32 %v1932_v35, %v1930_v63  ;;  %v1933_v9 = vmul.f32 %v1932_v35, %v1928_v49 }
 0xff0   : > { %v1934_v23 = vmul.f32 %v1932_v35, %v1929_v20 }
 0xff1   : > { %v1940_v39 = vsub.f32 %v5759_v32, %v1936_v31  ;;  %v1939_v18 = vsub.f32 %v5777_v48, %v1935_v60  ;;  %v1937_v16 = vsub.f32 %v5789_v54, %v1933_v9  ;;  %v4665_v60 = vld [vmem:[%s5308_s27 + $0x3] ss:$8 sm:$0x3] }
 0xff2   : > { %v1938_v37 = vsub.f32 %v5783_v2, %v1934_v23  ;;  %v2090_v9 = vrot.slane %v4665_v60, %v5310_v24 }
 0xff3   : > { %1948 = vperm.xlu0 %4783, %v1929_v20   ;;  %1986 = vperm.xlu1 %4784, %v1940_v39  }
 0xff7   : > { %1943 = vperm.xlu0 %4783, %v1928_v49   ;;  %1981 = vperm.xlu1 %4784, %v1939_v18  }
 0xffb   : > { %1971 = vperm.xlu0 %4783, %v1937_v16   ;;  %1976 = vperm.xlu1 %4784, %v1938_v37   ;;  %v2094_v16 = vrot.slane %v4665_v60, %v5313_v42 }
0x106a   : > { %v1959_v0 = vpop.permute.xlu0 %1958  ;;  %v1954_v30 = vpop.permute.xlu1 %1953 }
0x106b   : > { %v1967_v14 = vmul.f32 %v1959_v0, %v5990_v46  ;;  %v1968_v32 = vmul.f32 %v1959_v0, %v5996_v52  ;;  %v1965_v48 = vmul.f32 %v1954_v30, %v5980_v58  ;;  %v1966_v57 = vmul.f32 %v1954_v30, %v5982_v34 }
0x106e   : > { %v1949_v61 = vpop.permute.xlu0 %1948  ;;  %v1987_v6 = vpop.permute.xlu1 %1986 }
0x106f   : > { %v1995_v53 = vadd.f32 %v1987_v6, %v1967_v14  ;;  %v1996_v1 = vadd.f32 %v1987_v6, %v1968_v32  ;;  %v1963_v45 = vmul.f32 %v1949_v61, %v5967_v22  ;;  %v1964_v21 = vmul.f32 %v1949_v61, %v5973_v51 }
0x1071   : > { %v2003_v44 = vmul.f32 0.01, %v1995_v53  ;;  %v2004_v54 = vmul.f32 0.01, %v1996_v1 }
0x1072   : > { %v1944_v7 = vpop.permute.xlu0 %1943  ;;  %v1982_v2 = vpop.permute.xlu1 %1981 }
0x1073   : > { %v2011_v25 = vmax.f32 %v1995_v53, %v2003_v44  ;;  %v1993_v40 = vadd.f32 %v1982_v2, %v1965_v48  ;;  %v1994_v12 = vadd.f32 %v1982_v2, %v1966_v57  ;;  %v2012_v41 = vmax.f32 %v1996_v1, %v2004_v54 }
0x1074   : > { %v1961_v46 = vmul.f32 %v1944_v7, %v5955_v10  ;;  %v1962_v52 = vmul.f32 %v1944_v7, %v5958_v28  ;;  %v2254_v7 = vmul.f32 0.4, %v5865_v62  ;;  %v2255_v2 = vmul.f32 0.4, %v5873_v29 }
0x1075   : > { %v2001_v13 = vmul.f32 0.01, %v1993_v40  ;;  %v2002_v58 = vmul.f32 0.01, %v1994_v12  ;;  %2037 = vmatprep.subr.mxu1 %v2012_v41 }
0x1076   : > { %v1972_v34 = vpop.permute.xlu0 %1971  ;;  %2038 = vmatpush1.msra.mxu1 %v2011_v25  ;;  %v1977_v33 = vpop.permute.xlu1 %1976  ;;  %v2256_v25 = vmul.f32 0.4, %v5879_v59 }
0x1077   : > { %v1989_v4 = vadd.f32 %v1972_v34, %v1961_v46  ;;  %v1990_v11 = vadd.f32 %v1972_v34, %v1962_v52  ;;  %v2009_v56 = vmax.f32 %v1993_v40, %v2001_v13  ;;  %v1991_v63 = vadd.f32 %v1977_v33, %v1963_v45 }
0x1078   : > { %v1992_v50 = vadd.f32 %v1977_v33, %v1964_v21  ;;  %v2010_v35 = vmax.f32 %v1994_v12, %v2002_v58  ;;  %v2257_v40 = vmul.f32 0.4, %v5885_v43 }
0x1079   : > { %v1999_v31 = vmul.f32 0.01, %v1991_v63  ;;  %v1998_v28 = vmul.f32 0.01, %v1990_v11  ;;  %v1997_v22 = vmul.f32 0.01, %v1989_v4 }
0x107a   : > { %v2000_v10 = vmul.f32 0.01, %v1992_v50  ;;  %2039 = vmatprep.subr.mxu1 %v2010_v35 }
0x107b   : > { %2040 = vmatpush1.msra.mxu1 %v2009_v56  ;;  %v2007_v51 = vmax.f32 %v1991_v63, %v1999_v31  ;;  %v2006_v20 = vmax.f32 %v1990_v11, %v1998_v28  ;;  %v2005_v39 = vmax.f32 %v1989_v4, %v1997_v22 }
0x107c   : > { %v2008_v49 = vmax.f32 %v1992_v50, %v2000_v10 }
0x107e   : > { %2041 = vmatprep.subr.mxu1 %v2008_v49 }
0x107f   : > { %2042 = vmatpush1.msra.mxu1 %v2007_v51 }
0x1080   : > { %2043 = vmatprep.subr.mxu1 %v2006_v20 }
0x1081   : > { %2044 = vmatpush1.msra.mxu1 %v2005_v39 }
0x1082   : > { %4664 = vmatmul.mubr.msk.f32.vlgmr.msra.gmra.mxu1 %vm782_vm11, %v5803_v5 }
0x1083   : > { %2485 = vmatprep.mubr.f32.mxu1 %v4917_v19 }
0x1142   : > { %v2079_v23 = vpop.f32.mrf.mxu1 }
0x1143   : > { %v2080_v18 = vadd.f32 %v2079_v23, %v5316_v47 }
0x1144   : > { %v2081_v37 = vpop.f32.mrf.mxu1 }
0x1145   : > { %v2097_v0 = vmul.f32 %v2090_v9, %v2080_v18  ;;  %v2082_v30 = vadd.f32 %v2081_v37, %v5316_v47 }
0x1147   : > { %v6028_v14 = vadd.f32 %v2097_v0, %v5814_v55  ;;  %v2098_v32 = vmul.f32 %v2094_v16, %v2082_v30 }
0x1149   : > { %v6031_v5 = vadd.f32 %v2098_v32, %v5817_v15  ;;  %2101 = vrot.lane.b32.xlu1 %v6028_v14, %s4914_s16  ;;  %v6134_v32 = vld [vmem:[%s7502_s3] sm:$0xff] }
0x114b   : > { %2103 = vrot.lane.b32.xlu0 %v6031_v5, %s4914_s16 }
0x114d   : > { %2107 = vrot.lane.b32.xlu1 %v6028_v14, %s4913_s15 }
0x114f   : > { %2109 = vrot.lane.b32.xlu0 %v6031_v5, %s4913_s15 }
0x1151   : > { %2133 = vrot.lane.b32.xlu1 %v6028_v14, %s4915_s17 }
0x1153   : > { %2135 = vrot.lane.b32.xlu0 %v6031_v5, %s4915_s17 }
0x11bb   : > { %v2102_v55 = vpop.permute.xlu1 %2101 }
0x11bd   : > { %v2104_v15 = vpop.permute.xlu0 %2103 }
0x11be   : > { %v6047_v53 = vsel %vm454_vm1, %v2102_v55, %v2104_v15  ;;  %v2106_v44 = vsel %vm454_vm1, %v2104_v15, %v2102_v55  ;;  %v6142_v55 = vld [vmem:[%s7502_s3 + $0x8] sm:$0xff]  ;;  %v6150_v15 = vld [vmem:[%s7502_s3 + $0x10] sm:$0xff] }
0x11bf   : > { %v2108_v61 = vpop.permute.xlu1 %2107 }
0x11c1   : > { %v2110_v6 = vpop.permute.xlu0 %2109 }
0x11c2   : > { %v2112_v1 = vsel %vm461_vm0, %v2110_v6, %v2108_v61  ;;  %v2111_v48 = vsel %vm461_vm0, %v2108_v61, %v2110_v6  ;;  %v6158_v61 = vld [vmem:[%s7502_s3 + $0x18] sm:$0xff] }
0x11c3   : > { %2149 = vrot.lane.b32.xlu1 %v2111_v48, %s4915_s17  ;;  %v2116_v57 = vsel %vm5008_vm2, %v6047_v53, %v2112_v1  ;;  %v2113_v54 = vsel %vm5032_vm3, %v2111_v48, %v2106_v44  ;;  %v2134_v12 = vpop.permute.xlu1 %2133 }
0x11c4   : > { %2151 = vrot.lane.b32.xlu0 %v2116_v57, %s4915_s17 }
0x11c5   : > { %v2136_v41 = vpop.permute.xlu0 %2135 }
0x11c6   : > { %v2137_v63 = vsel %vm472_vm7, %v2134_v12, %v2136_v41  ;;  %v2138_v31 = vsel %vm472_vm7, %v2136_v41, %v2134_v12 }
0x11c7   : > { %2155 = vrot.lane.b32.xlu1 %v2111_v48, %s4916_s18 }
0x11c8   : > { %2157 = vrot.lane.b32.xlu0 %v2116_v57, %s4916_s18 }
0x11cb   : > { %2139 = vrot.lane.b32.xlu1 %v6028_v14, %s4916_s18 }
0x11cc   : > { %2141 = vrot.lane.b32.xlu0 %v6031_v5, %s4916_s18 }
0x11cf   : > { %2117 = vrot.lane.b32.xlu1 %v2113_v54, %s4915_s17 }
0x11d0   : > { %2119 = vrot.lane.b32.xlu0 %v6047_v53, %s4915_s17 }
0x11d3   : > { %2123 = vrot.lane.b32.xlu1 %v2113_v54, %s4916_s18 }
0x11d4   : > { %2125 = vrot.lane.b32.xlu0 %v6047_v53, %s4916_s18 }
0x11d7   : > { %2260 = vperm.xlu1 %4784, %v2254_v7  }
0x11d8   : > { %2265 = vperm.xlu0 %4783, %v2255_v2  }
0x11db   : > { %2270 = vperm.xlu1 %4784, %v2256_v25  }
0x11dc   : > { %2275 = vperm.xlu0 %4783, %v2257_v40   ;;  %v6176_v40 = vld [vmem:[%s5161_s12 + $0x10] sm:$0xff] }
0x1235   : > { %v2150_v46 = vpop.permute.xlu1 %2149 }
0x1236   : > { %v2152_v52 = vpop.permute.xlu0 %2151 }
0x1237   : > { %v2153_v62 = vsel %vm472_vm7, %v2150_v46, %v2152_v52  ;;  %v2154_v29 = vsel %vm472_vm7, %v2152_v52, %v2150_v46 }
0x1239   : > { %v2156_v45 = vpop.permute.xlu1 %2155 }
0x123a   : > { %v2158_v21 = vpop.permute.xlu0 %2157 }
0x123b   : > { %v2159_v59 = vsel %vm479_vm4, %v2156_v45, %v2158_v21  ;;  %v2160_v43 = vsel %vm479_vm4, %v2158_v21, %v2156_v45 }
0x123c   : > { %v2164_v13 = vsel %vm5058_vm6, %v2153_v62, %v2160_v43  ;;  %v2163_v58 = vsel %vm5054_vm5, %v2154_v29, %v2159_v59  ;;  %v2162_v56 = vsel %vm5075_vm8, %v2160_v43, %v2153_v62  ;;  %v2161_v35 = vsel %vm5079_vm9, %v2159_v59, %v2154_v29  ;;  %v6188_v29 = vld [vmem:[%s5161_s12 + $0x18] sm:$0xff] }
0x123d   : > { %2177 = vmatprep.subr.mxu0 %v2164_v13  ;;  %v2140_v34 = vpop.permute.xlu1 %2139 }
0x123e   : > { %v2142_v33 = vpop.permute.xlu0 %2141  ;;  %2178 = vmatpush1.msra.mxu0 %v2163_v58 }
0x123f   : > { %v2144_v4 = vsel %vm479_vm4, %v2142_v33, %v2140_v34  ;;  %2179 = vmatprep.subr.mxu0 %v2116_v57  ;;  %v2143_v11 = vsel %vm479_vm4, %v2140_v34, %v2142_v33 }
0x1240   : > { %2180 = vmatpush1.msra.mxu0 %v2111_v48  ;;  %v2148_v28 = vsel %vm5058_vm6, %v2137_v63, %v2144_v4  ;;  %v2147_v22 = vsel %vm5054_vm5, %v2138_v31, %v2143_v11  ;;  %v2146_v20 = vsel %vm5075_vm8, %v2144_v4, %v2137_v63  ;;  %v2145_v39 = vsel %vm5079_vm9, %v2143_v11, %v2138_v31  ;;  %v6197_v4 = vld [vmem:[%s5161_s12 + $0x20] sm:$0xff] }
0x1241   : > { %2181 = vmatprep.subr.mxu0 %v2162_v56  ;;  %v2118_v50 = vpop.permute.xlu1 %2117 }
0x1242   : > { %v2120_v10 = vpop.permute.xlu0 %2119  ;;  %2182 = vmatpush1.msra.mxu0 %v2161_v35 }
0x1243   : > { %2183 = vmatprep.subr.mxu0 %v2148_v28  ;;  %v2121_v60 = vsel %vm472_vm7, %v2118_v50, %v2120_v10  ;;  %v2122_v9 = vsel %vm472_vm7, %v2120_v10, %v2118_v50  ;;  %v6204_v10 = vld [vmem:[%s5161_s12 + $0x28] sm:$0xff] }
0x1244   : > { %2184 = vmatpush1.msra.mxu0 %v2147_v22 }
0x1245   : > { %2185 = vmatprep.subr.mxu0 %v6031_v5  ;;  %v2124_v51 = vpop.permute.xlu1 %2123 }
0x1246   : > { %v2126_v49 = vpop.permute.xlu0 %2125  ;;  %2186 = vmatpush1.msra.mxu0 %v6028_v14 }
0x1247   : > { %v2127_v23 = vsel %vm479_vm4, %v2124_v51, %v2126_v49  ;;  %v2128_v18 = vsel %vm479_vm4, %v2126_v49, %v2124_v51  ;;  %2187 = vmatprep.subr.mxu0 %v2146_v20 }
0x1248   : > { %2188 = vmatpush1.msra.mxu0 %v2145_v39  ;;  %v2132_v16 = vsel %vm5058_vm6, %v2121_v60, %v2128_v18  ;;  %v2131_v37 = vsel %vm5054_vm5, %v2122_v9, %v2127_v23  ;;  %v2130_v0 = vsel %vm5075_vm8, %v2128_v18, %v2121_v60  ;;  %v2129_v30 = vsel %vm5079_vm9, %v2127_v23, %v2122_v9  ;;  %v6212_v39 = vld [vmem:[%s5161_s12 + $0x30] sm:$0xff] }
0x1249   : > { %2189 = vmatprep.subr.mxu0 %v2132_v16 }
0x124a   : > { %2190 = vmatpush1.msra.mxu0 %v2131_v37 }
0x124b   : > { %2191 = vmatprep.subr.mxu0 %v6047_v53  ;;  %v6164_v53 = vld [vmem:[%s5161_s12] sm:$0xff] }
0x124c   : > { %2192 = vmatpush1.msra.mxu0 %v2113_v54  ;;  %v6170_v54 = vld [vmem:[%s5161_s12 + $0x8] sm:$0xff] }
0x124d   : > { %2193 = vmatprep.subr.mxu0 %v2130_v0 }
0x124e   : > { %2194 = vmatpush1.msra.mxu0 %v2129_v30  ;;  %v6223_v30 = vld [vmem:[%s5161_s12 + $0x38] sm:$0xff] }
0x124f   : > { %2195 = vmatprep.subr.mxu0 %v6031_v5 }
0x1250   : > { %2196 = vmatpush1.msra.mxu0 %v6028_v14 }
0x1251   : > { %4666 = vmatmul.mubr.msk.f32.vlgmr.msra.gmra.mxu0 %vm530_vm10, %v6134_v32 }
0x1252   : > { %2235 = vmatprep.mubr.f32.mxu0 %v4917_v19  ;;  %v2261_v48 = vpop.permute.xlu1 %2260 }
0x1253   : > { %v2266_v41 = vpop.permute.xlu0 %2265 }
0x1255   : > { %4667 = vmatmul.mubr.msk.f32.gmra.mxu0 %vm530_vm10, %v6142_v55 }
0x1256   : > { %2241 = vmatprep.mubr.f32.mxu0 %v4917_v19  ;;  %v2271_v63 = vpop.permute.xlu1 %2270 }
0x1257   : > { %v2276_v9 = vpop.permute.xlu0 %2275 }
0x1259   : > { %4668 = vmatmul.mubr.msk.f32.gmra.mxu0 %vm530_vm10, %v6150_v15 }
0x125a   : > { %2247 = vmatprep.mubr.f32.mxu0 %v4917_v19 }
0x125d   : > { %4669 = vmatmul.mubr.msk.f32.gmra.mxu0 %vm530_vm10, %v6158_v61 }
0x125e   : > { %2893 = vmatprep.mubr.f32.mxu0 %v4917_v19 }
0x1311   : > { %v2231_v6 = vpop.f32.mrf.mxu0 }
0x1312   : > { %v2232_v1 = vadd.f32 %v6164_v53, %v2231_v6 }
0x1313   : > { %v2233_v57 = vpop.f32.mrf.mxu0 }
0x1314   : > { %v6167_v44 = vadd.f32 %v2261_v48, %v2232_v1  ;;  %v2234_v7 = vadd.f32 %v6170_v54, %v2233_v57 }
0x1315   : > { %v2237_v2 = vpop.f32.mrf.mxu0 }
0x1316   : > { %v6173_v25 = vadd.f32 %v2261_v48, %v2234_v7  ;;  %v2238_v12 = vadd.f32 %v6176_v40, %v2237_v2  ;;  %v2303_v46 = vmul.f32 %v6167_v44, %v6167_v44 }
0x1317   : > { %v2239_v52 = vpop.f32.mrf.mxu0 }
0x1318   : > { %v2286_v45 = vadd.f32 %v6173_v25, %v6167_v44  ;;  %v2304_v21 = vmul.f32 %v6173_v25, %v6173_v25  ;;  %v6185_v62 = vadd.f32 %v2266_v41, %v2238_v12  ;;  %v2240_v59 = vadd.f32 %v6188_v29, %v2239_v52 }
0x1319   : > { %v2243_v43 = vpop.f32.mrf.mxu0 }
0x131a   : > { %v2311_v13 = vadd.f32 %v2304_v21, %v2303_v46  ;;  %v2287_v58 = vadd.f32 %v2286_v45, %v6185_v62  ;;  %v2305_v34 = vmul.f32 %v6185_v62, %v6185_v62  ;;  %v6194_v33 = vadd.f32 %v2266_v41, %v2240_v59 }
0x131b   : > { %v2244_v11 = vadd.f32 %v6197_v4, %v2243_v43  ;;  %v2245_v56 = vpop.f32.mrf.mxu0 }
0x131c   : > { %v2312_v50 = vadd.f32 %v2311_v13, %v2305_v34  ;;  %v2288_v35 = vadd.f32 %v2287_v58, %v6194_v33  ;;  %v2306_v31 = vmul.f32 %v6194_v33, %v6194_v33  ;;  %v2246_v28 = vadd.f32 %v6204_v10, %v2245_v56 }
0x131d   : > { %v6207_v22 = vadd.f32 %v2271_v63, %v2244_v11  ;;  %v2249_v51 = vpop.f32.mrf.mxu0 }
0x131e   : > { %v2313_v49 = vadd.f32 %v2312_v50, %v2306_v31  ;;  %v6209_v20 = vadd.f32 %v2271_v63, %v2246_v28  ;;  %v2250_v60 = vadd.f32 %v6212_v39, %v2249_v51 }
0x131f   : > { %v2289_v23 = vadd.f32 %v2288_v35, %v6207_v22  ;;  %v2307_v18 = vmul.f32 %v6207_v22, %v6207_v22  ;;  %v2251_v16 = vpop.f32.mrf.mxu0 }
0x1320   : > { %v2308_v37 = vmul.f32 %v6209_v20, %v6209_v20  ;;  %v6220_v0 = vadd.f32 %v2276_v9, %v2250_v60  ;;  %v2252_v6 = vadd.f32 %v6223_v30, %v2251_v16  ;;  %v6245_v16 = vld [vmem:[%s7504_s5 + $0x18] sm:$0xff] }
0x1321   : > { %v2314_v1 = vadd.f32 %v2313_v49, %v2307_v18  ;;  %v2290_v48 = vadd.f32 %v2289_v23, %v6209_v20  ;;  %v6239_v23 = vld [vmem:[%s7504_s5 + $0x10] sm:$0xff] }
0x1322   : > { %v2309_v57 = vmul.f32 %v6220_v0, %v6220_v0  ;;  %v6229_v7 = vadd.f32 %v2276_v9, %v2252_v6 }
0x1323   : > { %v2291_v2 = vadd.f32 %v2290_v48, %v6220_v0  ;;  %v2315_v12 = vadd.f32 %v2314_v1, %v2308_v37  ;;  %v6251_v48 = vld [vmem:[%s7504_s5] sm:$0xff] }
0x1324   : > { %v2310_v41 = vmul.f32 %v6229_v7, %v6229_v7 }
0x1325   : > { %v2292_v46 = vadd.f32 %v2291_v2, %v6229_v7  ;;  %v2316_v52 = vadd.f32 %v2315_v12, %v2309_v57  ;;  %v6257_v2 = vld [vmem:[%s7504_s5 + $0x8] sm:$0xff] }
0x1327   : > { %2293 = vadd.xlane.f32.xlu1 %v2292_v46  ;;  %v2317_v45 = vadd.f32 %v2316_v52, %v2310_v41  ;;  %v6263_v41 = vld [vmem:[%s7505_s6 + $0x18] sm:$0xff] }
0x1329   : > { %2318 = vadd.xlane.f32.xlu0 %v2317_v45 }
0x13b0   : > { %v2294_v21 = vpop.xlane.xlu1 %2293 }
0x13b1   : > { %v2295_v59 = vrot.slane %v2294_v21, 4 }
0x13b2   : > { %v2319_v43 = vpop.xlane.xlu0 %2318 }
0x13b3   : > { %v2296_v13 = vadd.f32 %v2295_v59, %v2294_v21  ;;  %v2320_v58 = vrot.slane %v2319_v43, 4  ;;  %v6269_v59 = vld [vmem:[%s7505_s6 + $0x10] sm:$0xff] }
0x13b5   : > { %v2321_v34 = vadd.f32 %v2320_v58, %v2319_v43  ;;  %v2297_v11 = vrot.slane %v2296_v13, 2 }
0x13b7   : > { %v2298_v56 = vadd.f32 %v2297_v11, %v2296_v13  ;;  %v2322_v63 = vrot.slane %v2321_v34, 2  ;;  %v6275_v13 = vld [vmem:[%s7505_s6] sm:$0xff] }
0x13b9   : > { %v2299_v50 = vrot.slane %v2298_v56, 1  ;;  %v2323_v35 = vadd.f32 %v2322_v63, %v2321_v34  ;;  %v6281_v34 = vld [vmem:[%s7505_s6 + $0x8] sm:$0xff] }
0x13bb   : > { %v2300_v31 = vadd.f32 %v2299_v50, %v2298_v56  ;;  %v2324_v28 = vrot.slane %v2323_v35, 1 }
0x13bd   : > { %4732 = vpush %v2300_v31  ;;  %v2325_v51 = vadd.f32 %v2324_v28, %v2323_v35 }
0x13bf   : > { %4734 = vpush %v2325_v51 }
0x13ee   : > { %s4733_s24 = spop %4732 }
0x13ef   : > { %s2302_s11 = smul.f32 0.00012207031, %s4733_s24 }
0x13f0   : > { %s4735_s19 = spop %4734 }
0x13f1   : > { %s2328_s25 = smul.f32 %s2302_s11, %s2302_s11  ;;  %v2340_v6 = vstv %s2302_s11 }
0x13f2   : > { %s2327_s26 = smul.f32 0.00012207031, %s4735_s19 }
0x13f4   : > { %s2329_s28 = ssub.f32 %s2327_s26, %s2328_s25 }
0x13f6   : > { %s2330_s29 = smax.f32 %s4919_s23, %s2329_s28 }
0x13f7   : > { %s2331_s14 = sadd.f32 1e-05, %s2330_s29 }
0x13f9   : > { %v2332_v49 = vstv %s2331_s14 }
0x13fa   : > { %4793 = vrsqrt.f32 %v2332_v49 }
0x1407   : > { %v4794_v60 = vpop.eup %4793 }
0x1408   : > { %4736 = vpush %v4794_v60 }
0x1439   : > { %s4737_s13 = spop %4736 }
0x143a   : > { %v2335_v9 = vstv %s4737_s13 }
0x143b   : > { %v2338_v18 = vmul.f32 %v6239_v23, %v2335_v9  ;;  %v2339_v37 = vmul.f32 %v6245_v16, %v2335_v9  ;;  %v2336_v57 = vmul.f32 %v6251_v48, %v2335_v9  ;;  %v2337_v12 = vmul.f32 %v6257_v2, %v2335_v9 }
0x143d   : > { %v2344_v1 = vmul.f32 %v2340_v6, %v2339_v37  ;;  %2366 = vperm.xlu0 %4783, %v2339_v37   ;;  %2361 = vperm.xlu1 %4784, %v2338_v18   ;;  %v2343_v52 = vmul.f32 %v2340_v6, %v2338_v18  ;;  %v2341_v45 = vmul.f32 %v2340_v6, %v2336_v57 }
0x143e   : > { %v2342_v21 = vmul.f32 %v2340_v6, %v2337_v12 }
0x143f   : > { %v2348_v46 = vsub.f32 %v6263_v41, %v2344_v1  ;;  %v2347_v43 = vsub.f32 %v6269_v59, %v2343_v52  ;;  %v2345_v58 = vsub.f32 %v6275_v13, %v2341_v45 }
0x1440   : > { %v2346_v11 = vsub.f32 %v6281_v34, %v2342_v21 }
0x1441   : > { %2356 = vperm.xlu0 %4783, %v2337_v12   ;;  %2394 = vperm.xlu1 %4784, %v2348_v46  }
0x1445   : > { %2351 = vperm.xlu0 %4783, %v2336_v57   ;;  %2389 = vperm.xlu1 %4784, %v2347_v43  }
0x1449   : > { %2379 = vperm.xlu0 %4783, %v2345_v58   ;;  %2384 = vperm.xlu1 %4784, %v2346_v11  }
0x14b8   : > { %v2367_v56 = vpop.permute.xlu0 %2366  ;;  %v2362_v63 = vpop.permute.xlu1 %2361 }
0x14b9   : > { %v2375_v50 = vmul.f32 %v2367_v56, %v6220_v0  ;;  %v2376_v35 = vmul.f32 %v2367_v56, %v6229_v7  ;;  %v2373_v60 = vmul.f32 %v2362_v63, %v6207_v22  ;;  %v2374_v9 = vmul.f32 %v2362_v63, %v6209_v20 }
0x14bc   : > { %v2357_v31 = vpop.permute.xlu0 %2356  ;;  %v2395_v28 = vpop.permute.xlu1 %2394 }
0x14bd   : > { %v2403_v51 = vadd.f32 %v2395_v28, %v2375_v50  ;;  %v2404_v49 = vadd.f32 %v2395_v28, %v2376_v35  ;;  %v2371_v45 = vmul.f32 %v2357_v31, %v6185_v62  ;;  %v2372_v21 = vmul.f32 %v2357_v31, %v6194_v33 }
0x14bf   : > { %v2411_v18 = vmul.f32 0.01, %v2403_v51  ;;  %v2412_v37 = vmul.f32 0.01, %v2404_v49 }
0x14c0   : > { %v2352_v6 = vpop.permute.xlu0 %2351  ;;  %v2390_v1 = vpop.permute.xlu1 %2389 }
0x14c1   : > { %v2419_v57 = vmax.f32 %v2403_v51, %v2411_v18  ;;  %v2401_v12 = vadd.f32 %v2390_v1, %v2373_v60  ;;  %v2402_v46 = vadd.f32 %v2390_v1, %v2374_v9  ;;  %v2420_v52 = vmax.f32 %v2404_v49, %v2412_v37  ;;  %v6295_v9 = vld [vmem:[%s7506_s7] sm:$0xff] }
0x14c2   : > { %v2369_v0 = vmul.f32 %v2352_v6, %v6167_v44  ;;  %v2370_v7 = vmul.f32 %v2352_v6, %v6173_v25  ;;  %v4671_v18 = vld [vmem:[%s5308_s27 + $0x4] ss:$8 sm:$0x3] }
0x14c3   : > { %v2409_v43 = vmul.f32 0.01, %v2401_v12  ;;  %v2410_v22 = vmul.f32 0.01, %v2402_v46  ;;  %2445 = vmatprep.subr.mxu1 %v2420_v52  ;;  %v2498_v37 = vrot.slane %v4671_v18, %v5310_v24 }
0x14c4   : > { %v2380_v20 = vpop.permute.xlu0 %2379  ;;  %2446 = vmatpush1.msra.mxu1 %v2419_v57  ;;  %v2385_v58 = vpop.permute.xlu1 %2384  ;;  %v2502_v57 = vrot.slane %v4671_v18, %v5313_v42 }
0x14c5   : > { %v2397_v11 = vadd.f32 %v2380_v20, %v2369_v0  ;;  %v2398_v56 = vadd.f32 %v2380_v20, %v2370_v7  ;;  %v2417_v63 = vmax.f32 %v2401_v12, %v2409_v43  ;;  %v2399_v50 = vadd.f32 %v2385_v58, %v2371_v45 }
0x14c6   : > { %v2400_v35 = vadd.f32 %v2385_v58, %v2372_v21  ;;  %v2418_v28 = vmax.f32 %v2402_v46, %v2410_v22 }
0x14c7   : > { %v2407_v51 = vmul.f32 0.01, %v2399_v50  ;;  %v2406_v25 = vmul.f32 0.01, %v2398_v56  ;;  %v2405_v62 = vmul.f32 0.01, %v2397_v11 }
0x14c8   : > { %v2408_v44 = vmul.f32 0.01, %v2400_v35  ;;  %2447 = vmatprep.subr.mxu1 %v2418_v28  ;;  %v6365_v28 = vld [vmem:[%s7503_s4 + $0x8] sm:$0xff] }
0x14c9   : > { %2448 = vmatpush1.msra.mxu1 %v2417_v63  ;;  %v2415_v33 = vmax.f32 %v2399_v50, %v2407_v51  ;;  %v2414_v49 = vmax.f32 %v2398_v56, %v2406_v25  ;;  %v2413_v60 = vmax.f32 %v2397_v11, %v2405_v62  ;;  %v6357_v50 = vld [vmem:[%s7503_s4] sm:$0xff]  ;;  %v2663_v51 = vmul.f32 0.5, %v6365_v28  ;;  %v6377_v62 = vld [vmem:[%s7503_s4 + $0x18] sm:$0xff] }
0x14ca   : > { %v2416_v31 = vmax.f32 %v2400_v35, %v2408_v44  ;;  %v2662_v35 = vmul.f32 0.5, %v6357_v50  ;;  %v6371_v44 = vld [vmem:[%s7503_s4 + $0x10] sm:$0xff] }
0x14cb   : > { %v2664_v25 = vmul.f32 0.5, %v6371_v44 }
0x14cc   : > { %2449 = vmatprep.subr.mxu1 %v2416_v31 }
0x14cd   : > { %2450 = vmatpush1.msra.mxu1 %v2415_v33  ;;  %v2665_v33 = vmul.f32 0.5, %v6377_v62 }
0x14ce   : > { %2451 = vmatprep.subr.mxu1 %v2414_v49 }
0x14cf   : > { %2452 = vmatpush1.msra.mxu1 %v2413_v60 }
0x14d0   : > { %4670 = vmatmul.mubr.msk.f32.vlgmr.msra.gmra.mxu1 %vm782_vm11, %v6295_v9 }
0x14d1   : > { %2637 = vmatprep.mubr.f32.mxu1 %v4917_v19 }
0x1590   : > { %v2487_v6 = vpop.f32.mrf.mxu1 }
0x1591   : > { %v2488_v1 = vadd.f32 %v2487_v6, %v5316_v47 }
0x1592   : > { %v2489_v12 = vpop.f32.mrf.mxu1 }
0x1593   : > { %v2505_v46 = vmul.f32 %v2498_v37, %v2488_v1  ;;  %v2490_v52 = vadd.f32 %v2489_v12, %v5316_v47 }
0x1595   : > { %v6306_v0 = vadd.f32 %v2505_v46, %v6028_v14  ;;  %v2506_v7 = vmul.f32 %v2502_v57, %v2490_v52 }
0x1597   : > { %v6309_v45 = vadd.f32 %v2506_v7, %v6031_v5  ;;  %2509 = vrot.lane.b32.xlu1 %v6306_v0, %s4914_s16 }
0x1599   : > { %2511 = vrot.lane.b32.xlu0 %v6309_v45, %s4914_s16 }
0x159b   : > { %2515 = vrot.lane.b32.xlu1 %v6306_v0, %s4913_s15 }
0x159d   : > { %2517 = vrot.lane.b32.xlu0 %v6309_v45, %s4913_s15 }
0x159f   : > { %2541 = vrot.lane.b32.xlu1 %v6306_v0, %s4915_s17 }
0x15a1   : > { %2543 = vrot.lane.b32.xlu0 %v6309_v45, %s4915_s17 }
0x1609   : > { %v2510_v14 = vpop.permute.xlu1 %2509 }
0x160b   : > { %v2512_v5 = vpop.permute.xlu0 %2511 }
0x160c   : > { %v6325_v22 = vsel %vm454_vm1, %v2510_v14, %v2512_v5  ;;  %v2514_v56 = vsel %vm454_vm1, %v2512_v5, %v2510_v14 }
0x160d   : > { %v2516_v21 = vpop.permute.xlu1 %2515 }
0x160f   : > { %v2518_v43 = vpop.permute.xlu0 %2517 }
0x1610   : > { %v2520_v20 = vsel %vm461_vm0, %v2518_v43, %v2516_v21  ;;  %v2519_v58 = vsel %vm461_vm0, %v2516_v21, %v2518_v43 }
0x1611   : > { %2557 = vrot.lane.b32.xlu1 %v2519_v58, %s4915_s17  ;;  %v2524_v11 = vsel %vm5008_vm2, %v6325_v22, %v2520_v20  ;;  %v6346_v63 = vsel %vm5032_vm3, %v2519_v58, %v2514_v56  ;;  %v2542_v31 = vpop.permute.xlu1 %2541 }
0x1612   : > { %2559 = vrot.lane.b32.xlu0 %v2524_v11, %s4915_s17 }
0x1613   : > { %v2544_v49 = vpop.permute.xlu0 %2543 }
0x1614   : > { %v2545_v56 = vsel %vm472_vm7, %v2542_v31, %v2544_v49 }
0x1615   : > { %2563 = vrot.lane.b32.xlu1 %v2519_v58, %s4916_s18 }
0x1616   : > { %2565 = vrot.lane.b32.xlu0 %v2524_v11, %s4916_s18 }
0x1619   : > { %2547 = vrot.lane.b32.xlu1 %v6306_v0, %s4916_s18 }
0x161a   : > { %2549 = vrot.lane.b32.xlu0 %v6309_v45, %s4916_s18 }
0x161d   : > { %2525 = vrot.lane.b32.xlu1 %v6346_v63, %s4915_s17 }
0x161e   : > { %2527 = vrot.lane.b32.xlu0 %v6325_v22, %s4915_s17 }
0x1621   : > { %2531 = vrot.lane.b32.xlu1 %v6346_v63, %s4916_s18 }
0x1622   : > { %2533 = vrot.lane.b32.xlu0 %v6325_v22, %s4916_s18 }
0x1625   : > { %2668 = vperm.xlu1 %4784, %v2662_v35  }
0x1626   : > { %2673 = vperm.xlu0 %4783, %v2663_v51  }
0x1629   : > { %2678 = vperm.xlu1 %4784, %v2664_v25   ;;  %v2546_v25 = vsel %vm472_vm7, %v2544_v49, %v2542_v31 }
0x162a   : > { %2683 = vperm.xlu0 %4783, %v2665_v33  }
0x1683   : > { %v2558_v60 = vpop.permute.xlu1 %2557 }
0x1684   : > { %v2560_v18 = vpop.permute.xlu0 %2559 }
0x1685   : > { %v2561_v1 = vsel %vm472_vm7, %v2558_v60, %v2560_v18  ;;  %v2562_v57 = vsel %vm472_vm7, %v2560_v18, %v2558_v60 }
0x1687   : > { %v2564_v37 = vpop.permute.xlu1 %2563 }
0x1688   : > { %v2566_v6 = vpop.permute.xlu0 %2565 }
0x1689   : > { %v2567_v12 = vsel %vm479_vm4, %v2564_v37, %v2566_v6  ;;  %v2568_v46 = vsel %vm479_vm4, %v2566_v6, %v2564_v37 }
0x168a   : > { %v2572_v52 = vsel %vm5058_vm6, %v2561_v1, %v2568_v46  ;;  %v2571_v7 = vsel %vm5054_vm5, %v2562_v57, %v2567_v12  ;;  %v2570_v20 = vsel %vm5075_vm8, %v2568_v46, %v2561_v1  ;;  %v2569_v51 = vsel %vm5079_vm9, %v2567_v12, %v2562_v57 }
0x168b   : > { %2585 = vmatprep.subr.mxu1 %v2572_v52  ;;  %v2548_v14 = vpop.permute.xlu1 %2547 }
0x168c   : > { %v2550_v5 = vpop.permute.xlu0 %2549  ;;  %2586 = vmatpush1.msra.mxu1 %v2571_v7 }
0x168d   : > { %v2552_v21 = vsel %vm479_vm4, %v2550_v5, %v2548_v14  ;;  %2587 = vmatprep.subr.mxu1 %v2524_v11  ;;  %v2551_v43 = vsel %vm479_vm4, %v2548_v14, %v2550_v5 }
0x168e   : > { %2588 = vmatpush1.msra.mxu1 %v2519_v58  ;;  %v2556_v11 = vsel %vm5058_vm6, %v2545_v56, %v2552_v21  ;;  %v2555_v58 = vsel %vm5054_vm5, %v2546_v25, %v2551_v43  ;;  %v2554_v37 = vsel %vm5075_vm8, %v2552_v21, %v2545_v56  ;;  %v2553_v31 = vsel %vm5079_vm9, %v2551_v43, %v2546_v25 }
0x168f   : > { %2589 = vmatprep.subr.mxu1 %v2570_v20  ;;  %v2526_v35 = vpop.permute.xlu1 %2525 }
0x1690   : > { %v2528_v33 = vpop.permute.xlu0 %2527  ;;  %2590 = vmatpush1.msra.mxu1 %v2569_v51 }
0x1691   : > { %2591 = vmatprep.subr.mxu1 %v2556_v11  ;;  %v2529_v49 = vsel %vm472_vm7, %v2526_v35, %v2528_v33  ;;  %v2530_v6 = vsel %vm472_vm7, %v2528_v33, %v2526_v35 }
0x1692   : > { %2592 = vmatpush1.msra.mxu1 %v2555_v58 }
0x1693   : > { %2593 = vmatprep.subr.mxu1 %v6309_v45  ;;  %v2532_v60 = vpop.permute.xlu1 %2531 }
0x1694   : > { %v2534_v18 = vpop.permute.xlu0 %2533  ;;  %2594 = vmatpush1.msra.mxu1 %v6306_v0 }
0x1695   : > { %v2535_v1 = vsel %vm479_vm4, %v2532_v60, %v2534_v18  ;;  %v2536_v57 = vsel %vm479_vm4, %v2534_v18, %v2532_v60  ;;  %2595 = vmatprep.subr.mxu1 %v2554_v37 }
0x1696   : > { %2596 = vmatpush1.msra.mxu1 %v2553_v31  ;;  %v2540_v12 = vsel %vm5058_vm6, %v2529_v49, %v2536_v57  ;;  %v2539_v46 = vsel %vm5054_vm5, %v2530_v6, %v2535_v1  ;;  %v2538_v52 = vsel %vm5075_vm8, %v2536_v57, %v2529_v49  ;;  %v2537_v7 = vsel %vm5079_vm9, %v2535_v1, %v2530_v6 }
0x1697   : > { %2597 = vmatprep.subr.mxu1 %v2540_v12 }
0x1698   : > { %2598 = vmatpush1.msra.mxu1 %v2539_v46 }
0x1699   : > { %2599 = vmatprep.subr.mxu1 %v6325_v22 }
0x169a   : > { %2600 = vmatpush1.msra.mxu1 %v6346_v63 }
0x169b   : > { %2601 = vmatprep.subr.mxu1 %v2538_v52 }
0x169c   : > { %2602 = vmatpush1.msra.mxu1 %v2537_v7 }
0x169d   : > { %2603 = vmatprep.subr.mxu1 %v6309_v45 }
0x169e   : > { %2604 = vmatpush1.msra.mxu1 %v6306_v0 }
0x169f   : > { %4672 = vmatmul.mubr.msk.f32.vlgmr.msra.gmra.mxu1 %vm530_vm10, %v6134_v32 }
0x16a0   : > { %2643 = vmatprep.mubr.f32.mxu1 %v4917_v19  ;;  %v2669_v63 = vpop.permute.xlu1 %2668 }
0x16a1   : > { %v2674_v20 = vpop.permute.xlu0 %2673 }
0x16a3   : > { %4673 = vmatmul.mubr.msk.f32.gmra.mxu1 %vm530_vm10, %v6142_v55 }
0x16a4   : > { %2649 = vmatprep.mubr.f32.mxu1 %v4917_v19  ;;  %v2679_v37 = vpop.permute.xlu1 %2678 }
0x16a5   : > { %v2684_v7 = vpop.permute.xlu0 %2683 }
0x16a7   : > { %4674 = vmatmul.mubr.msk.f32.gmra.mxu1 %vm530_vm10, %v6150_v15 }
0x16a8   : > { %2655 = vmatprep.mubr.f32.mxu1 %v4917_v19 }
0x16ab   : > { %4675 = vmatmul.mubr.msk.f32.gmra.mxu1 %vm530_vm10, %v6158_v61 }
0x16ac   : > { %3045 = vmatprep.mubr.f32.mxu1 %v4917_v19 }
0x175f   : > { %v2639_v22 = vpop.f32.mrf.mxu1 }
0x1760   : > { %v2640_v32 = vadd.f32 %v6164_v53, %v2639_v22 }
0x1761   : > { %v2641_v14 = vpop.f32.mrf.mxu1 }
0x1762   : > { %v6447_v5 = vadd.f32 %v2669_v63, %v2640_v32  ;;  %v2642_v55 = vadd.f32 %v6170_v54, %v2641_v14 }
0x1763   : > { %v2645_v21 = vpop.f32.mrf.mxu1 }
0x1764   : > { %v6450_v43 = vadd.f32 %v2669_v63, %v2642_v55  ;;  %v2646_v15 = vadd.f32 %v6176_v40, %v2645_v21  ;;  %v2711_v61 = vmul.f32 %v6447_v5, %v6447_v5 }
0x1765   : > { %v2647_v56 = vpop.f32.mrf.mxu1 }
0x1766   : > { %v2694_v35 = vadd.f32 %v6450_v43, %v6447_v5  ;;  %v2712_v53 = vmul.f32 %v6450_v43, %v6450_v43  ;;  %v6459_v51 = vadd.f32 %v2674_v20, %v2646_v15  ;;  %v2648_v54 = vadd.f32 %v6188_v29, %v2647_v56 }
0x1767   : > { %v2651_v25 = vpop.f32.mrf.mxu1 }
0x1768   : > { %v2719_v33 = vadd.f32 %v2712_v53, %v2711_v61  ;;  %v2695_v11 = vadd.f32 %v2694_v35, %v6459_v51  ;;  %v2713_v40 = vmul.f32 %v6459_v51, %v6459_v51  ;;  %v6465_v58 = vadd.f32 %v2674_v20, %v2648_v54 }
0x1769   : > { %v2652_v60 = vadd.f32 %v6197_v4, %v2651_v25  ;;  %v2653_v18 = vpop.f32.mrf.mxu1 }
0x176a   : > { %v2720_v31 = vadd.f32 %v2719_v33, %v2713_v40  ;;  %v2696_v49 = vadd.f32 %v2695_v11, %v6465_v58  ;;  %v2714_v6 = vmul.f32 %v6465_v58, %v6465_v58  ;;  %v2654_v29 = vadd.f32 %v6204_v10, %v2653_v18 }
0x176b   : > { %v6472_v1 = vadd.f32 %v2679_v37, %v2652_v60  ;;  %v2657_v57 = vpop.f32.mrf.mxu1 }
0x176c   : > { %v2721_v12 = vadd.f32 %v2720_v31, %v2714_v6  ;;  %v6474_v46 = vadd.f32 %v2679_v37, %v2654_v29  ;;  %v2658_v52 = vadd.f32 %v6212_v39, %v2657_v57 }
0x176d   : > { %v2697_v4 = vadd.f32 %v2696_v49, %v6472_v1  ;;  %v2715_v22 = vmul.f32 %v6472_v1, %v6472_v1  ;;  %v2659_v32 = vpop.f32.mrf.mxu1 }
0x176e   : > { %v2716_v63 = vmul.f32 %v6474_v46, %v6474_v46  ;;  %v6482_v14 = vadd.f32 %v2684_v7, %v2658_v52  ;;  %v2660_v10 = vadd.f32 %v6223_v30, %v2659_v32 }
0x176f   : > { %v2722_v55 = vadd.f32 %v2721_v12, %v2715_v22  ;;  %v2698_v21 = vadd.f32 %v2697_v4, %v6474_v46 }
0x1770   : > { %v2717_v39 = vmul.f32 %v6482_v14, %v6482_v14  ;;  %v6488_v15 = vadd.f32 %v2684_v7, %v2660_v10 }
0x1771   : > { %v2699_v20 = vadd.f32 %v2698_v21, %v6482_v14  ;;  %v2723_v61 = vadd.f32 %v2722_v55, %v2716_v63 }
0x1772   : > { %v2718_v56 = vmul.f32 %v6488_v15, %v6488_v15 }
0x1773   : > { %v2700_v35 = vadd.f32 %v2699_v20, %v6488_v15  ;;  %v2724_v53 = vadd.f32 %v2723_v61, %v2717_v39 }
0x1775   : > { %2701 = vadd.xlane.f32.xlu1 %v2700_v35  ;;  %v2725_v54 = vadd.f32 %v2724_v53, %v2718_v56 }
0x1777   : > { %2726 = vadd.xlane.f32.xlu0 %v2725_v54 }
0x17fe   : > { %v2702_v30 = vpop.xlane.xlu1 %2701 }
0x17ff   : > { %v2703_v25 = vrot.slane %v2702_v30, 4 }
0x1800   : > { %v2727_v33 = vpop.xlane.xlu0 %2726 }
0x1801   : > { %v2704_v11 = vadd.f32 %v2703_v25, %v2702_v30  ;;  %v2728_v40 = vrot.slane %v2727_v33, 4 }
0x1803   : > { %v2729_v60 = vadd.f32 %v2728_v40, %v2727_v33  ;;  %v2705_v18 = vrot.slane %v2704_v11, 2 }
0x1805   : > { %v2706_v37 = vadd.f32 %v2705_v18, %v2704_v11  ;;  %v2730_v31 = vrot.slane %v2729_v60, 2 }
0x1807   : > { %v2707_v49 = vrot.slane %v2706_v37, 1  ;;  %v2731_v6 = vadd.f32 %v2730_v31, %v2729_v60 }
0x1809   : > { %v2708_v29 = vadd.f32 %v2707_v49, %v2706_v37  ;;  %v2732_v57 = vrot.slane %v2731_v6, 1 }
0x180b   : > { %4738 = vpush %v2708_v29  ;;  %v2733_v12 = vadd.f32 %v2732_v57, %v2731_v6 }
0x180d   : > { %4740 = vpush %v2733_v12 }
0x183c   : > { %s4739_s22 = spop %4738 }
0x183d   : > { %s2710_s24 = smul.f32 0.00012207031, %s4739_s22 }
0x183e   : > { %s4741_s19 = spop %4740 }
0x183f   : > { %s2736_s25 = smul.f32 %s2710_s24, %s2710_s24  ;;  %v2748_v63 = vstv %s2710_s24 }
0x1840   : > { %s2735_s26 = smul.f32 0.00012207031, %s4741_s19 }
0x1842   : > { %s2737_s28 = ssub.f32 %s2735_s26, %s2736_s25 }
0x1844   : > { %s2738_s29 = smax.f32 %s4919_s23, %s2737_s28 }
0x1845   : > { %s2739_s14 = sadd.f32 1e-05, %s2738_s29 }
0x1847   : > { %v2740_v52 = vstv %s2739_s14 }
0x1848   : > { %4795 = vrsqrt.f32 %v2740_v52 }
0x1855   : > { %v4796_v7 = vpop.eup %4795 }
0x1856   : > { %4742 = vpush %v4796_v7 }
0x1887   : > { %s4743_s11 = spop %4742 }
0x1888   : > { %v2743_v4 = vstv %s4743_s11 }
0x1889   : > { %v2746_v22 = vmul.f32 %v6239_v23, %v2743_v4  ;;  %v2747_v32 = vmul.f32 %v6245_v16, %v2743_v4  ;;  %v2744_v55 = vmul.f32 %v6251_v48, %v2743_v4  ;;  %v2745_v21 = vmul.f32 %v6257_v2, %v2743_v4 }
0x188b   : > { %v2752_v10 = vmul.f32 %v2748_v63, %v2747_v32  ;;  %2774 = vperm.xlu0 %4783, %v2747_v32   ;;  %2769 = vperm.xlu1 %4784, %v2746_v22   ;;  %v2751_v20 = vmul.f32 %v2748_v63, %v2746_v22  ;;  %v2749_v61 = vmul.f32 %v2748_v63, %v2744_v55 }
0x188c   : > { %v2750_v56 = vmul.f32 %v2748_v63, %v2745_v21 }
0x188d   : > { %v2756_v39 = vsub.f32 %v6263_v41, %v2752_v10  ;;  %v2755_v35 = vsub.f32 %v6269_v59, %v2751_v20  ;;  %v2753_v23 = vsub.f32 %v6275_v13, %v2749_v61  ;;  %v4677_v20 = vld [vmem:[%s5308_s27 + $0x5] ss:$8 sm:$0x3] }
0x188e   : > { %v2754_v16 = vsub.f32 %v6281_v34, %v2750_v56  ;;  %v2906_v61 = vrot.slane %v4677_v20, %v5310_v24 }
0x188f   : > { %2764 = vperm.xlu0 %4783, %v2745_v21   ;;  %2802 = vperm.xlu1 %4784, %v2756_v39  }
0x1893   : > { %2759 = vperm.xlu0 %4783, %v2744_v55   ;;  %2797 = vperm.xlu1 %4784, %v2755_v35  }
0x1897   : > { %2787 = vperm.xlu0 %4783, %v2753_v23   ;;  %2792 = vperm.xlu1 %4784, %v2754_v16   ;;  %v2910_v23 = vrot.slane %v4677_v20, %v5313_v42 }
0x1906   : > { %v2775_v48 = vpop.permute.xlu0 %2774  ;;  %v2770_v53 = vpop.permute.xlu1 %2769 }
0x1907   : > { %v2783_v2 = vmul.f32 %v2775_v48, %v6482_v14  ;;  %v2784_v41 = vmul.f32 %v2775_v48, %v6488_v15  ;;  %v2781_v59 = vmul.f32 %v2770_v53, %v6472_v1  ;;  %v2782_v11 = vmul.f32 %v2770_v53, %v6474_v46 }
0x190a   : > { %v2765_v54 = vpop.permute.xlu0 %2764  ;;  %v2803_v30 = vpop.permute.xlu1 %2802 }
0x190b   : > { %v2811_v25 = vadd.f32 %v2803_v30, %v2783_v2  ;;  %v2812_v33 = vadd.f32 %v2803_v30, %v2784_v41  ;;  %v2779_v6 = vmul.f32 %v2765_v54, %v6459_v51  ;;  %v2780_v29 = vmul.f32 %v2765_v54, %v6465_v58 }
0x190d   : > { %v2819_v40 = vmul.f32 0.01, %v2811_v25  ;;  %v2820_v13 = vmul.f32 0.01, %v2812_v33 }
0x190e   : > { %v2760_v60 = vpop.permute.xlu0 %2759  ;;  %v2798_v34 = vpop.permute.xlu1 %2797 }
0x190f   : > { %v2827_v18 = vmax.f32 %v2811_v25, %v2819_v40  ;;  %v2809_v37 = vadd.f32 %v2798_v34, %v2781_v59  ;;  %v2810_v31 = vadd.f32 %v2798_v34, %v2782_v11  ;;  %v2828_v49 = vmax.f32 %v2812_v33, %v2820_v13 }
0x1910   : > { %v2777_v14 = vmul.f32 %v2760_v60, %v6447_v5  ;;  %v2778_v15 = vmul.f32 %v2760_v60, %v6450_v43  ;;  %v3070_v60 = vmul.f32 0.6, %v6357_v50  ;;  %v3071_v34 = vmul.f32 0.6, %v6365_v28 }
0x1911   : > { %v2817_v57 = vmul.f32 0.01, %v2809_v37  ;;  %v2818_v1 = vmul.f32 0.01, %v2810_v31  ;;  %2853 = vmatprep.subr.mxu0 %v2828_v49 }
0x1912   : > { %v2788_v46 = vpop.permute.xlu0 %2787  ;;  %2854 = vmatpush1.msra.mxu0 %v2827_v18  ;;  %v2793_v12 = vpop.permute.xlu1 %2792  ;;  %v3072_v18 = vmul.f32 0.6, %v6371_v44 }
0x1913   : > { %v2805_v52 = vadd.f32 %v2788_v46, %v2777_v14  ;;  %v2806_v7 = vadd.f32 %v2788_v46, %v2778_v15  ;;  %v2825_v4 = vmax.f32 %v2809_v37, %v2817_v57  ;;  %v2807_v22 = vadd.f32 %v2793_v12, %v2779_v6 }
0x1914   : > { %v2808_v32 = vadd.f32 %v2793_v12, %v2780_v29  ;;  %v2826_v63 = vmax.f32 %v2810_v31, %v2818_v1  ;;  %v3073_v37 = vmul.f32 0.6, %v6377_v62 }
0x1915   : > { %v2815_v10 = vmul.f32 0.01, %v2807_v22  ;;  %v2814_v43 = vmul.f32 0.01, %v2806_v7  ;;  %v2813_v51 = vmul.f32 0.01, %v2805_v52 }
0x1916   : > { %v2816_v5 = vmul.f32 0.01, %v2808_v32  ;;  %2855 = vmatprep.subr.mxu0 %v2826_v63 }
0x1917   : > { %2856 = vmatpush1.msra.mxu0 %v2825_v4  ;;  %v2823_v58 = vmax.f32 %v2807_v22, %v2815_v10  ;;  %v2822_v21 = vmax.f32 %v2806_v7, %v2814_v43  ;;  %v2821_v39 = vmax.f32 %v2805_v52, %v2813_v51 }
0x1918   : > { %v2824_v55 = vmax.f32 %v2808_v32, %v2816_v5 }
0x191a   : > { %2857 = vmatprep.subr.mxu0 %v2824_v55 }
0x191b   : > { %2858 = vmatpush1.msra.mxu0 %v2823_v58 }
0x191c   : > { %2859 = vmatprep.subr.mxu0 %v2822_v21 }
0x191d   : > { %2860 = vmatpush1.msra.mxu0 %v2821_v39 }
0x191e   : > { %4676 = vmatmul.mubr.msk.f32.vlgmr.msra.gmra.mxu0 %vm782_vm11, %v6295_v9 }
0x191f   : > { %3301 = vmatprep.mubr.f32.mxu0 %v4917_v19 }
0x19de   : > { %v2895_v56 = vpop.f32.mrf.mxu0 }
0x19df   : > { %v2896_v35 = vadd.f32 %v2895_v56, %v5316_v47 }
0x19e0   : > { %v2897_v16 = vpop.f32.mrf.mxu0 }
0x19e1   : > { %v2913_v48 = vmul.f32 %v2906_v61, %v2896_v35  ;;  %v2898_v53 = vadd.f32 %v2897_v16, %v5316_v47 }
0x19e3   : > { %v6520_v2 = vadd.f32 %v2913_v48, %v6306_v0  ;;  %v2914_v41 = vmul.f32 %v2910_v23, %v2898_v53 }
0x19e5   : > { %v6523_v9 = vadd.f32 %v2914_v41, %v6309_v45  ;;  %2917 = vrot.lane.b32.xlu1 %v6520_v2, %s4914_s16  ;;  %v6626_v41 = vld [vmem:[%s7502_s3] sm:$0xff] }
0x19e7   : > { %2919 = vrot.lane.b32.xlu0 %v6523_v9, %s4914_s16 }
0x19e9   : > { %2923 = vrot.lane.b32.xlu1 %v6520_v2, %s4913_s15 }
0x19eb   : > { %2925 = vrot.lane.b32.xlu0 %v6523_v9, %s4913_s15 }
0x19ed   : > { %2949 = vrot.lane.b32.xlu1 %v6520_v2, %s4915_s17 }
0x19ef   : > { %2951 = vrot.lane.b32.xlu0 %v6523_v9, %s4915_s17 }
0x1a57   : > { %v2918_v0 = vpop.permute.xlu1 %2917 }
0x1a59   : > { %v2920_v45 = vpop.permute.xlu0 %2919 }
0x1a5a   : > { %v6539_v25 = vsel %vm454_vm1, %v2918_v0, %v2920_v45  ;;  %v2922_v40 = vsel %vm454_vm1, %v2920_v45, %v2918_v0  ;;  %v6634_v0 = vld [vmem:[%s7502_s3 + $0x8] sm:$0xff]  ;;  %v6642_v45 = vld [vmem:[%s7502_s3 + $0x10] sm:$0xff] }
0x1a5b   : > { %v2924_v54 = vpop.permute.xlu1 %2923 }
0x1a5d   : > { %v2926_v30 = vpop.permute.xlu0 %2925 }
0x1a5e   : > { %v2928_v33 = vsel %vm461_vm0, %v2926_v30, %v2924_v54  ;;  %v2927_v59 = vsel %vm461_vm0, %v2924_v54, %v2926_v30  ;;  %v6650_v54 = vld [vmem:[%s7502_s3 + $0x18] sm:$0xff] }
0x1a5f   : > { %2965 = vrot.lane.b32.xlu1 %v2927_v59, %s4915_s17  ;;  %v2932_v11 = vsel %vm5008_vm2, %v6539_v25, %v2928_v33  ;;  %v2929_v13 = vsel %vm5032_vm3, %v2927_v59, %v2922_v40  ;;  %v2950_v31 = vpop.permute.xlu1 %2949 }
0x1a60   : > { %2967 = vrot.lane.b32.xlu0 %v2932_v11, %s4915_s17 }
0x1a61   : > { %v2952_v49 = vpop.permute.xlu0 %2951 }
0x1a62   : > { %v2953_v22 = vsel %vm472_vm7, %v2950_v31, %v2952_v49  ;;  %v2954_v10 = vsel %vm472_vm7, %v2952_v49, %v2950_v31 }
0x1a63   : > { %2971 = vrot.lane.b32.xlu1 %v2927_v59, %s4916_s18 }
0x1a64   : > { %2973 = vrot.lane.b32.xlu0 %v2932_v11, %s4916_s18 }
0x1a67   : > { %2955 = vrot.lane.b32.xlu1 %v6520_v2, %s4916_s18 }
0x1a68   : > { %2957 = vrot.lane.b32.xlu0 %v6523_v9, %s4916_s18 }
0x1a6b   : > { %2933 = vrot.lane.b32.xlu1 %v2929_v13, %s4915_s17 }
0x1a6c   : > { %2935 = vrot.lane.b32.xlu0 %v6539_v25, %s4915_s17 }
0x1a6f   : > { %2939 = vrot.lane.b32.xlu1 %v2929_v13, %s4916_s18 }
0x1a70   : > { %2941 = vrot.lane.b32.xlu0 %v6539_v25, %s4916_s18 }
0x1a73   : > { %3076 = vperm.xlu1 %4784, %v3070_v60  }
0x1a74   : > { %3081 = vperm.xlu0 %4783, %v3071_v34  }
0x1a77   : > { %3086 = vperm.xlu1 %4784, %v3072_v18  }
0x1a78   : > { %3091 = vperm.xlu0 %4783, %v3073_v37   ;;  %v6668_v37 = vld [vmem:[%s5161_s12 + $0x10] sm:$0xff] }
0x1ad1   : > { %v2966_v14 = vpop.permute.xlu1 %2965 }
0x1ad2   : > { %v2968_v15 = vpop.permute.xlu0 %2967 }
0x1ad3   : > { %v2969_v50 = vsel %vm472_vm7, %v2966_v14, %v2968_v15  ;;  %v2970_v28 = vsel %vm472_vm7, %v2968_v15, %v2966_v14 }
0x1ad5   : > { %v2972_v6 = vpop.permute.xlu1 %2971 }
0x1ad6   : > { %v2974_v29 = vpop.permute.xlu0 %2973 }
0x1ad7   : > { %v2975_v44 = vsel %vm479_vm4, %v2972_v6, %v2974_v29  ;;  %v2976_v62 = vsel %vm479_vm4, %v2974_v29, %v2972_v6 }
0x1ad8   : > { %v2980_v57 = vsel %vm5058_vm6, %v2969_v50, %v2976_v62  ;;  %v2979_v1 = vsel %vm5054_vm5, %v2970_v28, %v2975_v44  ;;  %v2978_v4 = vsel %vm5075_vm8, %v2976_v62, %v2969_v50  ;;  %v2977_v63 = vsel %vm5079_vm9, %v2975_v44, %v2970_v28  ;;  %v6680_v28 = vld [vmem:[%s5161_s12 + $0x18] sm:$0xff] }
0x1ad9   : > { %2993 = vmatprep.subr.mxu1 %v2980_v57  ;;  %v2956_v46 = vpop.permute.xlu1 %2955 }
0x1ada   : > { %v2958_v12 = vpop.permute.xlu0 %2957  ;;  %2994 = vmatpush1.msra.mxu1 %v2979_v1 }
0x1adb   : > { %v2960_v52 = vsel %vm479_vm4, %v2958_v12, %v2956_v46  ;;  %2995 = vmatprep.subr.mxu1 %v2932_v11  ;;  %v2959_v7 = vsel %vm479_vm4, %v2956_v46, %v2958_v12 }
0x1adc   : > { %2996 = vmatpush1.msra.mxu1 %v2927_v59  ;;  %v2964_v43 = vsel %vm5058_vm6, %v2953_v22, %v2960_v52  ;;  %v2963_v51 = vsel %vm5054_vm5, %v2954_v10, %v2959_v7  ;;  %v2962_v21 = vsel %vm5075_vm8, %v2960_v52, %v2953_v22  ;;  %v2961_v39 = vsel %vm5079_vm9, %v2959_v7, %v2954_v10  ;;  %v6689_v52 = vld [vmem:[%s5161_s12 + $0x20] sm:$0xff] }
0x1add   : > { %2997 = vmatprep.subr.mxu1 %v2978_v4  ;;  %v2934_v32 = vpop.permute.xlu1 %2933 }
0x1ade   : > { %v2936_v5 = vpop.permute.xlu0 %2935  ;;  %2998 = vmatpush1.msra.mxu1 %v2977_v63 }
0x1adf   : > { %2999 = vmatprep.subr.mxu1 %v2964_v43  ;;  %v2937_v20 = vsel %vm472_vm7, %v2934_v32, %v2936_v5  ;;  %v2938_v61 = vsel %vm472_vm7, %v2936_v5, %v2934_v32  ;;  %v6696_v5 = vld [vmem:[%s5161_s12 + $0x28] sm:$0xff] }
0x1ae0   : > { %3000 = vmatpush1.msra.mxu1 %v2963_v51 }
0x1ae1   : > { %3001 = vmatprep.subr.mxu1 %v6523_v9  ;;  %v2940_v58 = vpop.permute.xlu1 %2939 }
0x1ae2   : > { %v2942_v55 = vpop.permute.xlu0 %2941  ;;  %3002 = vmatpush1.msra.mxu1 %v6520_v2 }
0x1ae3   : > { %v2943_v56 = vsel %vm479_vm4, %v2940_v58, %v2942_v55  ;;  %v2944_v35 = vsel %vm479_vm4, %v2942_v55, %v2940_v58  ;;  %3003 = vmatprep.subr.mxu1 %v2962_v21 }
0x1ae4   : > { %3004 = vmatpush1.msra.mxu1 %v2961_v39  ;;  %v2948_v23 = vsel %vm5058_vm6, %v2937_v20, %v2944_v35  ;;  %v2947_v16 = vsel %vm5054_vm5, %v2938_v61, %v2943_v56  ;;  %v2946_v48 = vsel %vm5075_vm8, %v2944_v35, %v2937_v20  ;;  %v2945_v53 = vsel %vm5079_vm9, %v2943_v56, %v2938_v61  ;;  %v6704_v39 = vld [vmem:[%s5161_s12 + $0x30] sm:$0xff] }
0x1ae5   : > { %3005 = vmatprep.subr.mxu1 %v2948_v23 }
0x1ae6   : > { %3006 = vmatpush1.msra.mxu1 %v2947_v16 }
0x1ae7   : > { %3007 = vmatprep.subr.mxu1 %v6539_v25  ;;  %v6656_v25 = vld [vmem:[%s5161_s12] sm:$0xff] }
0x1ae8   : > { %3008 = vmatpush1.msra.mxu1 %v2929_v13  ;;  %v6662_v13 = vld [vmem:[%s5161_s12 + $0x8] sm:$0xff] }
0x1ae9   : > { %3009 = vmatprep.subr.mxu1 %v2946_v48 }
0x1aea   : > { %3010 = vmatpush1.msra.mxu1 %v2945_v53  ;;  %v6715_v53 = vld [vmem:[%s5161_s12 + $0x38] sm:$0xff] }
0x1aeb   : > { %3011 = vmatprep.subr.mxu1 %v6523_v9 }
0x1aec   : > { %3012 = vmatpush1.msra.mxu1 %v6520_v2 }
0x1aed   : > { %4678 = vmatmul.mubr.msk.f32.vlgmr.msra.gmra.mxu1 %vm530_vm10, %v6626_v41 }
0x1aee   : > { %3051 = vmatprep.mubr.f32.mxu1 %v4917_v19  ;;  %v3077_v59 = vpop.permute.xlu1 %3076 }
0x1aef   : > { %v3082_v49 = vpop.permute.xlu0 %3081 }
0x1af1   : > { %4679 = vmatmul.mubr.msk.f32.gmra.mxu1 %vm530_vm10, %v6634_v0 }
0x1af2   : > { %3057 = vmatprep.mubr.f32.mxu1 %v4917_v19  ;;  %v3087_v22 = vpop.permute.xlu1 %3086 }
0x1af3   : > { %v3092_v61 = vpop.permute.xlu0 %3091 }
0x1af5   : > { %4680 = vmatmul.mubr.msk.f32.gmra.mxu1 %vm530_vm10, %v6642_v45 }
0x1af6   : > { %3063 = vmatprep.mubr.f32.mxu1 %v4917_v19 }
0x1af9   : > { %4681 = vmatmul.mubr.msk.f32.gmra.mxu1 %vm530_vm10, %v6650_v54 }
0x1afa   : > { %3709 = vmatprep.mubr.f32.mxu1 %v4917_v19 }
0x1bad   : > { %v3047_v30 = vpop.f32.mrf.mxu1 }
0x1bae   : > { %v3048_v33 = vadd.f32 %v6656_v25, %v3047_v30 }
0x1baf   : > { %v3049_v11 = vpop.f32.mrf.mxu1 }
0x1bb0   : > { %v6659_v40 = vadd.f32 %v3077_v59, %v3048_v33  ;;  %v3050_v60 = vadd.f32 %v6662_v13, %v3049_v11 }
0x1bb1   : > { %v3053_v34 = vpop.f32.mrf.mxu1 }
0x1bb2   : > { %v6665_v18 = vadd.f32 %v3077_v59, %v3050_v60  ;;  %v3054_v31 = vadd.f32 %v6668_v37, %v3053_v34  ;;  %v3119_v14 = vmul.f32 %v6659_v40, %v6659_v40 }
0x1bb3   : > { %v3055_v15 = vpop.f32.mrf.mxu1 }
0x1bb4   : > { %v3102_v6 = vadd.f32 %v6665_v18, %v6659_v40  ;;  %v3120_v29 = vmul.f32 %v6665_v18, %v6665_v18  ;;  %v6677_v50 = vadd.f32 %v3082_v49, %v3054_v31  ;;  %v3056_v44 = vadd.f32 %v6680_v28, %v3055_v15 }
0x1bb5   : > { %v3059_v62 = vpop.f32.mrf.mxu1 }
0x1bb6   : > { %v3127_v57 = vadd.f32 %v3120_v29, %v3119_v14  ;;  %v3103_v1 = vadd.f32 %v3102_v6, %v6677_v50  ;;  %v3121_v46 = vmul.f32 %v6677_v50, %v6677_v50  ;;  %v6686_v12 = vadd.f32 %v3082_v49, %v3056_v44 }
0x1bb7   : > { %v3060_v7 = vadd.f32 %v6689_v52, %v3059_v62  ;;  %v3061_v4 = vpop.f32.mrf.mxu1 }
0x1bb8   : > { %v3128_v32 = vadd.f32 %v3127_v57, %v3121_v46  ;;  %v3104_v63 = vadd.f32 %v3103_v1, %v6686_v12  ;;  %v3122_v10 = vmul.f32 %v6686_v12, %v6686_v12  ;;  %v3062_v43 = vadd.f32 %v6696_v5, %v3061_v4 }
0x1bb9   : > { %v6699_v51 = vadd.f32 %v3087_v22, %v3060_v7  ;;  %v3065_v58 = vpop.f32.mrf.mxu1 }
0x1bba   : > { %v3129_v55 = vadd.f32 %v3128_v32, %v3122_v10  ;;  %v6701_v21 = vadd.f32 %v3087_v22, %v3062_v43  ;;  %v3066_v20 = vadd.f32 %v6704_v39, %v3065_v58 }
0x1bbb   : > { %v3105_v56 = vadd.f32 %v3104_v63, %v6699_v51  ;;  %v3123_v35 = vmul.f32 %v6699_v51, %v6699_v51  ;;  %v3067_v23 = vpop.f32.mrf.mxu1 }
0x1bbc   : > { %v3124_v16 = vmul.f32 %v6701_v21, %v6701_v21  ;;  %v6712_v48 = vadd.f32 %v3092_v61, %v3066_v20  ;;  %v3068_v30 = vadd.f32 %v6715_v53, %v3067_v23  ;;  %v6737_v23 = vld [vmem:[%s7504_s5 + $0x18] sm:$0xff] }
0x1bbd   : > { %v3130_v33 = vadd.f32 %v3129_v55, %v3123_v35  ;;  %v3106_v59 = vadd.f32 %v3105_v56, %v6701_v21  ;;  %v6731_v56 = vld [vmem:[%s7504_s5 + $0x10] sm:$0xff] }
0x1bbe   : > { %v3125_v11 = vmul.f32 %v6712_v48, %v6712_v48  ;;  %v6721_v60 = vadd.f32 %v3092_v61, %v3068_v30 }
0x1bbf   : > { %v3107_v34 = vadd.f32 %v3106_v59, %v6712_v48  ;;  %v3131_v31 = vadd.f32 %v3130_v33, %v3124_v16  ;;  %v6743_v59 = vld [vmem:[%s7504_s5] sm:$0xff] }
0x1bc0   : > { %v3126_v49 = vmul.f32 %v6721_v60, %v6721_v60 }
0x1bc1   : > { %v3108_v14 = vadd.f32 %v3107_v34, %v6721_v60  ;;  %v3132_v15 = vadd.f32 %v3131_v31, %v3125_v11  ;;  %v6749_v34 = vld [vmem:[%s7504_s5 + $0x8] sm:$0xff] }
0x1bc3   : > { %3109 = vadd.xlane.f32.xlu1 %v3108_v14  ;;  %v3133_v6 = vadd.f32 %v3132_v15, %v3126_v49  ;;  %v6755_v49 = vld [vmem:[%s7505_s6 + $0x18] sm:$0xff] }
0x1bc5   : > { %3134 = vadd.xlane.f32.xlu0 %v3133_v6 }
0x1c4c   : > { %v3110_v29 = vpop.xlane.xlu1 %3109 }
0x1c4d   : > { %v3111_v44 = vrot.slane %v3110_v29, 4 }
0x1c4e   : > { %v3135_v62 = vpop.xlane.xlu0 %3134 }
0x1c4f   : > { %v3112_v57 = vadd.f32 %v3111_v44, %v3110_v29  ;;  %v3136_v1 = vrot.slane %v3135_v62, 4  ;;  %v6761_v44 = vld [vmem:[%s7505_s6 + $0x10] sm:$0xff] }
0x1c51   : > { %v3137_v46 = vadd.f32 %v3136_v1, %v3135_v62  ;;  %v3113_v7 = vrot.slane %v3112_v57, 2 }
0x1c53   : > { %v3114_v4 = vadd.f32 %v3113_v7, %v3112_v57  ;;  %v3138_v22 = vrot.slane %v3137_v46, 2  ;;  %v6767_v57 = vld [vmem:[%s7505_s6] sm:$0xff] }
0x1c55   : > { %v3115_v32 = vrot.slane %v3114_v4, 1  ;;  %v3139_v63 = vadd.f32 %v3138_v22, %v3137_v46  ;;  %v6773_v46 = vld [vmem:[%s7505_s6 + $0x8] sm:$0xff] }
0x1c57   : > { %v3116_v10 = vadd.f32 %v3115_v32, %v3114_v4  ;;  %v3140_v43 = vrot.slane %v3139_v63, 1 }
0x1c59   : > { %4744 = vpush %v3116_v10  ;;  %v3141_v58 = vadd.f32 %v3140_v43, %v3139_v63 }
0x1c5b   : > { %4746 = vpush %v3141_v58 }
0x1c8a   : > { %s4745_s28 = spop %4744 }
0x1c8b   : > { %s3118_s29 = smul.f32 0.00012207031, %s4745_s28 }
0x1c8c   : > { %s4747_s14 = spop %4746 }
0x1c8d   : > { %s3144_s11 = smul.f32 %s3118_s29, %s3118_s29  ;;  %v3156_v30 = vstv %s3118_s29 }
0x1c8e   : > { %s3143_s13 = smul.f32 0.00012207031, %s4747_s14 }
0x1c90   : > { %s3145_s20 = ssub.f32 %s3143_s13, %s3144_s11 }
0x1c92   : > { %s3146_s21 = smax.f32 %s4919_s23, %s3145_s20 }
0x1c93   : > { %s3147_s22 = sadd.f32 1e-05, %s3146_s21 }
0x1c95   : > { %v3148_v55 = vstv %s3147_s22 }
0x1c96   : > { %4797 = vrsqrt.f32 %v3148_v55 }
0x1ca3   : > { %v4798_v20 = vpop.eup %4797 }
0x1ca4   : > { %4748 = vpush %v4798_v20 }
0x1cd5   : > { %s4749_s24 = spop %4748 }
0x1cd6   : > { %v3151_v61 = vstv %s4749_s24 }
0x1cd7   : > { %v3154_v35 = vmul.f32 %v6731_v56, %v3151_v61  ;;  %v3155_v16 = vmul.f32 %v6737_v23, %v3151_v61  ;;  %v3152_v11 = vmul.f32 %v6743_v59, %v3151_v61  ;;  %v3153_v31 = vmul.f32 %v6749_v34, %v3151_v61 }
0x1cd9   : > { %v3160_v33 = vmul.f32 %v3156_v30, %v3155_v16  ;;  %3182 = vperm.xlu0 %4783, %v3155_v16   ;;  %3177 = vperm.xlu1 %4784, %v3154_v35   ;;  %v3159_v15 = vmul.f32 %v3156_v30, %v3154_v35  ;;  %v3157_v6 = vmul.f32 %v3156_v30, %v3152_v11 }
0x1cda   : > { %v3158_v29 = vmul.f32 %v3156_v30, %v3153_v31 }
0x1cdb   : > { %v3164_v14 = vsub.f32 %v6755_v49, %v3160_v33  ;;  %v3163_v62 = vsub.f32 %v6761_v44, %v3159_v15  ;;  %v3161_v1 = vsub.f32 %v6767_v57, %v3157_v6 }
0x1cdc   : > { %v3162_v7 = vsub.f32 %v6773_v46, %v3158_v29 }
0x1cdd   : > { %3172 = vperm.xlu0 %4783, %v3153_v31   ;;  %3210 = vperm.xlu1 %4784, %v3164_v14  }
0x1ce1   : > { %3167 = vperm.xlu0 %4783, %v3152_v11   ;;  %3205 = vperm.xlu1 %4784, %v3163_v62  }
0x1ce5   : > { %3195 = vperm.xlu0 %4783, %v3161_v1   ;;  %3200 = vperm.xlu1 %4784, %v3162_v7  }
0x1d54   : > { %v3183_v4 = vpop.permute.xlu0 %3182  ;;  %v3178_v22 = vpop.permute.xlu1 %3177 }
0x1d55   : > { %v3191_v32 = vmul.f32 %v3183_v4, %v6712_v48  ;;  %v3192_v63 = vmul.f32 %v3183_v4, %v6721_v60  ;;  %v3189_v20 = vmul.f32 %v3178_v22, %v6699_v51  ;;  %v3190_v61 = vmul.f32 %v3178_v22, %v6701_v21 }
0x1d58   : > { %v3173_v10 = vpop.permute.xlu0 %3172  ;;  %v3211_v43 = vpop.permute.xlu1 %3210 }
0x1d59   : > { %v3219_v58 = vadd.f32 %v3211_v43, %v3191_v32  ;;  %v3220_v55 = vadd.f32 %v3211_v43, %v3192_v63  ;;  %v3187_v6 = vmul.f32 %v3173_v10, %v6677_v50  ;;  %v3188_v29 = vmul.f32 %v3173_v10, %v6686_v12 }
0x1d5b   : > { %v3227_v35 = vmul.f32 0.01, %v3219_v58  ;;  %v3228_v16 = vmul.f32 0.01, %v3220_v55 }
0x1d5c   : > { %v3168_v30 = vpop.permute.xlu0 %3167  ;;  %v3206_v33 = vpop.permute.xlu1 %3205 }
0x1d5d   : > { %v3235_v11 = vmax.f32 %v3219_v58, %v3227_v35  ;;  %v3236_v31 = vmax.f32 %v3220_v55, %v3228_v16  ;;  %v3217_v14 = vadd.f32 %v3206_v33, %v3189_v20  ;;  %v3218_v15 = vadd.f32 %v3206_v33, %v3190_v61  ;;  %v6787_v61 = vld [vmem:[%s7506_s7] sm:$0xff] }
0x1d5e   : > { %v3185_v48 = vmul.f32 %v3168_v30, %v6659_v40  ;;  %v3186_v60 = vmul.f32 %v3168_v30, %v6665_v18  ;;  %v4683_v35 = vld [vmem:[%s5308_s27 + $0x6] ss:$8 sm:$0x3] }
0x1d5f   : > { %v3225_v62 = vmul.f32 0.01, %v3217_v14  ;;  %v3226_v51 = vmul.f32 0.01, %v3218_v15  ;;  %3261 = vmatprep.subr.mxu0 %v3236_v31  ;;  %v3314_v16 = vrot.slane %v4683_v35, %v5310_v24 }
0x1d60   : > { %v3196_v21 = vpop.permute.xlu0 %3195  ;;  %3262 = vmatpush1.msra.mxu0 %v3235_v11  ;;  %v3201_v1 = vpop.permute.xlu1 %3200  ;;  %v3318_v11 = vrot.slane %v4683_v35, %v5313_v42 }
0x1d61   : > { %v3213_v7 = vadd.f32 %v3196_v21, %v3185_v48  ;;  %v3214_v4 = vadd.f32 %v3196_v21, %v3186_v60  ;;  %v3233_v22 = vmax.f32 %v3217_v14, %v3225_v62  ;;  %v3234_v32 = vmax.f32 %v3218_v15, %v3226_v51 }
0x1d62   : > { %v3215_v63 = vadd.f32 %v3201_v1, %v3187_v6  ;;  %v3216_v43 = vadd.f32 %v3201_v1, %v3188_v29 }
0x1d63   : > { %v3222_v18 = vmul.f32 0.01, %v3214_v4  ;;  %3263 = vmatprep.subr.mxu0 %v3234_v32  ;;  %v3221_v50 = vmul.f32 0.01, %v3213_v7  ;;  %v6849_v32 = vld [vmem:[%s7503_s4] sm:$0xff] }
0x1d64   : > { %v3223_v58 = vmul.f32 0.01, %v3215_v63  ;;  %v3224_v40 = vmul.f32 0.01, %v3216_v43  ;;  %3264 = vmatpush1.msra.mxu0 %v3233_v22 }
0x1d65   : > { %v3230_v55 = vmax.f32 %v3214_v4, %v3222_v18  ;;  %v3229_v20 = vmax.f32 %v3213_v7, %v3221_v50  ;;  %v6869_v50 = vld [vmem:[%s7503_s4 + $0x18] sm:$0xff] }
0x1d66   : > { %v3231_v12 = vmax.f32 %v3215_v63, %v3223_v58  ;;  %v3232_v10 = vmax.f32 %v3216_v43, %v3224_v40  ;;  %v3478_v63 = vmul.f32 0.7, %v6849_v32  ;;  %v6857_v43 = vld [vmem:[%s7503_s4 + $0x8] sm:$0xff]  ;;  %v6863_v40 = vld [vmem:[%s7503_s4 + $0x10] sm:$0xff] }
0x1d67   : > { %v3479_v58 = vmul.f32 0.7, %v6857_v43  ;;  %v3480_v18 = vmul.f32 0.7, %v6863_v40 }
0x1d68   : > { %3265 = vmatprep.subr.mxu0 %v3232_v10 }
0x1d69   : > { %3266 = vmatpush1.msra.mxu0 %v3231_v12  ;;  %v3481_v12 = vmul.f32 0.7, %v6869_v50 }
0x1d6a   : > { %3267 = vmatprep.subr.mxu0 %v3230_v55 }
0x1d6b   : > { %3268 = vmatpush1.msra.mxu0 %v3229_v20 }
0x1d6c   : > { %4682 = vmatmul.mubr.msk.f32.vlgmr.msra.gmra.mxu0 %vm782_vm11, %v6787_v61 }
0x1d6d   : > { %3453 = vmatprep.mubr.f32.mxu0 %v4917_v19 }
0x1e2c   : > { %v3303_v30 = vpop.f32.mrf.mxu0 }
0x1e2d   : > { %v3304_v33 = vadd.f32 %v3303_v30, %v5316_v47 }
0x1e2e   : > { %v3305_v31 = vpop.f32.mrf.mxu0 }
0x1e2f   : > { %v3321_v14 = vmul.f32 %v3314_v16, %v3304_v33  ;;  %v3306_v15 = vadd.f32 %v3305_v31, %v5316_v47 }
0x1e31   : > { %v6798_v48 = vadd.f32 %v3321_v14, %v6520_v2  ;;  %v3322_v60 = vmul.f32 %v3318_v11, %v3306_v15 }
0x1e33   : > { %v6801_v6 = vadd.f32 %v3322_v60, %v6523_v9  ;;  %3325 = vrot.lane.b32.xlu1 %v6798_v48, %s4914_s16 }
0x1e35   : > { %3327 = vrot.lane.b32.xlu0 %v6801_v6, %s4914_s16 }
0x1e37   : > { %3331 = vrot.lane.b32.xlu1 %v6798_v48, %s4913_s15 }
0x1e39   : > { %3333 = vrot.lane.b32.xlu0 %v6801_v6, %s4913_s15 }
0x1e3b   : > { %3357 = vrot.lane.b32.xlu1 %v6798_v48, %s4915_s17 }
0x1e3d   : > { %3359 = vrot.lane.b32.xlu0 %v6801_v6, %s4915_s17 }
0x1ea5   : > { %v3326_v2 = vpop.permute.xlu1 %3325 }
0x1ea7   : > { %v3328_v9 = vpop.permute.xlu0 %3327 }
0x1ea8   : > { %v6817_v51 = vsel %vm454_vm1, %v3326_v2, %v3328_v9  ;;  %v3330_v4 = vsel %vm454_vm1, %v3328_v9, %v3326_v2 }
0x1ea9   : > { %v3332_v29 = vpop.permute.xlu1 %3331 }
0x1eab   : > { %v3334_v62 = vpop.permute.xlu0 %3333 }
0x1eac   : > { %v3335_v21 = vsel %vm461_vm0, %v3332_v29, %v3334_v62  ;;  %v3336_v1 = vsel %vm461_vm0, %v3334_v62, %v3332_v29 }
0x1ead   : > { %3373 = vrot.lane.b32.xlu1 %v3335_v21, %s4915_s17  ;;  %v3340_v7 = vsel %vm5008_vm2, %v6817_v51, %v3336_v1  ;;  %v6838_v22 = vsel %vm5032_vm3, %v3335_v21, %v3330_v4  ;;  %v3358_v10 = vpop.permute.xlu1 %3357 }
0x1eae   : > { %3375 = vrot.lane.b32.xlu0 %v3340_v7, %s4915_s17 }
0x1eaf   : > { %v3360_v55 = vpop.permute.xlu0 %3359 }
0x1eb0   : > { %v3361_v4 = vsel %vm472_vm7, %v3358_v10, %v3360_v55 }
0x1eb1   : > { %3379 = vrot.lane.b32.xlu1 %v3335_v21, %s4916_s18 }
0x1eb2   : > { %3381 = vrot.lane.b32.xlu0 %v3340_v7, %s4916_s18 }
0x1eb5   : > { %3363 = vrot.lane.b32.xlu1 %v6798_v48, %s4916_s18 }
0x1eb6   : > { %3365 = vrot.lane.b32.xlu0 %v6801_v6, %s4916_s18 }
0x1eb9   : > { %3341 = vrot.lane.b32.xlu1 %v6838_v22, %s4915_s17 }
0x1eba   : > { %3343 = vrot.lane.b32.xlu0 %v6817_v51, %s4915_s17 }
0x1ebd   : > { %3347 = vrot.lane.b32.xlu1 %v6838_v22, %s4916_s18 }
0x1ebe   : > { %3349 = vrot.lane.b32.xlu0 %v6817_v51, %s4916_s18 }
0x1ec1   : > { %3484 = vperm.xlu1 %4784, %v3478_v63  }
0x1ec2   : > { %3489 = vperm.xlu0 %4783, %v3479_v58  }
0x1ec5   : > { %3494 = vperm.xlu1 %4784, %v3480_v18   ;;  %v3362_v18 = vsel %vm472_vm7, %v3360_v55, %v3358_v10 }
0x1ec6   : > { %3499 = vperm.xlu0 %4783, %v3481_v12  }
0x1f1f   : > { %v3374_v20 = vpop.permute.xlu1 %3373 }
0x1f20   : > { %v3376_v35 = vpop.permute.xlu0 %3375 }
0x1f21   : > { %v3377_v33 = vsel %vm472_vm7, %v3374_v20, %v3376_v35  ;;  %v3378_v11 = vsel %vm472_vm7, %v3376_v35, %v3374_v20 }
0x1f23   : > { %v3380_v16 = vpop.permute.xlu1 %3379 }
0x1f24   : > { %v3382_v30 = vpop.permute.xlu0 %3381 }
0x1f25   : > { %v3383_v31 = vsel %vm479_vm4, %v3380_v16, %v3382_v30  ;;  %v3384_v14 = vsel %vm479_vm4, %v3382_v30, %v3380_v16 }
0x1f26   : > { %v3388_v15 = vsel %vm5058_vm6, %v3377_v33, %v3384_v14  ;;  %v3387_v60 = vsel %vm5054_vm5, %v3378_v11, %v3383_v31  ;;  %v3386_v1 = vsel %vm5075_vm8, %v3384_v14, %v3377_v33  ;;  %v3385_v58 = vsel %vm5079_vm9, %v3383_v31, %v3378_v11 }
0x1f27   : > { %3401 = vmatprep.subr.mxu0 %v3388_v15  ;;  %v3364_v2 = vpop.permute.xlu1 %3363 }
0x1f28   : > { %v3366_v9 = vpop.permute.xlu0 %3365  ;;  %3402 = vmatpush1.msra.mxu0 %v3387_v60 }
0x1f29   : > { %v3368_v29 = vsel %vm479_vm4, %v3366_v9, %v3364_v2  ;;  %3403 = vmatprep.subr.mxu0 %v3340_v7  ;;  %v3367_v62 = vsel %vm479_vm4, %v3364_v2, %v3366_v9 }
0x1f2a   : > { %3404 = vmatpush1.msra.mxu0 %v3335_v21  ;;  %v3372_v7 = vsel %vm5058_vm6, %v3361_v4, %v3368_v29  ;;  %v3371_v21 = vsel %vm5054_vm5, %v3362_v18, %v3367_v62  ;;  %v3370_v16 = vsel %vm5075_vm8, %v3368_v29, %v3361_v4  ;;  %v3369_v10 = vsel %vm5079_vm9, %v3367_v62, %v3362_v18 }
0x1f2b   : > { %3405 = vmatprep.subr.mxu0 %v3386_v1  ;;  %v3342_v63 = vpop.permute.xlu1 %3341 }
0x1f2c   : > { %v3344_v12 = vpop.permute.xlu0 %3343  ;;  %3406 = vmatpush1.msra.mxu0 %v3385_v58 }
0x1f2d   : > { %3407 = vmatprep.subr.mxu0 %v3372_v7  ;;  %v3345_v55 = vsel %vm472_vm7, %v3342_v63, %v3344_v12  ;;  %v3346_v30 = vsel %vm472_vm7, %v3344_v12, %v3342_v63 }
0x1f2e   : > { %3408 = vmatpush1.msra.mxu0 %v3371_v21 }
0x1f2f   : > { %3409 = vmatprep.subr.mxu0 %v6801_v6  ;;  %v3348_v20 = vpop.permute.xlu1 %3347 }
0x1f30   : > { %v3350_v35 = vpop.permute.xlu0 %3349  ;;  %3410 = vmatpush1.msra.mxu0 %v6798_v48 }
0x1f31   : > { %v3351_v33 = vsel %vm479_vm4, %v3348_v20, %v3350_v35  ;;  %v3352_v11 = vsel %vm479_vm4, %v3350_v35, %v3348_v20  ;;  %3411 = vmatprep.subr.mxu0 %v3370_v16 }
0x1f32   : > { %3412 = vmatpush1.msra.mxu0 %v3369_v10  ;;  %v3356_v31 = vsel %vm5058_vm6, %v3345_v55, %v3352_v11  ;;  %v3355_v14 = vsel %vm5054_vm5, %v3346_v30, %v3351_v33  ;;  %v3354_v15 = vsel %vm5075_vm8, %v3352_v11, %v3345_v55  ;;  %v3353_v60 = vsel %vm5079_vm9, %v3351_v33, %v3346_v30 }
0x1f33   : > { %3413 = vmatprep.subr.mxu0 %v3356_v31 }
0x1f34   : > { %3414 = vmatpush1.msra.mxu0 %v3355_v14 }
0x1f35   : > { %3415 = vmatprep.subr.mxu0 %v6817_v51 }
0x1f36   : > { %3416 = vmatpush1.msra.mxu0 %v6838_v22 }
0x1f37   : > { %3417 = vmatprep.subr.mxu0 %v3354_v15 }
0x1f38   : > { %3418 = vmatpush1.msra.mxu0 %v3353_v60 }
0x1f39   : > { %3419 = vmatprep.subr.mxu0 %v6801_v6 }
0x1f3a   : > { %3420 = vmatpush1.msra.mxu0 %v6798_v48 }
0x1f3b   : > { %4684 = vmatmul.mubr.msk.f32.vlgmr.msra.gmra.mxu0 %vm530_vm10, %v6626_v41 }
0x1f3c   : > { %3459 = vmatprep.mubr.f32.mxu0 %v4917_v19  ;;  %v3485_v22 = vpop.permute.xlu1 %3484 }
0x1f3d   : > { %v3490_v1 = vpop.permute.xlu0 %3489 }
0x1f3f   : > { %4685 = vmatmul.mubr.msk.f32.gmra.mxu0 %vm530_vm10, %v6634_v0 }
0x1f40   : > { %3465 = vmatprep.mubr.f32.mxu0 %v4917_v19  ;;  %v3495_v16 = vpop.permute.xlu1 %3494 }
0x1f41   : > { %v3500_v60 = vpop.permute.xlu0 %3499 }
0x1f43   : > { %4686 = vmatmul.mubr.msk.f32.gmra.mxu0 %vm530_vm10, %v6642_v45 }
0x1f44   : > { %3471 = vmatprep.mubr.f32.mxu0 %v4917_v19 }
0x1f47   : > { %4687 = vmatmul.mubr.msk.f32.gmra.mxu0 %vm530_vm10, %v6650_v54 }
0x1f48   : > { %3861 = vmatprep.mubr.f32.mxu0 %v4917_v19 }
0x1ffb   : > { %v3455_v51 = vpop.f32.mrf.mxu0 }
0x1ffc   : > { %v3456_v41 = vadd.f32 %v6656_v25, %v3455_v51 }
0x1ffd   : > { %v3457_v2 = vpop.f32.mrf.mxu0 }
0x1ffe   : > { %v6939_v9 = vadd.f32 %v3485_v22, %v3456_v41  ;;  %v3458_v0 = vadd.f32 %v6662_v13, %v3457_v2 }
0x1fff   : > { %v3461_v29 = vpop.f32.mrf.mxu0 }
0x2000   : > { %v6942_v62 = vadd.f32 %v3485_v22, %v3458_v0  ;;  %v3462_v45 = vadd.f32 %v6668_v37, %v3461_v29  ;;  %v3527_v54 = vmul.f32 %v6939_v9, %v6939_v9 }
0x2001   : > { %v3463_v4 = vpop.f32.mrf.mxu0 }
0x2002   : > { %v3510_v63 = vadd.f32 %v6942_v62, %v6939_v9  ;;  %v3528_v25 = vmul.f32 %v6942_v62, %v6942_v62  ;;  %v6951_v58 = vadd.f32 %v3490_v1, %v3462_v45  ;;  %v3464_v13 = vadd.f32 %v6680_v28, %v3463_v4 }
0x2003   : > { %v3467_v18 = vpop.f32.mrf.mxu0 }
0x2004   : > { %v3535_v12 = vadd.f32 %v3528_v25, %v3527_v54  ;;  %v3511_v7 = vadd.f32 %v3510_v63, %v6951_v58  ;;  %v3529_v37 = vmul.f32 %v6951_v58, %v6951_v58  ;;  %v6957_v21 = vadd.f32 %v3490_v1, %v3464_v13 }
0x2005   : > { %v3468_v20 = vadd.f32 %v6689_v52, %v3467_v18  ;;  %v3469_v35 = vpop.f32.mrf.mxu0 }
0x2006   : > { %v3536_v10 = vadd.f32 %v3535_v12, %v3529_v37  ;;  %v3512_v55 = vadd.f32 %v3511_v7, %v6957_v21  ;;  %v3530_v30 = vmul.f32 %v6957_v21, %v6957_v21  ;;  %v3470_v28 = vadd.f32 %v6696_v5, %v3469_v35 }
0x2007   : > { %v6964_v33 = vadd.f32 %v3495_v16, %v3468_v20  ;;  %v3473_v11 = vpop.f32.mrf.mxu0 }
0x2008   : > { %v3537_v31 = vadd.f32 %v3536_v10, %v3530_v30  ;;  %v6966_v14 = vadd.f32 %v3495_v16, %v3470_v28  ;;  %v3474_v15 = vadd.f32 %v6704_v39, %v3473_v11 }
0x2009   : > { %v3513_v52 = vadd.f32 %v3512_v55, %v6964_v33  ;;  %v3531_v51 = vmul.f32 %v6964_v33, %v6964_v33  ;;  %v3475_v41 = vpop.f32.mrf.mxu0 }
0x200a   : > { %v3532_v22 = vmul.f32 %v6966_v14, %v6966_v14  ;;  %v6974_v2 = vadd.f32 %v3500_v60, %v3474_v15  ;;  %v3476_v5 = vadd.f32 %v6715_v53, %v3475_v41 }
0x200b   : > { %v3538_v0 = vadd.f32 %v3537_v31, %v3531_v51  ;;  %v3514_v29 = vadd.f32 %v3513_v52, %v6966_v14 }
0x200c   : > { %v3533_v39 = vmul.f32 %v6974_v2, %v6974_v2  ;;  %v6980_v45 = vadd.f32 %v3500_v60, %v3476_v5 }
0x200d   : > { %v3515_v1 = vadd.f32 %v3514_v29, %v6974_v2  ;;  %v3539_v54 = vadd.f32 %v3538_v0, %v3532_v22 }
0x200e   : > { %v3534_v4 = vmul.f32 %v6980_v45, %v6980_v45 }
0x200f   : > { %v3516_v63 = vadd.f32 %v3515_v1, %v6980_v45  ;;  %v3540_v25 = vadd.f32 %v3539_v54, %v3533_v39 }
0x2011   : > { %3517 = vadd.xlane.f32.xlu1 %v3516_v63  ;;  %v3541_v13 = vadd.f32 %v3540_v25, %v3534_v4 }
0x2013   : > { %3542 = vadd.xlane.f32.xlu0 %v3541_v13 }
0x209a   : > { %v3518_v53 = vpop.xlane.xlu1 %3517 }
0x209b   : > { %v3519_v18 = vrot.slane %v3518_v53, 4 }
0x209c   : > { %v3543_v12 = vpop.xlane.xlu0 %3542 }
0x209d   : > { %v3520_v7 = vadd.f32 %v3519_v18, %v3518_v53  ;;  %v3544_v37 = vrot.slane %v3543_v12, 4 }
0x209f   : > { %v3521_v20 = vrot.slane %v3520_v7, 2  ;;  %v3545_v35 = vadd.f32 %v3544_v37, %v3543_v12 }
0x20a1   : > { %v3546_v16 = vrot.slane %v3545_v35, 2  ;;  %v3522_v10 = vadd.f32 %v3521_v20, %v3520_v7 }
0x20a3   : > { %v3523_v55 = vrot.slane %v3522_v10, 1  ;;  %v3547_v30 = vadd.f32 %v3546_v16, %v3545_v35 }
0x20a5   : > { %v3524_v28 = vadd.f32 %v3523_v55, %v3522_v10  ;;  %v3548_v11 = vrot.slane %v3547_v30, 1 }
0x20a7   : > { %4750 = vpush %v3524_v28  ;;  %v3549_v31 = vadd.f32 %v3548_v11, %v3547_v30 }
0x20a9   : > { %4752 = vpush %v3549_v31 }
0x20d8   : > { %s4751_s26 = spop %4750 }
0x20d9   : > { %s3526_s28 = smul.f32 0.00012207031, %s4751_s26 }
0x20da   : > { %s4753_s14 = spop %4752 }
0x20db   : > { %s3552_s11 = smul.f32 %s3526_s28, %s3526_s28  ;;  %v3564_v22 = vstv %s3526_s28 }
0x20dc   : > { %s3551_s13 = smul.f32 0.00012207031, %s4753_s14 }
0x20de   : > { %s3553_s20 = ssub.f32 %s3551_s13, %s3552_s11 }
0x20e0   : > { %s3554_s21 = smax.f32 %s4919_s23, %s3553_s20 }
0x20e1   : > { %s3555_s22 = sadd.f32 1e-05, %s3554_s21 }
0x20e3   : > { %v3556_v15 = vstv %s3555_s22 }
0x20e4   : > { %4799 = vrsqrt.f32 %v3556_v15 }
0x20f1   : > { %v4800_v60 = vpop.eup %4799 }
0x20f2   : > { %4754 = vpush %v4800_v60 }
0x2123   : > { %s4755_s29 = spop %4754 }
0x2124   : > { %v3559_v52 = vstv %s4755_s29 }
0x2125   : > { %v3562_v51 = vmul.f32 %v6731_v56, %v3559_v52  ;;  %v3563_v41 = vmul.f32 %v6737_v23, %v3559_v52  ;;  %v3560_v0 = vmul.f32 %v6743_v59, %v3559_v52  ;;  %v3561_v29 = vmul.f32 %v6749_v34, %v3559_v52 }
0x2127   : > { %v3568_v5 = vmul.f32 %v3564_v22, %v3563_v41  ;;  %3590 = vperm.xlu0 %4783, %v3563_v41   ;;  %3585 = vperm.xlu1 %4784, %v3562_v51   ;;  %v3567_v1 = vmul.f32 %v3564_v22, %v3562_v51  ;;  %v3565_v54 = vmul.f32 %v3564_v22, %v3560_v0 }
0x2128   : > { %v3566_v4 = vmul.f32 %v3564_v22, %v3561_v29 }
0x2129   : > { %v3572_v39 = vsub.f32 %v6755_v49, %v3568_v5  ;;  %v3571_v63 = vsub.f32 %v6761_v44, %v3567_v1  ;;  %v3569_v56 = vsub.f32 %v6767_v57, %v3565_v54  ;;  %v4689_v1 = vld [vmem:[%s5308_s27 + $0x7] ss:$8 sm:$0x3] }
0x212a   : > { %v3570_v23 = vsub.f32 %v6773_v46, %v3566_v4  ;;  %v3722_v54 = vrot.slane %v4689_v1, %v5310_v24 }
0x212b   : > { %3580 = vperm.xlu0 %4783, %v3561_v29   ;;  %3618 = vperm.xlu1 %4784, %v3572_v39  }
0x212f   : > { %3575 = vperm.xlu0 %4783, %v3560_v0   ;;  %3613 = vperm.xlu1 %4784, %v3571_v63  }
0x2133   : > { %3603 = vperm.xlu0 %4783, %v3569_v56   ;;  %3608 = vperm.xlu1 %4784, %v3570_v23   ;;  %v3726_v56 = vrot.slane %v4689_v1, %v5313_v42 }
0x21a2   : > { %v3591_v59 = vpop.permute.xlu0 %3590  ;;  %v3586_v25 = vpop.permute.xlu1 %3585 }
0x21a3   : > { %v3599_v34 = vmul.f32 %v3591_v59, %v6974_v2  ;;  %v3600_v49 = vmul.f32 %v3591_v59, %v6980_v45  ;;  %v3597_v44 = vmul.f32 %v3586_v25, %v6964_v33  ;;  %v3598_v7 = vmul.f32 %v3586_v25, %v6966_v14 }
0x21a6   : > { %v3581_v13 = vpop.permute.xlu0 %3580  ;;  %v3619_v53 = vpop.permute.xlu1 %3618 }
0x21a7   : > { %v3627_v18 = vadd.f32 %v3619_v53, %v3599_v34  ;;  %v3628_v12 = vadd.f32 %v3619_v53, %v3600_v49  ;;  %v3595_v30 = vmul.f32 %v3581_v13, %v6951_v58  ;;  %v3596_v28 = vmul.f32 %v3581_v13, %v6957_v21 }
0x21a9   : > { %v3635_v37 = vmul.f32 0.01, %v3627_v18  ;;  %v3636_v57 = vmul.f32 0.01, %v3628_v12 }
0x21aa   : > { %v3576_v20 = vpop.permute.xlu0 %3575  ;;  %v3614_v46 = vpop.permute.xlu1 %3613 }
0x21ab   : > { %v3643_v35 = vmax.f32 %v3627_v18, %v3635_v37  ;;  %v3644_v16 = vmax.f32 %v3628_v12, %v3636_v57  ;;  %v3625_v10 = vadd.f32 %v3614_v46, %v3597_v44  ;;  %v3626_v55 = vadd.f32 %v3614_v46, %v3598_v7 }
0x21ac   : > { %v3593_v2 = vmul.f32 %v3576_v20, %v6939_v9  ;;  %v3594_v45 = vmul.f32 %v3576_v20, %v6942_v62  ;;  %v3886_v20 = vmul.f32 0.8, %v6849_v32  ;;  %v3887_v46 = vmul.f32 0.8, %v6857_v43 }
0x21ad   : > { %v3633_v11 = vmul.f32 0.01, %v3625_v10  ;;  %v3634_v33 = vmul.f32 0.01, %v3626_v55  ;;  %3669 = vmatprep.subr.mxu1 %v3644_v16  ;;  %v3889_v16 = vmul.f32 0.8, %v6869_v50 }
0x21ae   : > { %v3604_v14 = vpop.permute.xlu0 %3603  ;;  %3670 = vmatpush1.msra.mxu1 %v3643_v35  ;;  %v3609_v31 = vpop.permute.xlu1 %3608  ;;  %v3888_v35 = vmul.f32 0.8, %v6863_v40 }
0x21af   : > { %v3621_v15 = vadd.f32 %v3604_v14, %v3593_v2  ;;  %v3622_v60 = vadd.f32 %v3604_v14, %v3594_v45  ;;  %v3641_v52 = vmax.f32 %v3625_v10, %v3633_v11  ;;  %v3642_v51 = vmax.f32 %v3626_v55, %v3634_v33 }
0x21b0   : > { %v3623_v41 = vadd.f32 %v3609_v31, %v3595_v30  ;;  %v3624_v22 = vadd.f32 %v3609_v31, %v3596_v28 }
0x21b1   : > { %v3630_v62 = vmul.f32 0.01, %v3622_v60  ;;  %3671 = vmatprep.subr.mxu1 %v3642_v51  ;;  %v3629_v58 = vmul.f32 0.01, %v3621_v15 }
0x21b2   : > { %v3631_v5 = vmul.f32 0.01, %v3623_v41  ;;  %v3632_v9 = vmul.f32 0.01, %v3624_v22  ;;  %3672 = vmatpush1.msra.mxu1 %v3641_v52 }
0x21b3   : > { %v3638_v29 = vmax.f32 %v3622_v60, %v3630_v62  ;;  %v3637_v39 = vmax.f32 %v3621_v15, %v3629_v58 }
0x21b4   : > { %v3639_v21 = vmax.f32 %v3623_v41, %v3631_v5  ;;  %v3640_v0 = vmax.f32 %v3624_v22, %v3632_v9 }
0x21b6   : > { %3673 = vmatprep.subr.mxu1 %v3640_v0 }
0x21b7   : > { %3674 = vmatpush1.msra.mxu1 %v3639_v21 }
0x21b8   : > { %3675 = vmatprep.subr.mxu1 %v3638_v29 }
0x21b9   : > { %3676 = vmatpush1.msra.mxu1 %v3637_v39 }
0x21ba   : > { %4688 = vmatmul.mubr.msk.f32.vlgmr.msra.gmra.mxu1 %vm782_vm11, %v6787_v61 }
0x21bb   : > { %4117 = vmatprep.mubr.f32.mxu1 %v4917_v19 }
0x227a   : > { %v3711_v4 = vpop.f32.mrf.mxu1 }
0x227b   : > { %v3712_v63 = vadd.f32 %v3711_v4, %v5316_v47 }
0x227c   : > { %v3713_v23 = vpop.f32.mrf.mxu1 }
0x227d   : > { %v3729_v59 = vmul.f32 %v3722_v54, %v3712_v63  ;;  %v3714_v25 = vadd.f32 %v3713_v23, %v5316_v47 }
0x227f   : > { %v7012_v34 = vadd.f32 %v3729_v59, %v6798_v48  ;;  %v3730_v49 = vmul.f32 %v3726_v56, %v3714_v25 }
0x2281   : > { %v7015_v61 = vadd.f32 %v3730_v49, %v6801_v6  ;;  %3733 = vrot.lane.b32.xlu1 %v7012_v34, %s4914_s16  ;;  %v7118_v49 = vld [vmem:[%s7502_s3] sm:$0xff] }
0x2283   : > { %3735 = vrot.lane.b32.xlu0 %v7015_v61, %s4914_s16 }
0x2285   : > { %3739 = vrot.lane.b32.xlu1 %v7012_v34, %s4913_s15 }
0x2287   : > { %3741 = vrot.lane.b32.xlu0 %v7015_v61, %s4913_s15 }
0x2289   : > { %3765 = vrot.lane.b32.xlu1 %v7012_v34, %s4915_s17 }
0x228b   : > { %3767 = vrot.lane.b32.xlu0 %v7015_v61, %s4915_s17 }
0x22f3   : > { %v3734_v48 = vpop.permute.xlu1 %3733 }
0x22f5   : > { %v3736_v6 = vpop.permute.xlu0 %3735 }
0x22f6   : > { %v7031_v18 = vsel %vm454_vm1, %v3734_v48, %v3736_v6  ;;  %v3738_v37 = vsel %vm454_vm1, %v3736_v6, %v3734_v48  ;;  %v7126_v48 = vld [vmem:[%s7502_s3 + $0x8] sm:$0xff]  ;;  %v7134_v6 = vld [vmem:[%s7502_s3 + $0x10] sm:$0xff] }
0x22f7   : > { %v3740_v13 = vpop.permute.xlu1 %3739 }
0x22f9   : > { %v3742_v53 = vpop.permute.xlu0 %3741 }
0x22fa   : > { %v3743_v12 = vsel %vm461_vm0, %v3740_v13, %v3742_v53  ;;  %v3744_v44 = vsel %vm461_vm0, %v3742_v53, %v3740_v13  ;;  %v7142_v13 = vld [vmem:[%s7502_s3 + $0x18] sm:$0xff] }
0x22fb   : > { %3781 = vrot.lane.b32.xlu1 %v3743_v12, %s4915_s17  ;;  %v3748_v7 = vsel %vm5008_vm2, %v7031_v18, %v3744_v44  ;;  %v3745_v57 = vsel %vm5032_vm3, %v3743_v12, %v3738_v37  ;;  %v3766_v10 = vpop.permute.xlu1 %3765 }
0x22fc   : > { %3783 = vrot.lane.b32.xlu0 %v3748_v7, %s4915_s17 }
0x22fd   : > { %v3768_v55 = vpop.permute.xlu0 %3767 }
0x22fe   : > { %v3769_v51 = vsel %vm472_vm7, %v3766_v10, %v3768_v55  ;;  %v3770_v5 = vsel %vm472_vm7, %v3768_v55, %v3766_v10 }
0x22ff   : > { %3787 = vrot.lane.b32.xlu1 %v3743_v12, %s4916_s18 }
0x2300   : > { %3789 = vrot.lane.b32.xlu0 %v3748_v7, %s4916_s18 }
0x2303   : > { %3771 = vrot.lane.b32.xlu1 %v7012_v34, %s4916_s18 }
0x2304   : > { %3773 = vrot.lane.b32.xlu0 %v7015_v61, %s4916_s18 }
0x2307   : > { %3749 = vrot.lane.b32.xlu1 %v3745_v57, %s4915_s17 }
0x2308   : > { %3751 = vrot.lane.b32.xlu0 %v7031_v18, %s4915_s17 }
0x230b   : > { %3755 = vrot.lane.b32.xlu1 %v3745_v57, %s4916_s18 }
0x230c   : > { %3757 = vrot.lane.b32.xlu0 %v7031_v18, %s4916_s18 }
0x230f   : > { %3892 = vperm.xlu1 %4784, %v3886_v20  }
0x2310   : > { %3897 = vperm.xlu0 %4783, %v3887_v46  }
0x2313   : > { %3902 = vperm.xlu1 %4784, %v3888_v35  }
0x2314   : > { %3907 = vperm.xlu0 %4783, %v3889_v16   ;;  %v7160_v16 = vld [vmem:[%s5161_s12 + $0x10] sm:$0xff] }
0x236d   : > { %v3782_v2 = vpop.permute.xlu1 %3781 }
0x236e   : > { %v3784_v45 = vpop.permute.xlu0 %3783 }
0x236f   : > { %v3785_v32 = vsel %vm472_vm7, %v3782_v2, %v3784_v45  ;;  %v3786_v43 = vsel %vm472_vm7, %v3784_v45, %v3782_v2 }
0x2371   : > { %v3788_v30 = vpop.permute.xlu1 %3787 }
0x2372   : > { %v3790_v28 = vpop.permute.xlu0 %3789 }
0x2373   : > { %v3791_v40 = vsel %vm479_vm4, %v3788_v30, %v3790_v28  ;;  %v3792_v50 = vsel %vm479_vm4, %v3790_v28, %v3788_v30 }
0x2374   : > { %v3796_v11 = vsel %vm5058_vm6, %v3785_v32, %v3792_v50  ;;  %v3795_v33 = vsel %vm5054_vm5, %v3786_v43, %v3791_v40  ;;  %v3794_v52 = vsel %vm5075_vm8, %v3792_v50, %v3785_v32  ;;  %v3793_v22 = vsel %vm5079_vm9, %v3791_v40, %v3786_v43  ;;  %v7172_v43 = vld [vmem:[%s5161_s12 + $0x18] sm:$0xff] }
0x2375   : > { %3809 = vmatprep.subr.mxu0 %v3796_v11  ;;  %v3772_v14 = vpop.permute.xlu1 %3771 }
0x2376   : > { %v3774_v31 = vpop.permute.xlu0 %3773  ;;  %3810 = vmatpush1.msra.mxu0 %v3795_v33 }
0x2377   : > { %v3776_v15 = vsel %vm479_vm4, %v3774_v31, %v3772_v14  ;;  %3811 = vmatprep.subr.mxu0 %v3748_v7  ;;  %v3775_v60 = vsel %vm479_vm4, %v3772_v14, %v3774_v31 }
0x2378   : > { %3812 = vmatpush1.msra.mxu0 %v3743_v12  ;;  %v3780_v62 = vsel %vm5058_vm6, %v3769_v51, %v3776_v15  ;;  %v3779_v58 = vsel %vm5054_vm5, %v3770_v5, %v3775_v60  ;;  %v3778_v29 = vsel %vm5075_vm8, %v3776_v15, %v3769_v51  ;;  %v3777_v39 = vsel %vm5079_vm9, %v3775_v60, %v3770_v5  ;;  %v7181_v15 = vld [vmem:[%s5161_s12 + $0x20] sm:$0xff] }
0x2379   : > { %3813 = vmatprep.subr.mxu0 %v3794_v52  ;;  %v3750_v41 = vpop.permute.xlu1 %3749 }
0x237a   : > { %v3752_v9 = vpop.permute.xlu0 %3751  ;;  %3814 = vmatpush1.msra.mxu0 %v3793_v22 }
0x237b   : > { %3815 = vmatprep.subr.mxu0 %v3780_v62  ;;  %v3753_v1 = vsel %vm472_vm7, %v3750_v41, %v3752_v9  ;;  %v3754_v54 = vsel %vm472_vm7, %v3752_v9, %v3750_v41  ;;  %v7188_v9 = vld [vmem:[%s5161_s12 + $0x28] sm:$0xff] }
0x237c   : > { %3816 = vmatpush1.msra.mxu0 %v3779_v58 }
0x237d   : > { %3817 = vmatprep.subr.mxu0 %v7015_v61  ;;  %v3756_v21 = vpop.permute.xlu1 %3755 }
0x237e   : > { %v3758_v0 = vpop.permute.xlu0 %3757  ;;  %3818 = vmatpush1.msra.mxu0 %v7012_v34 }
0x237f   : > { %v3759_v4 = vsel %vm479_vm4, %v3756_v21, %v3758_v0  ;;  %v3760_v63 = vsel %vm479_vm4, %v3758_v0, %v3756_v21  ;;  %3819 = vmatprep.subr.mxu0 %v3778_v29 }
0x2380   : > { %3820 = vmatpush1.msra.mxu0 %v3777_v39  ;;  %v3764_v56 = vsel %vm5058_vm6, %v3753_v1, %v3760_v63  ;;  %v3763_v23 = vsel %vm5054_vm5, %v3754_v54, %v3759_v4  ;;  %v3762_v59 = vsel %vm5075_vm8, %v3760_v63, %v3753_v1  ;;  %v3761_v25 = vsel %vm5079_vm9, %v3759_v4, %v3754_v54  ;;  %v7196_v39 = vld [vmem:[%s5161_s12 + $0x30] sm:$0xff] }
0x2381   : > { %3821 = vmatprep.subr.mxu0 %v3764_v56 }
0x2382   : > { %3822 = vmatpush1.msra.mxu0 %v3763_v23 }
0x2383   : > { %3823 = vmatprep.subr.mxu0 %v7031_v18  ;;  %v7148_v18 = vld [vmem:[%s5161_s12] sm:$0xff] }
0x2384   : > { %3824 = vmatpush1.msra.mxu0 %v3745_v57  ;;  %v7154_v57 = vld [vmem:[%s5161_s12 + $0x8] sm:$0xff] }
0x2385   : > { %3825 = vmatprep.subr.mxu0 %v3762_v59 }
0x2386   : > { %3826 = vmatpush1.msra.mxu0 %v3761_v25  ;;  %v7207_v25 = vld [vmem:[%s5161_s12 + $0x38] sm:$0xff] }
0x2387   : > { %3827 = vmatprep.subr.mxu0 %v7015_v61 }
0x2388   : > { %3828 = vmatpush1.msra.mxu0 %v7012_v34 }
0x2389   : > { %4690 = vmatmul.mubr.msk.f32.vlgmr.msra.gmra.mxu0 %vm530_vm10, %v7118_v49 }
0x238a   : > { %3867 = vmatprep.mubr.f32.mxu0 %v4917_v19  ;;  %v3893_v44 = vpop.permute.xlu1 %3892 }
0x238b   : > { %v3898_v55 = vpop.permute.xlu0 %3897 }
0x238d   : > { %4691 = vmatmul.mubr.msk.f32.gmra.mxu0 %vm530_vm10, %v7126_v48 }
0x238e   : > { %3873 = vmatprep.mubr.f32.mxu0 %v4917_v19  ;;  %v3903_v51 = vpop.permute.xlu1 %3902 }
0x238f   : > { %v3908_v54 = vpop.permute.xlu0 %3907 }
0x2391   : > { %4692 = vmatmul.mubr.msk.f32.gmra.mxu0 %vm530_vm10, %v7134_v6 }
0x2392   : > { %3879 = vmatprep.mubr.f32.mxu0 %v4917_v19 }
0x2395   : > { %4693 = vmatmul.mubr.msk.f32.gmra.mxu0 %vm530_vm10, %v7142_v13 }
0x2396   : > { %4525 = vmatprep.mubr.f32.mxu0 %v4917_v19 }
0x2449   : > { %v3863_v53 = vpop.f32.mrf.mxu0 }
0x244a   : > { %v3864_v12 = vadd.f32 %v7148_v18, %v3863_v53 }
0x244b   : > { %v3865_v7 = vpop.f32.mrf.mxu0 }
0x244c   : > { %v7151_v37 = vadd.f32 %v3893_v44, %v3864_v12  ;;  %v3866_v20 = vadd.f32 %v7154_v57, %v3865_v7 }
0x244d   : > { %v3869_v46 = vpop.f32.mrf.mxu0 }
0x244e   : > { %v7157_v35 = vadd.f32 %v3893_v44, %v3866_v20  ;;  %v3870_v10 = vadd.f32 %v7160_v16, %v3869_v46  ;;  %v3935_v2 = vmul.f32 %v7151_v37, %v7151_v37 }
0x244f   : > { %v3871_v45 = vpop.f32.mrf.mxu0 }
0x2450   : > { %v3918_v30 = vadd.f32 %v7157_v35, %v7151_v37  ;;  %v3936_v28 = vmul.f32 %v7157_v35, %v7157_v35  ;;  %v7169_v32 = vadd.f32 %v3898_v55, %v3870_v10  ;;  %v3872_v40 = vadd.f32 %v7172_v43, %v3871_v45 }
0x2451   : > { %v3875_v50 = vpop.f32.mrf.mxu0 }
0x2452   : > { %v3943_v11 = vadd.f32 %v3936_v28, %v3935_v2  ;;  %v3919_v33 = vadd.f32 %v3918_v30, %v7169_v32  ;;  %v3937_v14 = vmul.f32 %v7169_v32, %v7169_v32  ;;  %v7178_v31 = vadd.f32 %v3898_v55, %v3872_v40 }
0x2453   : > { %v3876_v60 = vadd.f32 %v7181_v15, %v3875_v50  ;;  %v3877_v52 = vpop.f32.mrf.mxu0 }
0x2454   : > { %v3944_v41 = vadd.f32 %v3943_v11, %v3937_v14  ;;  %v3920_v22 = vadd.f32 %v3919_v33, %v7178_v31  ;;  %v3938_v5 = vmul.f32 %v7178_v31, %v7178_v31  ;;  %v3878_v62 = vadd.f32 %v7188_v9, %v3877_v52 }
0x2455   : > { %v7191_v58 = vadd.f32 %v3903_v51, %v3876_v60  ;;  %v3881_v21 = vpop.f32.mrf.mxu0 }
0x2456   : > { %v3945_v0 = vadd.f32 %v3944_v41, %v3938_v5  ;;  %v7193_v29 = vadd.f32 %v3903_v51, %v3878_v62  ;;  %v3882_v1 = vadd.f32 %v7196_v39, %v3881_v21 }
0x2457   : > { %v3921_v4 = vadd.f32 %v3920_v22, %v7191_v58  ;;  %v3939_v63 = vmul.f32 %v7191_v58, %v7191_v58  ;;  %v3883_v56 = vpop.f32.mrf.mxu0 }
0x2458   : > { %v3940_v23 = vmul.f32 %v7193_v29, %v7193_v29  ;;  %v7204_v59 = vadd.f32 %v3908_v54, %v3882_v1  ;;  %v3884_v53 = vadd.f32 %v7207_v25, %v3883_v56  ;;  %v7229_v56 = vld [vmem:[%s7504_s5 + $0x18] sm:$0xff] }
0x2459   : > { %v3946_v12 = vadd.f32 %v3945_v0, %v3939_v63  ;;  %v3922_v44 = vadd.f32 %v3921_v4, %v7193_v29  ;;  %v7223_v4 = vld [vmem:[%s7504_s5 + $0x10] sm:$0xff] }
0x245a   : > { %v3941_v7 = vmul.f32 %v7204_v59, %v7204_v59  ;;  %v7213_v20 = vadd.f32 %v3908_v54, %v3884_v53 }
0x245b   : > { %v3923_v46 = vadd.f32 %v3922_v44, %v7204_v59  ;;  %v3947_v10 = vadd.f32 %v3946_v12, %v3940_v23  ;;  %v7235_v44 = vld [vmem:[%s7504_s5] sm:$0xff] }
0x245c   : > { %v3942_v55 = vmul.f32 %v7213_v20, %v7213_v20 }
0x245d   : > { %v3924_v2 = vadd.f32 %v3923_v46, %v7213_v20  ;;  %v3948_v45 = vadd.f32 %v3947_v10, %v3941_v7  ;;  %v7241_v46 = vld [vmem:[%s7504_s5 + $0x8] sm:$0xff] }
0x245f   : > { %3925 = vadd.xlane.f32.xlu1 %v3924_v2  ;;  %v3949_v30 = vadd.f32 %v3948_v45, %v3942_v55  ;;  %v7247_v55 = vld [vmem:[%s7505_s6 + $0x18] sm:$0xff] }
0x2461   : > { %3950 = vadd.xlane.f32.xlu0 %v3949_v30 }
0x24e8   : > { %v3926_v28 = vpop.xlane.xlu1 %3925 }
0x24e9   : > { %v3927_v40 = vrot.slane %v3926_v28, 4 }
0x24ea   : > { %v3951_v50 = vpop.xlane.xlu0 %3950 }
0x24eb   : > { %v3928_v11 = vadd.f32 %v3927_v40, %v3926_v28  ;;  %v3952_v33 = vrot.slane %v3951_v50, 4  ;;  %v7253_v40 = vld [vmem:[%s7505_s6 + $0x10] sm:$0xff] }
0x24ed   : > { %v3929_v14 = vrot.slane %v3928_v11, 2  ;;  %v3953_v60 = vadd.f32 %v3952_v33, %v3951_v50 }
0x24ef   : > { %v3954_v52 = vrot.slane %v3953_v60, 2  ;;  %v3930_v51 = vadd.f32 %v3929_v14, %v3928_v11  ;;  %v7259_v11 = vld [vmem:[%s7505_s6] sm:$0xff]  ;;  %v7265_v14 = vld [vmem:[%s7505_s6 + $0x8] sm:$0xff] }
0x24f1   : > { %v3931_v41 = vrot.slane %v3930_v51, 1  ;;  %v3955_v22 = vadd.f32 %v3954_v52, %v3953_v60 }
0x24f3   : > { %v3932_v5 = vadd.f32 %v3931_v41, %v3930_v51  ;;  %v3956_v62 = vrot.slane %v3955_v22, 1 }
0x24f5   : > { %4756 = vpush %v3932_v5  ;;  %v3957_v21 = vadd.f32 %v3956_v62, %v3955_v22 }
0x24f7   : > { %4758 = vpush %v3957_v21 }
0x2526   : > { %s4757_s12 = spop %4756 }
0x2527   : > { %s3934_s20 = smul.f32 0.00012207031, %s4757_s12 }
0x2528   : > { %s4759_s21 = spop %4758 }
0x2529   : > { %s3960_s22 = smul.f32 %s3934_s20, %s3934_s20  ;;  %v3972_v53 = vstv %s3934_s20 }
0x252a   : > { %s3959_s29 = smul.f32 0.00012207031, %s4759_s21 }
0x252c   : > { %s3961_s24 = ssub.f32 %s3959_s29, %s3960_s22 }
0x252e   : > { %s3962_s19 = smax.f32 %s4919_s23, %s3961_s24 }
0x252f   : > { %s3963_s25 = sadd.f32 1e-05, %s3962_s19 }
0x2531   : > { %v3964_v0 = vstv %s3963_s25 }
0x2532   : > { %4801 = vrsqrt.f32 %v3964_v0 }
0x253f   : > { %v4802_v1 = vpop.eup %4801 }
0x2540   : > { %4760 = vpush %v4802_v1 }
0x2571   : > { %s4761_s26 = spop %4760 }
0x2572   : > { %v3967_v54 = vstv %s4761_s26 }
0x2573   : > { %v3970_v63 = vmul.f32 %v7223_v4, %v3967_v54  ;;  %v3971_v23 = vmul.f32 %v7229_v56, %v3967_v54  ;;  %v3968_v7 = vmul.f32 %v7235_v44, %v3967_v54  ;;  %v3969_v10 = vmul.f32 %v7241_v46, %v3967_v54 }
0x2575   : > { %v3976_v12 = vmul.f32 %v3972_v53, %v3971_v23  ;;  %3998 = vperm.xlu0 %4783, %v3971_v23   ;;  %3993 = vperm.xlu1 %4784, %v3970_v63   ;;  %v3975_v45 = vmul.f32 %v3972_v53, %v3970_v63  ;;  %v3973_v30 = vmul.f32 %v3972_v53, %v3968_v7 }
0x2576   : > { %v3974_v28 = vmul.f32 %v3972_v53, %v3969_v10 }
0x2577   : > { %v3980_v2 = vsub.f32 %v7247_v55, %v3976_v12  ;;  %v3979_v50 = vsub.f32 %v7253_v40, %v3975_v45  ;;  %v3977_v33 = vsub.f32 %v7259_v11, %v3973_v30 }
0x2578   : > { %v3978_v60 = vsub.f32 %v7265_v14, %v3974_v28 }
0x2579   : > { %3988 = vperm.xlu0 %4783, %v3969_v10   ;;  %4026 = vperm.xlu1 %4784, %v3980_v2  }
0x257d   : > { %3983 = vperm.xlu0 %4783, %v3968_v7   ;;  %4021 = vperm.xlu1 %4784, %v3979_v50  }
0x2581   : > { %4011 = vperm.xlu0 %4783, %v3977_v33   ;;  %4016 = vperm.xlu1 %4784, %v3978_v60  }
0x25f0   : > { %v3999_v52 = vpop.permute.xlu0 %3998  ;;  %v3994_v51 = vpop.permute.xlu1 %3993 }
0x25f1   : > { %v4007_v41 = vmul.f32 %v3999_v52, %v7204_v59  ;;  %v4008_v22 = vmul.f32 %v3999_v52, %v7213_v20  ;;  %v4005_v1 = vmul.f32 %v3994_v51, %v7191_v58  ;;  %v4006_v54 = vmul.f32 %v3994_v51, %v7193_v29 }
0x25f4   : > { %v3989_v5 = vpop.permute.xlu0 %3988  ;;  %v4027_v62 = vpop.permute.xlu1 %4026 }
0x25f5   : > { %v4035_v21 = vadd.f32 %v4027_v62, %v4007_v41  ;;  %v4036_v0 = vadd.f32 %v4027_v62, %v4008_v22  ;;  %v4003_v30 = vmul.f32 %v3989_v5, %v7169_v32  ;;  %v4004_v28 = vmul.f32 %v3989_v5, %v7178_v31 }
0x25f7   : > { %v4043_v63 = vmul.f32 0.01, %v4035_v21  ;;  %v4044_v23 = vmul.f32 0.01, %v4036_v0 }
0x25f8   : > { %v3984_v53 = vpop.permute.xlu0 %3983  ;;  %v4022_v12 = vpop.permute.xlu1 %4021 }
0x25f9   : > { %v4051_v7 = vmax.f32 %v4035_v21, %v4043_v63  ;;  %v4052_v10 = vmax.f32 %v4036_v0, %v4044_v23  ;;  %v4033_v2 = vadd.f32 %v4022_v12, %v4005_v1  ;;  %v4034_v45 = vadd.f32 %v4022_v12, %v4006_v54  ;;  %v7279_v54 = vld [vmem:[%s7506_s7] sm:$0xff]  ;;  %v4695_v63 = vld [vmem:[%s5308_s27 + $0x10] ss:$8 sm:$0x3] }
0x25fa   : > { %v4001_v59 = vmul.f32 %v3984_v53, %v7151_v37  ;;  %v4002_v20 = vmul.f32 %v3984_v53, %v7157_v35  ;;  %v4130_v23 = vrot.slane %v4695_v63, %v5310_v24 }
0x25fb   : > { %v4041_v50 = vmul.f32 0.01, %v4033_v2  ;;  %v4042_v58 = vmul.f32 0.01, %v4034_v45  ;;  %4077 = vmatprep.subr.mxu1 %v4052_v10 }
0x25fc   : > { %v4012_v29 = vpop.permute.xlu0 %4011  ;;  %4078 = vmatpush1.msra.mxu1 %v4051_v7  ;;  %v4017_v33 = vpop.permute.xlu1 %4016  ;;  %v4134_v7 = vrot.slane %v4695_v63, %v5313_v42 }
0x25fd   : > { %v4029_v60 = vadd.f32 %v4012_v29, %v4001_v59  ;;  %v4030_v52 = vadd.f32 %v4012_v29, %v4002_v20  ;;  %v4049_v51 = vmax.f32 %v4033_v2, %v4041_v50  ;;  %v4050_v41 = vmax.f32 %v4034_v45, %v4042_v58 }
0x25fe   : > { %v4031_v22 = vadd.f32 %v4017_v33, %v4003_v30  ;;  %v4032_v62 = vadd.f32 %v4017_v33, %v4004_v28 }
0x25ff   : > { %v4038_v35 = vmul.f32 0.01, %v4030_v52  ;;  %4079 = vmatprep.subr.mxu1 %v4050_v41  ;;  %v4037_v32 = vmul.f32 0.01, %v4029_v60  ;;  %v4294_v41 = vmul.f32 0.9, %v4901_v8 }
0x2600   : > { %v4039_v21 = vmul.f32 0.01, %v4031_v22  ;;  %v4040_v37 = vmul.f32 0.01, %v4032_v62  ;;  %4080 = vmatpush1.msra.mxu1 %v4049_v51 }
0x2601   : > { %v4046_v0 = vmax.f32 %v4030_v52, %v4038_v35  ;;  %v4045_v1 = vmax.f32 %v4029_v60, %v4037_v32 }
0x2602   : > { %v4047_v31 = vmax.f32 %v4031_v22, %v4039_v21  ;;  %v4048_v5 = vmax.f32 %v4032_v62, %v4040_v37  ;;  %v4295_v22 = vmul.f32 0.9, %v4902_v17  ;;  %v4903_v62 = vld [vmem:[%s7503_s4 + $0x10] sm:$0xff]  ;;  %v4904_v37 = vld [vmem:[%s7503_s4 + $0x18] sm:$0xff] }
0x2603   : > { %v4296_v21 = vmul.f32 0.9, %v4903_v62  ;;  %v4297_v35 = vmul.f32 0.9, %v4904_v37 }
0x2604   : > { %4081 = vmatprep.subr.mxu1 %v4048_v5 }
0x2605   : > { %4082 = vmatpush1.msra.mxu1 %v4047_v31 }
0x2606   : > { %4083 = vmatprep.subr.mxu1 %v4046_v0 }
0x2607   : > { %4084 = vmatpush1.msra.mxu1 %v4045_v1 }
0x2608   : > { %4694 = vmatmul.mubr.msk.f32.vlgmr.msra.gmra.mxu1 %vm782_vm11, %v7279_v54 }
0x2609   : > { %4269 = vmatprep.mubr.f32.mxu1 %v4917_v19 }
0x26c8   : > { %v4119_v53 = vpop.f32.mrf.mxu1 }
0x26c9   : > { %v4120_v12 = vadd.f32 %v4119_v53, %v5316_v47 }
0x26ca   : > { %v4121_v10 = vpop.f32.mrf.mxu1 }
0x26cb   : > { %v4137_v2 = vmul.f32 %v4130_v23, %v4120_v12  ;;  %v4122_v45 = vadd.f32 %v4121_v10, %v5316_v47 }
0x26cd   : > { %v7290_v59 = vadd.f32 %v4137_v2, %v7012_v34  ;;  %v4138_v20 = vmul.f32 %v4134_v7, %v4122_v45 }
0x26cf   : > { %v7293_v30 = vadd.f32 %v4138_v20, %v7015_v61  ;;  %4141 = vrot.lane.b32.xlu1 %v7290_v59, %s4914_s16 }
0x26d1   : > { %4143 = vrot.lane.b32.xlu0 %v7293_v30, %s4914_s16 }
0x26d3   : > { %4147 = vrot.lane.b32.xlu1 %v7290_v59, %s4913_s15 }
0x26d5   : > { %4149 = vrot.lane.b32.xlu0 %v7293_v30, %s4913_s15 }
0x26d7   : > { %4173 = vrot.lane.b32.xlu1 %v7290_v59, %s4915_s17 }
0x26d9   : > { %4175 = vrot.lane.b32.xlu0 %v7293_v30, %s4915_s17 }
0x2741   : > { %v4142_v34 = vpop.permute.xlu1 %4141 }
0x2743   : > { %v4144_v61 = vpop.permute.xlu0 %4143 }
0x2744   : > { %v7309_v58 = vsel %vm454_vm1, %v4142_v34, %v4144_v61  ;;  %v4146_v52 = vsel %vm454_vm1, %v4144_v61, %v4142_v34 }
0x2745   : > { %v4148_v28 = vpop.permute.xlu1 %4147 }
0x2747   : > { %v4150_v50 = vpop.permute.xlu0 %4149 }
0x2748   : > { %v4151_v29 = vsel %vm461_vm0, %v4148_v28, %v4150_v50  ;;  %v4152_v33 = vsel %vm461_vm0, %v4150_v50, %v4148_v28 }
0x2749   : > { %4189 = vrot.lane.b32.xlu1 %v4151_v29, %s4915_s17  ;;  %v4156_v60 = vsel %vm5008_vm2, %v7309_v58, %v4152_v33  ;;  %v7330_v51 = vsel %vm5032_vm3, %v4151_v29, %v4146_v52  ;;  %v4174_v32 = vpop.permute.xlu1 %4173 }
0x274a   : > { %4191 = vrot.lane.b32.xlu0 %v4156_v60, %s4915_s17 }
0x274b   : > { %v4176_v31 = vpop.permute.xlu0 %4175 }
0x274c   : > { %v4177_v50 = vsel %vm472_vm7, %v4174_v32, %v4176_v31  ;;  %v4178_v8 = vsel %vm472_vm7, %v4176_v31, %v4174_v32 }
0x274d   : > { %4195 = vrot.lane.b32.xlu1 %v4151_v29, %s4916_s18 }
0x274e   : > { %4197 = vrot.lane.b32.xlu0 %v4156_v60, %s4916_s18 }
0x2751   : > { %4179 = vrot.lane.b32.xlu1 %v7290_v59, %s4916_s18 }
0x2752   : > { %4181 = vrot.lane.b32.xlu0 %v7293_v30, %s4916_s18 }
0x2755   : > { %4157 = vrot.lane.b32.xlu1 %v7330_v51, %s4915_s17 }
0x2756   : > { %4159 = vrot.lane.b32.xlu0 %v7309_v58, %s4915_s17 }
0x2759   : > { %4163 = vrot.lane.b32.xlu1 %v7330_v51, %s4916_s18 }
0x275a   : > { %4165 = vrot.lane.b32.xlu0 %v7309_v58, %s4916_s18 }
0x275d   : > { %4300 = vperm.xlu1 %4784, %v4294_v41  }
0x275e   : > { %4305 = vperm.xlu0 %4783, %v4295_v22  }
0x2761   : > { %4310 = vperm.xlu1 %4784, %v4296_v21  }
0x2762   : > { %4315 = vperm.xlu0 %4783, %v4297_v35  }
0x27bb   : > { %v4190_v5 = vpop.permute.xlu1 %4189 }
0x27bc   : > { %v4192_v0 = vpop.permute.xlu0 %4191 }
0x27bd   : > { %v4193_v23 = vsel %vm472_vm7, %v4190_v5, %v4192_v0  ;;  %v4194_v53 = vsel %vm472_vm7, %v4192_v0, %v4190_v5 }
0x27bf   : > { %v4196_v1 = vpop.permute.xlu1 %4195 }
0x27c0   : > { %v4198_v63 = vpop.permute.xlu0 %4197 }
0x27c1   : > { %v4199_v12 = vsel %vm479_vm4, %v4196_v1, %v4198_v63  ;;  %v4200_v7 = vsel %vm479_vm4, %v4198_v63, %v4196_v1 }
0x27c2   : > { %v4204_v10 = vsel %vm5058_vm6, %v4193_v23, %v4200_v7  ;;  %v4203_v2 = vsel %vm5054_vm5, %v4194_v53, %v4199_v12  ;;  %v4202_v28 = vsel %vm5075_vm8, %v4200_v7, %v4193_v23  ;;  %v4201_v52 = vsel %vm5079_vm9, %v4199_v12, %v4194_v53 }
0x27c3   : > { %4217 = vmatprep.subr.mxu1 %v4204_v10  ;;  %v4180_v45 = vpop.permute.xlu1 %4179 }
0x27c4   : > { %v4182_v20 = vpop.permute.xlu0 %4181  ;;  %4218 = vmatpush1.msra.mxu1 %v4203_v2 }
0x27c5   : > { %v4184_v34 = vsel %vm479_vm4, %v4182_v20, %v4180_v45  ;;  %4219 = vmatprep.subr.mxu1 %v4156_v60  ;;  %v4183_v61 = vsel %vm479_vm4, %v4180_v45, %v4182_v20 }
0x27c6   : > { %4220 = vmatpush1.msra.mxu1 %v4151_v29  ;;  %v4188_v60 = vsel %vm5058_vm6, %v4177_v50, %v4184_v34  ;;  %v4187_v29 = vsel %vm5054_vm5, %v4178_v8, %v4183_v61  ;;  %v4186_v62 = vsel %vm5075_vm8, %v4184_v34, %v4177_v50  ;;  %v4185_v21 = vsel %vm5079_vm9, %v4183_v61, %v4178_v8 }
0x27c7   : > { %4221 = vmatprep.subr.mxu1 %v4202_v28  ;;  %v4158_v33 = vpop.permute.xlu1 %4157 }
0x27c8   : > { %v4160_v41 = vpop.permute.xlu0 %4159  ;;  %4222 = vmatpush1.msra.mxu1 %v4201_v52 }
0x27c9   : > { %4223 = vmatprep.subr.mxu1 %v4188_v60  ;;  %v4161_v37 = vsel %vm472_vm7, %v4158_v33, %v4160_v41  ;;  %v4162_v35 = vsel %vm472_vm7, %v4160_v41, %v4158_v33 }
0x27ca   : > { %4224 = vmatpush1.msra.mxu1 %v4187_v29 }
0x27cb   : > { %4225 = vmatprep.subr.mxu1 %v7293_v30  ;;  %v4164_v17 = vpop.permute.xlu1 %4163 }
0x27cc   : > { %v4166_v22 = vpop.permute.xlu0 %4165  ;;  %4226 = vmatpush1.msra.mxu1 %v7290_v59 }
0x27cd   : > { %v4167_v32 = vsel %vm479_vm4, %v4164_v17, %v4166_v22  ;;  %v4168_v31 = vsel %vm479_vm4, %v4166_v22, %v4164_v17  ;;  %4227 = vmatprep.subr.mxu1 %v4186_v62 }
0x27ce   : > { %4228 = vmatpush1.msra.mxu1 %v4185_v21  ;;  %v4172_v5 = vsel %vm5058_vm6, %v4161_v37, %v4168_v31  ;;  %v4171_v0 = vsel %vm5054_vm5, %v4162_v35, %v4167_v32  ;;  %v4170_v1 = vsel %vm5075_vm8, %v4168_v31, %v4161_v37  ;;  %v4169_v3 = vsel %vm5079_vm9, %v4167_v32, %v4162_v35 }
0x27cf   : > { %4229 = vmatprep.subr.mxu1 %v4172_v5 }
0x27d0   : > { %4230 = vmatpush1.msra.mxu1 %v4171_v0 }
0x27d1   : > { %4231 = vmatprep.subr.mxu1 %v7309_v58 }
0x27d2   : > { %4232 = vmatpush1.msra.mxu1 %v7330_v51 }
0x27d3   : > { %4233 = vmatprep.subr.mxu1 %v4170_v1 }
0x27d4   : > { %4234 = vmatpush1.msra.mxu1 %v4169_v3 }
0x27d5   : > { %4235 = vmatprep.subr.mxu1 %v7293_v30 }
0x27d6   : > { %4236 = vmatpush1.msra.mxu1 %v7290_v59 }
0x27d7   : > { %4696 = vmatmul.mubr.msk.f32.vlgmr.msra.gmra.mxu1 %vm530_vm10, %v7118_v49 }
0x27d8   : > { %4275 = vmatprep.mubr.f32.mxu1 %v4917_v19  ;;  %v4301_v36 = vpop.permute.xlu1 %4300 }
0x27db   : > { %4697 = vmatmul.mubr.msk.f32.gmra.mxu1 %vm530_vm10, %v7126_v48 }
0x27dc   : > { %4281 = vmatprep.mubr.f32.mxu1 %v4917_v19  ;;  %v4311_v34 = vpop.permute.xlu1 %4310 }
0x27df   : > { %4698 = vmatmul.mubr.msk.f32.gmra.mxu1 %vm530_vm10, %v7134_v6  ;;  %v4306_v6 = vpop.permute.xlu0 %4305 }
0x27e0   : > { %4287 = vmatprep.mubr.f32.mxu1 %v4917_v19 }
0x27e3   : > { %4699 = vmatmul.mubr.msk.f32.gmra.mxu1 %vm530_vm10, %v7142_v13  ;;  %v4316_v29 = vpop.permute.xlu0 %4315 }
0x2897   : > { %v4271_v26 = vpop.f32.mrf.mxu1 }
0x2898   : > { %v4272_v27 = vadd.f32 %v7148_v18, %v4271_v26 }
0x2899   : > { %v4273_v38 = vpop.f32.mrf.mxu1 }
0x289a   : > { %v7418_v49 = vadd.f32 %v4301_v36, %v4272_v27  ;;  %v4274_v58 = vadd.f32 %v7154_v57, %v4273_v38 }
0x289b   : > { %v4277_v48 = vpop.f32.mrf.mxu1 }
0x289c   : > { %v7421_v51 = vadd.f32 %v4301_v36, %v4274_v58  ;;  %v4278_v63 = vadd.f32 %v7160_v16, %v4277_v48  ;;  %v4343_v19 = vmul.f32 %v7418_v49, %v7418_v49 }
0x289d   : > { %v4279_v23 = vpop.f32.mrf.mxu1 }
0x289e   : > { %v4326_v13 = vadd.f32 %v7421_v51, %v7418_v49  ;;  %v4344_v18 = vmul.f32 %v7421_v51, %v7421_v51  ;;  %v7430_v53 = vadd.f32 %v4306_v6, %v4278_v63  ;;  %v4280_v57 = vadd.f32 %v7172_v43, %v4279_v23 }
0x289f   : > { %v4283_v12 = vpop.f32.mrf.mxu1 }
0x28a0   : > { %v4351_v7 = vadd.f32 %v4344_v18, %v4343_v19  ;;  %v4327_v10 = vadd.f32 %v4326_v13, %v7430_v53  ;;  %v4345_v16 = vmul.f32 %v7430_v53, %v7430_v53  ;;  %v7436_v2 = vadd.f32 %v4306_v6, %v4280_v57 }
0x28a1   : > { %v4284_v45 = vadd.f32 %v7181_v15, %v4283_v12  ;;  %v4285_v20 = vpop.f32.mrf.mxu1 }
0x28a2   : > { %v4352_v61 = vadd.f32 %v4351_v7, %v4345_v16  ;;  %v4328_v28 = vadd.f32 %v4327_v10, %v7436_v2  ;;  %v4346_v50 = vmul.f32 %v7436_v2, %v7436_v2  ;;  %v4286_v43 = vadd.f32 %v7188_v9, %v4285_v20 }
0x28a3   : > { %v7443_v33 = vadd.f32 %v4311_v34, %v4284_v45  ;;  %v4289_v52 = vpop.f32.mrf.mxu1 }
0x28a4   : > { %v4353_v8 = vadd.f32 %v4352_v61, %v4346_v50  ;;  %v7445_v41 = vadd.f32 %v4311_v34, %v4286_v43  ;;  %v4290_v60 = vadd.f32 %v7196_v39, %v4289_v52 }
0x28a5   : > { %v4329_v15 = vadd.f32 %v4328_v28, %v7443_v33  ;;  %v4347_v17 = vmul.f32 %v7443_v33, %v7443_v33  ;;  %v4291_v22 = vpop.f32.mrf.mxu1 }
0x28a6   : > { %v4348_v62 = vmul.f32 %v7445_v41, %v7445_v41  ;;  %v7453_v21 = vadd.f32 %v4316_v29, %v4290_v60  ;;  %v4292_v9 = vadd.f32 %v7207_v25, %v4291_v22 }
0x28a7   : > { %v4354_v37 = vadd.f32 %v4353_v8, %v4347_v17  ;;  %v4330_v35 = vadd.f32 %v4329_v15, %v7445_v41 }
0x28a8   : > { %v4349_v39 = vmul.f32 %v7453_v21, %v7453_v21  ;;  %v7459_v32 = vadd.f32 %v4316_v29, %v4292_v9 }
0x28a9   : > { %v4331_v31 = vadd.f32 %v4330_v35, %v7453_v21  ;;  %v4355_v5 = vadd.f32 %v4354_v37, %v4348_v62 }
0x28aa   : > { %v4350_v0 = vmul.f32 %v7459_v32, %v7459_v32 }
0x28ab   : > { %v4332_v1 = vadd.f32 %v4331_v31, %v7459_v32  ;;  %v4356_v3 = vadd.f32 %v4355_v5, %v4349_v39 }
0x28ad   : > { %4333 = vadd.xlane.f32.xlu1 %v4332_v1  ;;  %v4357_v26 = vadd.f32 %v4356_v3, %v4350_v0 }
0x28af   : > { %4358 = vadd.xlane.f32.xlu0 %v4357_v26 }
0x2936   : > { %v4334_v25 = vpop.xlane.xlu1 %4333 }
0x2937   : > { %v4335_v27 = vrot.slane %v4334_v25, 4 }
0x2938   : > { %v4359_v36 = vpop.xlane.xlu0 %4358 }
0x2939   : > { %v4336_v38 = vadd.f32 %v4335_v27, %v4334_v25  ;;  %v4360_v58 = vrot.slane %v4359_v36, 4 }
0x293b   : > { %v4337_v48 = vrot.slane %v4336_v38, 2  ;;  %v4361_v63 = vadd.f32 %v4360_v58, %v4359_v36 }
0x293d   : > { %v4362_v6 = vrot.slane %v4361_v63, 2  ;;  %v4338_v19 = vadd.f32 %v4337_v48, %v4336_v38 }
0x293f   : > { %v4339_v23 = vrot.slane %v4338_v19, 1  ;;  %v4363_v13 = vadd.f32 %v4362_v6, %v4361_v63 }
0x2941   : > { %v4340_v18 = vadd.f32 %v4339_v23, %v4338_v19  ;;  %v4364_v57 = vrot.slane %v4363_v13, 1 }
0x2943   : > { %4762 = vpush %v4340_v18  ;;  %v4365_v12 = vadd.f32 %v4364_v57, %v4363_v13  ;;  %v4701_v57 = vld [vmem:[%s5308_s27 + $0x11] ss:$8 sm:$0x3] }
0x2945   : > { %4764 = vpush %v4365_v12  ;;  %v4538_v12 = vrot.slane %v4701_v57, %v5310_v24 }
0x2974   : > { %s4763_s18 = spop %4762 }
0x2975   : > { %s4342_s20 = smul.f32 0.00012207031, %s4763_s18 }
0x2976   : > { %s4765_s25 = spop %4764 }
0x2977   : > { %s4368_s26 = smul.f32 %s4342_s20, %s4342_s20  ;;  %v4380_v34 = vstv %s4342_s20 }
0x2978   : > { %s4367_s28 = smul.f32 0.00012207031, %s4765_s25 }
0x297a   : > { %s4369_s14 = ssub.f32 %s4367_s28, %s4368_s26 }
0x297c   : > { %s4370_s11 = smax.f32 %s4919_s23, %s4369_s14  ;;  %s7522_s23 = sshll.u32 %s7524_s10, 4 }
0x297d   : > { %s4371_s13 = sadd.f32 1e-05, %s4370_s11  ;;  %s372_s21 = scalar_lea.vmem %s7508_s9, %s7522_s23 }
0x297f   : > { %v4372_v7 = vstv %s4371_s13 }
0x2980   : > { %4803 = vrsqrt.f32 %v4372_v7 }
0x298d   : > { %v4804_v10 = vpop.eup %4803 }
0x298e   : > { %4766 = vpush %v4804_v10 }
0x29bf   : > { %s4767_s12 = spop %4766 }
0x29c0   : > { %v4375_v16 = vstv %s4767_s12 }
0x29c1   : > { %v4378_v45 = vmul.f32 %v7223_v4, %v4375_v16  ;;  %v4379_v20 = vmul.f32 %v7229_v56, %v4375_v16  ;;  %v4376_v28 = vmul.f32 %v7235_v44, %v4375_v16  ;;  %v4377_v50 = vmul.f32 %v7241_v46, %v4375_v16 }
0x29c2   : > { %v4542_v16 = vrot.slane %v4701_v57, %v5313_v42 }
0x29c3   : > { %v4384_v61 = vmul.f32 %v4380_v34, %v4379_v20  ;;  %4406 = vperm.xlu0 %4783, %v4379_v20   ;;  %4401 = vperm.xlu1 %4784, %v4378_v45   ;;  %v4383_v52 = vmul.f32 %v4380_v34, %v4378_v45  ;;  %v4381_v8 = vmul.f32 %v4380_v34, %v4376_v28 }
0x29c4   : > { %v4382_v60 = vmul.f32 %v4380_v34, %v4377_v50 }
0x29c5   : > { %v4388_v43 = vsub.f32 %v7247_v55, %v4384_v61  ;;  %v4387_v29 = vsub.f32 %v7253_v40, %v4383_v52  ;;  %v4385_v4 = vsub.f32 %v7259_v11, %v4381_v8 }
0x29c6   : > { %v4386_v56 = vsub.f32 %v7265_v14, %v4382_v60 }
0x29c7   : > { %4396 = vperm.xlu0 %4783, %v4377_v50   ;;  %4434 = vperm.xlu1 %4784, %v4388_v43  }
0x29cb   : > { %4391 = vperm.xlu0 %4783, %v4376_v28   ;;  %4429 = vperm.xlu1 %4784, %v4387_v29  }
0x29cf   : > { %4419 = vperm.xlu0 %4783, %v4385_v4   ;;  %4424 = vperm.xlu1 %4784, %v4386_v56  }
0x2a3e   : > { %v4407_v44 = vpop.permute.xlu0 %4406  ;;  %v4402_v15 = vpop.permute.xlu1 %4401 }
0x2a3f   : > { %v4415_v46 = vmul.f32 %v4407_v44, %v7453_v21  ;;  %v4416_v55 = vmul.f32 %v4407_v44, %v7459_v32  ;;  %v4413_v40 = vmul.f32 %v4402_v15, %v7443_v33  ;;  %v4414_v37 = vmul.f32 %v4402_v15, %v7445_v41 }
0x2a42   : > { %v4397_v17 = vpop.permute.xlu0 %4396  ;;  %v4435_v22 = vpop.permute.xlu1 %4434 }
0x2a43   : > { %v4443_v62 = vadd.f32 %v4435_v22, %v4415_v46  ;;  %v4444_v9 = vadd.f32 %v4435_v22, %v4416_v55  ;;  %v4411_v3 = vmul.f32 %v4397_v17, %v7430_v53  ;;  %v4412_v26 = vmul.f32 %v4397_v17, %v7436_v2 }
0x2a45   : > { %v4451_v35 = vmul.f32 0.01, %v4443_v62  ;;  %v4452_v11 = vmul.f32 0.01, %v4444_v9 }
0x2a46   : > { %v4392_v39 = vpop.permute.xlu0 %4391  ;;  %v4430_v14 = vpop.permute.xlu1 %4429 }
0x2a47   : > { %v4459_v31 = vmax.f32 %v4443_v62, %v4451_v35  ;;  %v4460_v5 = vmax.f32 %v4444_v9, %v4452_v11  ;;  %v4441_v0 = vadd.f32 %v4430_v14, %v4413_v40  ;;  %v4442_v1 = vadd.f32 %v4430_v14, %v4414_v37 }
0x2a48   : > { %v4409_v21 = vmul.f32 %v4392_v39, %v7418_v49  ;;  %v4410_v32 = vmul.f32 %v4392_v39, %v7421_v51 }
0x2a49   : > { %v4449_v25 = vmul.f32 0.01, %v4441_v0  ;;  %v4450_v33 = vmul.f32 0.01, %v4442_v1  ;;  %4485 = vmatprep.subr.mxu0 %v4460_v5 }
0x2a4a   : > { %v4420_v41 = vpop.permute.xlu0 %4419  ;;  %4486 = vmatpush1.msra.mxu0 %v4459_v31  ;;  %v4425_v27 = vpop.permute.xlu1 %4424 }
0x2a4b   : > { %v4437_v36 = vadd.f32 %v4420_v41, %v4409_v21  ;;  %v4438_v38 = vadd.f32 %v4420_v41, %v4410_v32  ;;  %v4457_v58 = vmax.f32 %v4441_v0, %v4449_v25  ;;  %v4458_v48 = vmax.f32 %v4442_v1, %v4450_v33 }
0x2a4c   : > { %v4439_v63 = vadd.f32 %v4425_v27, %v4411_v3  ;;  %v4440_v6 = vadd.f32 %v4425_v27, %v4412_v26 }
0x2a4d   : > { %v4446_v51 = vmul.f32 0.01, %v4438_v38  ;;  %4487 = vmatprep.subr.mxu0 %v4458_v48  ;;  %v4445_v53 = vmul.f32 0.01, %v4437_v36 }
0x2a4e   : > { %v4447_v49 = vmul.f32 0.01, %v4439_v63  ;;  %v4448_v19 = vmul.f32 0.01, %v4440_v6  ;;  %4488 = vmatpush1.msra.mxu0 %v4457_v58 }
0x2a4f   : > { %v4454_v13 = vmax.f32 %v4438_v38, %v4446_v51  ;;  %v4453_v18 = vmax.f32 %v4437_v36, %v4445_v53 }
0x2a50   : > { %v4455_v2 = vmax.f32 %v4439_v63, %v4447_v49  ;;  %v4456_v23 = vmax.f32 %v4440_v6, %v4448_v19 }
0x2a52   : > { %4489 = vmatprep.subr.mxu0 %v4456_v23 }
0x2a53   : > { %4490 = vmatpush1.msra.mxu0 %v4455_v2 }
0x2a54   : > { %4491 = vmatprep.subr.mxu0 %v4454_v13 }
0x2a55   : > { %4492 = vmatpush1.msra.mxu0 %v4453_v18 }
0x2a56   : > { %4700 = vmatmul.mubr.msk.f32.vlgmr.msra.gmra.mxu0 %vm782_vm11, %v7279_v54 }
0x2b16   : > { %v4527_v7 = vpop.f32.mrf.mxu0 }
0x2b17   : > { %v4528_v10 = vadd.f32 %v4527_v7, %v5316_v47 }
0x2b18   : > { %v4529_v45 = vpop.f32.mrf.mxu0 }
0x2b19   : > { %v4545_v20 = vmul.f32 %v4538_v12, %v4528_v10  ;;  %v4530_v34 = vadd.f32 %v4529_v45, %v5316_v47 }
0x2b1b   : > { %v4547_v61 = vadd.f32 %v4545_v20, %v7290_v59  ;;  %v4546_v54 = vmul.f32 %v4542_v16, %v4530_v34 }
0x2b1d   : > { %4549 = vst [vmem:[%s372_s21] sm:$0xff] %v4547_v61  ;;  %v4548_v24 = vadd.f32 %v4546_v54, %v7293_v30 }
0x2b1f   : > { %4550 = vst [vmem:[%s372_s21 + $0x8] sm:$0xff] %v4548_v24 }
0x2b20 PF: > { %s19_s30 = sadd.s32 1, %s4911_s30  }
0x2b21   : > { %p16_p4 = scmp.ge.s32.totalorder %s19_s30, 4  }
0x2b23   :  { %18 = sbr.rel (!%p16_p4) target bundleno = 1 (0x1), region = 101 }

</bundles_post_ra>
